<compile_context>
chip_gen: v6e
topology: v6e:2x2x1
jax: 0.10.0
libtpu: 0.0.40
codegen_flags: <defaults>
</compile_context>

<pallas_src>
import functools

import jax
import jax.numpy as jnp
from jax import lax
from jax.experimental import pallas as pl
from jax.experimental.pallas import tpu as pltpu


def _residual2d_kernel(x_ref, w_ref, b_ref, m_ref, o_ref, p2_ref, *,
                       G, C, KH, KW, D, Wp, JOUT, lead, base, FLAT):
    # x_ref : (G, C, FLAT)   padded inputs, spatial flattened row-major (stride Wp), lead-aligned
    # w_ref : (KH*KW, C, C)  w_ref[kh*KW+kw, co, ci] = weight[co, ci, kh, kw]
    # b_ref : (C, 1)         bias
    # m_ref : (1, JOUT)      1.0 on real pixels of the strided output axis, 0.0 elsewhere
    # o_ref : (G, C, JOUT)   strided-layout outputs (un-strided in the wrapper)
    # p2_ref: (C, FLAT)      VMEM scratch: zero-padded input of the second conv

    # ---- hoisted once per grid step, reused by both convolutions and all packed images ----
    w_all = w_ref[...]                                   # (KH*KW, C, C)
    bias_b = jnp.broadcast_to(b_ref[...], (C, JOUT))     # lane-broadcast bias = accumulator init
    mask = m_ref[...]                                    # (1, JOUT)

    def dilated_conv(load_slab):
        # 'same' conv with dilation D: out[:, j] = b + sum_t W_t @ src[:, j + off_t]  (MXU dots)
        acc = bias_b                                     # (C, JOUT) f32
        for kh in range(KH):
            for kw in range(KW):
                t = kh * KW + kw
                off = lead + kh * D * Wp + kw * D
                acc = acc + jnp.dot(w_all[t], load_slab(off),
                                    preferred_element_type=jnp.float32,
                                    precision=lax.Precision.HIGHEST)
        return acc

    # Scratch border zeroing: once per grid step (interior is fully overwritten for every image).
    # Kept per-step (not pid==0) so the batch grid axis can stay "parallel" (scratch per-core).
    # `base` and FLAT are multiples of 128 -> unmasked full-lane stores.
    if base > 0:
        p2_ref[:, 0:base] = jnp.zeros((C, base), jnp.float32)
    if FLAT - (base + JOUT) > 0:
        p2_ref[:, base + JOUT:FLAT] = jnp.zeros((C, FLAT - base - JOUT), jnp.float32)

    for g in range(G):                                   # static unroll over packed images
        # conv -> ReLU; zero everything that is not a real pixel so conv2 sees clean 'same' padding
        y = jnp.maximum(dilated_conv(lambda off, g=g: x_ref[g, :, off:off + JOUT]), 0.0)
        p2_ref[:, base:base + JOUT] = y * mask
        # conv -> residual add (the interior slab of the padded input is exactly the original x)
        y2 = dilated_conv(lambda off: p2_ref[:, off:off + JOUT])
        o_ref[g] = (y2 + x_ref[g, :, base:base + JOUT]).astype(o_ref.dtype)


def residual2d_block_forward(x, weight, bias, *, filter_size=(3, 3), dilation=5):
    """x: (B, C, H, W); weight: (C, C, KH, KW); bias: (C,).  Returns (B, C, H, W)."""
    B, C, H, W = x.shape
    KH, KW = filter_size
    D = dilation
    tot_h, tot_w = D * (KH - 1), D * (KW - 1)
    pt, pb = tot_h // 2, tot_h - tot_h // 2          # PyTorch 'same': extra pad goes bottom/right
    pleft, pr = tot_w // 2, tot_w - tot_w // 2
    Hp, Wp = H + tot_h, W + tot_w

    JV = H * Wp                                      # valid length of the strided output axis
    JOUT = ((JV + 127) // 128) * 128                 # lane-dense working / output width
    off_max = (KH - 1) * D * Wp + (KW - 1) * D       # largest tap offset (= interior offset * 2)
    base0 = pt * Wp + pleft                          # flat offset of pixel (0, 0) inside padded img
    LEAD = (-base0) % 128                            # leading pad -> base is 128-aligned
    base = LEAD + base0
    FLAT = ((LEAD + off_max + JOUT + 127) // 128) * 128

    # Pack 2 images per grid step to fill sublanes / amortize per-step overhead, but only when it
    # keeps the batch grid length >= 2 (two v7x TensorCores under "parallel" semantics).
    G = 2 if (B % 2 == 0 and B >= 4) else 1

    # ---- host-side layout plumbing (cheap XLA pads/reshapes) ----
    xp = jnp.pad(x.astype(jnp.float32), ((0, 0), (0, 0), (pt, pb), (pleft, pr)))
    xp = xp.reshape(B, C, Hp * Wp)
    xp = jnp.pad(xp, ((0, 0), (0, 0), (LEAD, FLAT - LEAD - Hp * Wp)))

    # (C_out, C_in, KH, KW) -> (KH*KW, C_out, C_in): per-tap channel-mix matrices
    wstk = jnp.transpose(weight.astype(jnp.float32), (2, 3, 0, 1)).reshape(KH * KW, C, C)
    bcol = bias.astype(jnp.float32).reshape(C, 1)

    j = jnp.arange(JOUT)
    mask = (((j % Wp) < W) & (j < JV)).astype(jnp.float32).reshape(1, JOUT)

    kernel = functools.partial(_residual2d_kernel, G=G, C=C, KH=KH, KW=KW, D=D,
                               Wp=Wp, JOUT=JOUT, lead=LEAD, base=base, FLAT=FLAT)

    out = pl.pallas_call(
        kernel,
        out_shape=jax.ShapeDtypeStruct((B, C, JOUT), jnp.float32),
        grid_spec=pltpu.PrefetchScalarGridSpec(
            num_scalar_prefetch=0,
            grid=(B // G,),
            in_specs=[
                pl.BlockSpec((G, C, FLAT), lambda b: (b, 0, 0)),
                pl.BlockSpec((KH * KW, C, C), lambda b: (0, 0, 0)),
                pl.BlockSpec((C, 1), lambda b: (0, 0)),
                pl.BlockSpec((1, JOUT), lambda b: (0, 0)),
            ],
            out_specs=pl.BlockSpec((G, C, JOUT), lambda b: (b, 0, 0)),
            scratch_shapes=[pltpu.VMEM((C, FLAT), jnp.float32)],
        ),
        compiler_params=pltpu.CompilerParams(dimension_semantics=("parallel",)),
    )(xp, wstk, bcol, mask)

    # un-stride: (B, C, JOUT) -> (B, C, H, Wp) -> (B, C, H, W)
    out = out[:, :, :JV].reshape(B, C, H, Wp)[:, :, :, :W]
    return out.astype(x.dtype)


def reference_forward(x, weight, bias, *, filter_size=(3, 3), dilation=5):
    """Pure-JAX reference mirroring the PyTorch Residual2DBlock."""
    KH, KW = filter_size
    D = dilation
    tot_h, tot_w = D * (KH - 1), D * (KW - 1)
    pad = ((tot_h // 2, tot_h - tot_h // 2), (tot_w // 2, tot_w - tot_w // 2))

    def conv(inp):
        out = lax.conv_general_dilated(
            inp, weight, window_strides=(1, 1), padding=pad,
            rhs_dilation=(D, D), dimension_numbers=('NCHW', 'OIHW', 'NCHW'),
            precision=lax.Precision.HIGHEST)
        return out + bias[None, :, None, None]

    y = jnp.maximum(conv(x), 0.0)
    return conv(y) + x


if __name__ == "__main__":
    B, C, H, W = 2, 4, 16, 16
    filter_size = (3, 3)
    dilation = 5

    key = jax.random.PRNGKey(0)
    kx, kw, kb = jax.random.split(key, 3)
    x = jax.random.normal(kx, (B, C, H, W), dtype=jnp.float32)
    weight = jax.random.normal(kw, (C, C, *filter_size), dtype=jnp.float32) * 0.1
    bias = jax.random.normal(kb, (C,), dtype=jnp.float32) * 0.1

    out = residual2d_block_forward(x, weight, bias, filter_size=filter_size, dilation=dilation)
    out = jax.block_until_ready(out)

    ref = reference_forward(x, weight, bias, filter_size=filter_size, dilation=dilation)
    assert out.shape == ref.shape, (out.shape, ref.shape)
    max_err = float(jnp.max(jnp.abs(out - ref)))
    assert jnp.allclose(out, ref, rtol=1e-4, atol=1e-4), max_err

    print("KERNEL_OK")
</pallas_src>

<mosaic_0001>
module attributes {stable_mosaic.version = 11 : i64} {
  func.func @_residual2d_kernel(%arg0: i32, %arg1: memref<1x4x1024xf32, #tpu.memory_space<vmem>>, %arg2: memref<9x4x4xf32, #tpu.memory_space<vmem>>, %arg3: memref<4x1xf32, #tpu.memory_space<vmem>>, %arg4: memref<1x512xf32, #tpu.memory_space<vmem>>, %arg5: memref<1x4x512xf32, #tpu.memory_space<vmem>>, %arg6: memref<4x1024xf32, #tpu.memory_space<vmem>>) attributes {dimension_semantics = [#tpu.dimension_semantics<parallel>], iteration_bounds = array<i64: 2>, scalar_prefetch = 0 : i64, scratch_operands = 1 : i64, tpu.core_type = #tpu.core_type<tc>, window_params = [{transform_indices = @transform_0, window_bounds = array<i64: 1, 4, 1024>}, {pipeline_mode = #tpu.pipeline_mode<synchronous>, transform_indices = @transform_1, window_bounds = array<i64: 9, 4, 4>}, {pipeline_mode = #tpu.pipeline_mode<synchronous>, transform_indices = @transform_2, window_bounds = array<i64: 4, 1>}, {pipeline_mode = #tpu.pipeline_mode<synchronous>, transform_indices = @transform_3, window_bounds = array<i64: 1, 512>}, {transform_indices = @transform_4, window_bounds = array<i64: 1, 4, 512>}]} {
    %c0 = arith.constant 0 : index
    %c0_0 = arith.constant 0 : index
    %c0_1 = arith.constant 0 : index
    %0 = vector.load %arg2[%c0, %c0_0, %c0_1] : memref<9x4x4xf32, #tpu.memory_space<vmem>>, vector<9x4x4xf32>
    %c0_2 = arith.constant 0 : index
    %c0_3 = arith.constant 0 : index
    %1 = vector.load %arg3[%c0_2, %c0_3] : memref<4x1xf32, #tpu.memory_space<vmem>>, vector<4x1xf32>
    %2 = vector.shape_cast %1 : vector<4x1xf32> to vector<4x1xf32>
    %3 = vector.broadcast %2 : vector<4x1xf32> to vector<4x512xf32>
    %c0_4 = arith.constant 0 : index
    %c0_5 = arith.constant 0 : index
    %4 = vector.load %arg4[%c0_4, %c0_5] : memref<1x512xf32, #tpu.memory_space<vmem>>, vector<1x512xf32>
    %cst = arith.constant 0.000000e+00 : f32
    %5 = vector.broadcast %cst : f32 to vector<4x256xf32>
    %c0_6 = arith.constant 0 : index
    %c0_7 = arith.constant 0 : index
    %6 = vector.load %arg6[%c0_6, %c0_7] : memref<4x1024xf32, #tpu.memory_space<vmem>>, vector<4x256xf32>
    tpu.vector_store %arg6[%c0_6, %c0_7], %5 {strides = array<i32>} : memref<4x1024xf32, #tpu.memory_space<vmem>>, vector<4x256xf32>,
    %cst_8 = arith.constant 0.000000e+00 : f32
    %7 = vector.broadcast %cst_8 : f32 to vector<4x256xf32>
    %c0_9 = arith.constant 0 : index
    %c768 = arith.constant 768 : index
    %8 = vector.load %arg6[%c0_9, %c768] : memref<4x1024xf32, #tpu.memory_space<vmem>>, vector<4x256xf32>
    tpu.vector_store %arg6[%c0_9, %c768], %7 {strides = array<i32>} : memref<4x1024xf32, #tpu.memory_space<vmem>>, vector<4x256xf32>,
    %9 = vector.extract_strided_slice %0 {offsets = [0, 0, 0], sizes = [1, 4, 4], strides = [1, 1, 1]} : vector<9x4x4xf32> to vector<1x4x4xf32>
    %10 = vector.shape_cast %9 : vector<1x4x4xf32> to vector<4x4xf32>
    %c0_10 = arith.constant 0 : index
    %c0_11 = arith.constant 0 : index
    %c121 = arith.constant 121 : index
    %11 = vector.load %arg1[%c0_10, %c0_11, %c121] : memref<1x4x1024xf32, #tpu.memory_space<vmem>>, vector<1x4x512xf32>
    %12 = vector.shape_cast %11 : vector<1x4x512xf32> to vector<4x512xf32>
    %cst_12 = arith.constant dense<0.000000e+00> : vector<4x512xf32>
    %13 = tpu.matmul %10, %12, %cst_12 {dimension_numbers = #tpu.dot_dimension_numbers<[1], [0], [0], [1], [0, 0, 1, 1], [], []>, precision = #tpu.contract_precision<fp32>} : vector<4x4xf32>, vector<4x512xf32>, vector<4x512xf32> -> vector<4x512xf32>
    %14 = arith.addf %3, %13 : vector<4x512xf32>
    %15 = vector.extract_strided_slice %0 {offsets = [1, 0, 0], sizes = [1, 4, 4], strides = [1, 1, 1]} : vector<9x4x4xf32> to vector<1x4x4xf32>
    %16 = vector.shape_cast %15 : vector<1x4x4xf32> to vector<4x4xf32>
    %c0_13 = arith.constant 0 : index
    %c0_14 = arith.constant 0 : index
    %c126 = arith.constant 126 : index
    %17 = vector.load %arg1[%c0_13, %c0_14, %c126] : memref<1x4x1024xf32, #tpu.memory_space<vmem>>, vector<1x4x512xf32>
    %18 = vector.shape_cast %17 : vector<1x4x512xf32> to vector<4x512xf32>
    %cst_15 = arith.constant dense<0.000000e+00> : vector<4x512xf32>
    %19 = tpu.matmul %16, %18, %cst_15 {dimension_numbers = #tpu.dot_dimension_numbers<[1], [0], [0], [1], [0, 0, 1, 1], [], []>, precision = #tpu.contract_precision<fp32>} : vector<4x4xf32>, vector<4x512xf32>, vector<4x512xf32> -> vector<4x512xf32>
    %20 = arith.addf %14, %19 : vector<4x512xf32>
    %21 = vector.extract_strided_slice %0 {offsets = [2, 0, 0], sizes = [1, 4, 4], strides = [1, 1, 1]} : vector<9x4x4xf32> to vector<1x4x4xf32>
    %22 = vector.shape_cast %21 : vector<1x4x4xf32> to vector<4x4xf32>
    %c0_16 = arith.constant 0 : index
    %c0_17 = arith.constant 0 : index
    %c131 = arith.constant 131 : index
    %23 = vector.load %arg1[%c0_16, %c0_17, %c131] : memref<1x4x1024xf32, #tpu.memory_space<vmem>>, vector<1x4x512xf32>
    %24 = vector.shape_cast %23 : vector<1x4x512xf32> to vector<4x512xf32>
    %cst_18 = arith.constant dense<0.000000e+00> : vector<4x512xf32>
    %25 = tpu.matmul %22, %24, %cst_18 {dimension_numbers = #tpu.dot_dimension_numbers<[1], [0], [0], [1], [0, 0, 1, 1], [], []>, precision = #tpu.contract_precision<fp32>} : vector<4x4xf32>, vector<4x512xf32>, vector<4x512xf32> -> vector<4x512xf32>
    %26 = arith.addf %20, %25 : vector<4x512xf32>
    %27 = vector.extract_strided_slice %0 {offsets = [3, 0, 0], sizes = [1, 4, 4], strides = [1, 1, 1]} : vector<9x4x4xf32> to vector<1x4x4xf32>
    %28 = vector.shape_cast %27 : vector<1x4x4xf32> to vector<4x4xf32>
    %c0_19 = arith.constant 0 : index
    %c0_20 = arith.constant 0 : index
    %c251 = arith.constant 251 : index
    %29 = vector.load %arg1[%c0_19, %c0_20, %c251] : memref<1x4x1024xf32, #tpu.memory_space<vmem>>, vector<1x4x512xf32>
    %30 = vector.shape_cast %29 : vector<1x4x512xf32> to vector<4x512xf32>
    %cst_21 = arith.constant dense<0.000000e+00> : vector<4x512xf32>
    %31 = tpu.matmul %28, %30, %cst_21 {dimension_numbers = #tpu.dot_dimension_numbers<[1], [0], [0], [1], [0, 0, 1, 1], [], []>, precision = #tpu.contract_precision<fp32>} : vector<4x4xf32>, vector<4x512xf32>, vector<4x512xf32> -> vector<4x512xf32>
    %32 = arith.addf %26, %31 : vector<4x512xf32>
    %33 = vector.extract_strided_slice %0 {offsets = [4, 0, 0], sizes = [1, 4, 4], strides = [1, 1, 1]} : vector<9x4x4xf32> to vector<1x4x4xf32>
    %34 = vector.shape_cast %33 : vector<1x4x4xf32> to vector<4x4xf32>
    %c0_22 = arith.constant 0 : index
    %c0_23 = arith.constant 0 : index
    %c256 = arith.constant 256 : index
    %35 = vector.load %arg1[%c0_22, %c0_23, %c256] : memref<1x4x1024xf32, #tpu.memory_space<vmem>>, vector<1x4x512xf32>
    %36 = vector.shape_cast %35 : vector<1x4x512xf32> to vector<4x512xf32>
    %cst_24 = arith.constant dense<0.000000e+00> : vector<4x512xf32>
    %37 = tpu.matmul %34, %36, %cst_24 {dimension_numbers = #tpu.dot_dimension_numbers<[1], [0], [0], [1], [0, 0, 1, 1], [], []>, precision = #tpu.contract_precision<fp32>} : vector<4x4xf32>, vector<4x512xf32>, vector<4x512xf32> -> vector<4x512xf32>
    %38 = arith.addf %32, %37 : vector<4x512xf32>
    %39 = vector.extract_strided_slice %0 {offsets = [5, 0, 0], sizes = [1, 4, 4], strides = [1, 1, 1]} : vector<9x4x4xf32> to vector<1x4x4xf32>
    %40 = vector.shape_cast %39 : vector<1x4x4xf32> to vector<4x4xf32>
    %c0_25 = arith.constant 0 : index
    %c0_26 = arith.constant 0 : index
    %c261 = arith.constant 261 : index
    %41 = vector.load %arg1[%c0_25, %c0_26, %c261] : memref<1x4x1024xf32, #tpu.memory_space<vmem>>, vector<1x4x512xf32>
    %42 = vector.shape_cast %41 : vector<1x4x512xf32> to vector<4x512xf32>
    %cst_27 = arith.constant dense<0.000000e+00> : vector<4x512xf32>
    %43 = tpu.matmul %40, %42, %cst_27 {dimension_numbers = #tpu.dot_dimension_numbers<[1], [0], [0], [1], [0, 0, 1, 1], [], []>, precision = #tpu.contract_precision<fp32>} : vector<4x4xf32>, vector<4x512xf32>, vector<4x512xf32> -> vector<4x512xf32>
    %44 = arith.addf %38, %43 : vector<4x512xf32>
    %45 = vector.extract_strided_slice %0 {offsets = [6, 0, 0], sizes = [1, 4, 4], strides = [1, 1, 1]} : vector<9x4x4xf32> to vector<1x4x4xf32>
    %46 = vector.shape_cast %45 : vector<1x4x4xf32> to vector<4x4xf32>
    %c0_28 = arith.constant 0 : index
    %c0_29 = arith.constant 0 : index
    %c381 = arith.constant 381 : index
    %47 = vector.load %arg1[%c0_28, %c0_29, %c381] : memref<1x4x1024xf32, #tpu.memory_space<vmem>>, vector<1x4x512xf32>
    %48 = vector.shape_cast %47 : vector<1x4x512xf32> to vector<4x512xf32>
    %cst_30 = arith.constant dense<0.000000e+00> : vector<4x512xf32>
    %49 = tpu.matmul %46, %48, %cst_30 {dimension_numbers = #tpu.dot_dimension_numbers<[1], [0], [0], [1], [0, 0, 1, 1], [], []>, precision = #tpu.contract_precision<fp32>} : vector<4x4xf32>, vector<4x512xf32>, vector<4x512xf32> -> vector<4x512xf32>
    %50 = arith.addf %44, %49 : vector<4x512xf32>
    %51 = vector.extract_strided_slice %0 {offsets = [7, 0, 0], sizes = [1, 4, 4], strides = [1, 1, 1]} : vector<9x4x4xf32> to vector<1x4x4xf32>
    %52 = vector.shape_cast %51 : vector<1x4x4xf32> to vector<4x4xf32>
    %c0_31 = arith.constant 0 : index
    %c0_32 = arith.constant 0 : index
    %c386 = arith.constant 386 : index
    %53 = vector.load %arg1[%c0_31, %c0_32, %c386] : memref<1x4x1024xf32, #tpu.memory_space<vmem>>, vector<1x4x512xf32>
    %54 = vector.shape_cast %53 : vector<1x4x512xf32> to vector<4x512xf32>
    %cst_33 = arith.constant dense<0.000000e+00> : vector<4x512xf32>
    %55 = tpu.matmul %52, %54, %cst_33 {dimension_numbers = #tpu.dot_dimension_numbers<[1], [0], [0], [1], [0, 0, 1, 1], [], []>, precision = #tpu.contract_precision<fp32>} : vector<4x4xf32>, vector<4x512xf32>, vector<4x512xf32> -> vector<4x512xf32>
    %56 = arith.addf %50, %55 : vector<4x512xf32>
    %57 = vector.extract_strided_slice %0 {offsets = [8, 0, 0], sizes = [1, 4, 4], strides = [1, 1, 1]} : vector<9x4x4xf32> to vector<1x4x4xf32>
    %58 = vector.shape_cast %57 : vector<1x4x4xf32> to vector<4x4xf32>
    %c0_34 = arith.constant 0 : index
    %c0_35 = arith.constant 0 : index
    %c391 = arith.constant 391 : index
    %59 = vector.load %arg1[%c0_34, %c0_35, %c391] : memref<1x4x1024xf32, #tpu.memory_space<vmem>>, vector<1x4x512xf32>
    %60 = vector.shape_cast %59 : vector<1x4x512xf32> to vector<4x512xf32>
    %cst_36 = arith.constant dense<0.000000e+00> : vector<4x512xf32>
    %61 = tpu.matmul %58, %60, %cst_36 {dimension_numbers = #tpu.dot_dimension_numbers<[1], [0], [0], [1], [0, 0, 1, 1], [], []>, precision = #tpu.contract_precision<fp32>} : vector<4x4xf32>, vector<4x512xf32>, vector<4x512xf32> -> vector<4x512xf32>
    %62 = arith.addf %56, %61 : vector<4x512xf32>
    %cst_37 = arith.constant 0.000000e+00 : f32
    %63 = vector.broadcast %cst_37 : f32 to vector<4x512xf32>
    %64 = arith.maximumf %62, %63 : vector<4x512xf32>
    %65 = vector.broadcast %4 : vector<1x512xf32> to vector<4x512xf32>
    %66 = arith.mulf %64, %65 : vector<4x512xf32>
    %c0_38 = arith.constant 0 : index
    %c256_39 = arith.constant 256 : index
    %67 = vector.load %arg6[%c0_38, %c256_39] : memref<4x1024xf32, #tpu.memory_space<vmem>>, vector<4x512xf32>
    tpu.vector_store %arg6[%c0_38, %c256_39], %66 {strides = array<i32>} : memref<4x1024xf32, #tpu.memory_space<vmem>>, vector<4x512xf32>,
    %68 = vector.extract_strided_slice %0 {offsets = [0, 0, 0], sizes = [1, 4, 4], strides = [1, 1, 1]} : vector<9x4x4xf32> to vector<1x4x4xf32>
    %69 = vector.shape_cast %68 : vector<1x4x4xf32> to vector<4x4xf32>
    %c0_40 = arith.constant 0 : index
    %c121_41 = arith.constant 121 : index
    %70 = vector.load %arg6[%c0_40, %c121_41] : memref<4x1024xf32, #tpu.memory_space<vmem>>, vector<4x512xf32>
    %cst_42 = arith.constant dense<0.000000e+00> : vector<4x512xf32>
    %71 = tpu.matmul %69, %70, %cst_42 {dimension_numbers = #tpu.dot_dimension_numbers<[1], [0], [0], [1], [0, 0, 1, 1], [], []>, precision = #tpu.contract_precision<fp32>} : vector<4x4xf32>, vector<4x512xf32>, vector<4x512xf32> -> vector<4x512xf32>
    %72 = arith.addf %3, %71 : vector<4x512xf32>
    %73 = vector.extract_strided_slice %0 {offsets = [1, 0, 0], sizes = [1, 4, 4], strides = [1, 1, 1]} : vector<9x4x4xf32> to vector<1x4x4xf32>
    %74 = vector.shape_cast %73 : vector<1x4x4xf32> to vector<4x4xf32>
    %c0_43 = arith.constant 0 : index
    %c126_44 = arith.constant 126 : index
    %75 = vector.load %arg6[%c0_43, %c126_44] : memref<4x1024xf32, #tpu.memory_space<vmem>>, vector<4x512xf32>
    %cst_45 = arith.constant dense<0.000000e+00> : vector<4x512xf32>
    %76 = tpu.matmul %74, %75, %cst_45 {dimension_numbers = #tpu.dot_dimension_numbers<[1], [0], [0], [1], [0, 0, 1, 1], [], []>, precision = #tpu.contract_precision<fp32>} : vector<4x4xf32>, vector<4x512xf32>, vector<4x512xf32> -> vector<4x512xf32>
    %77 = arith.addf %72, %76 : vector<4x512xf32>
    %78 = vector.extract_strided_slice %0 {offsets = [2, 0, 0], sizes = [1, 4, 4], strides = [1, 1, 1]} : vector<9x4x4xf32> to vector<1x4x4xf32>
    %79 = vector.shape_cast %78 : vector<1x4x4xf32> to vector<4x4xf32>
    %c0_46 = arith.constant 0 : index
    %c131_47 = arith.constant 131 : index
    %80 = vector.load %arg6[%c0_46, %c131_47] : memref<4x1024xf32, #tpu.memory_space<vmem>>, vector<4x512xf32>
    %cst_48 = arith.constant dense<0.000000e+00> : vector<4x512xf32>
    %81 = tpu.matmul %79, %80, %cst_48 {dimension_numbers = #tpu.dot_dimension_numbers<[1], [0], [0], [1], [0, 0, 1, 1], [], []>, precision = #tpu.contract_precision<fp32>} : vector<4x4xf32>, vector<4x512xf32>, vector<4x512xf32> -> vector<4x512xf32>
    %82 = arith.addf %77, %81 : vector<4x512xf32>
    %83 = vector.extract_strided_slice %0 {offsets = [3, 0, 0], sizes = [1, 4, 4], strides = [1, 1, 1]} : vector<9x4x4xf32> to vector<1x4x4xf32>
    %84 = vector.shape_cast %83 : vector<1x4x4xf32> to vector<4x4xf32>
    %c0_49 = arith.constant 0 : index
    %c251_50 = arith.constant 251 : index
    %85 = vector.load %arg6[%c0_49, %c251_50] : memref<4x1024xf32, #tpu.memory_space<vmem>>, vector<4x512xf32>
    %cst_51 = arith.constant dense<0.000000e+00> : vector<4x512xf32>
    %86 = tpu.matmul %84, %85, %cst_51 {dimension_numbers = #tpu.dot_dimension_numbers<[1], [0], [0], [1], [0, 0, 1, 1], [], []>, precision = #tpu.contract_precision<fp32>} : vector<4x4xf32>, vector<4x512xf32>, vector<4x512xf32> -> vector<4x512xf32>
    %87 = arith.addf %82, %86 : vector<4x512xf32>
    %88 = vector.extract_strided_slice %0 {offsets = [4, 0, 0], sizes = [1, 4, 4], strides = [1, 1, 1]} : vector<9x4x4xf32> to vector<1x4x4xf32>
    %89 = vector.shape_cast %88 : vector<1x4x4xf32> to vector<4x4xf32>
    %c0_52 = arith.constant 0 : index
    %c256_53 = arith.constant 256 : index
    %90 = vector.load %arg6[%c0_52, %c256_53] : memref<4x1024xf32, #tpu.memory_space<vmem>>, vector<4x512xf32>
    %cst_54 = arith.constant dense<0.000000e+00> : vector<4x512xf32>
    %91 = tpu.matmul %89, %90, %cst_54 {dimension_numbers = #tpu.dot_dimension_numbers<[1], [0], [0], [1], [0, 0, 1, 1], [], []>, precision = #tpu.contract_precision<fp32>} : vector<4x4xf32>, vector<4x512xf32>, vector<4x512xf32> -> vector<4x512xf32>
    %92 = arith.addf %87, %91 : vector<4x512xf32>
    %93 = vector.extract_strided_slice %0 {offsets = [5, 0, 0], sizes = [1, 4, 4], strides = [1, 1, 1]} : vector<9x4x4xf32> to vector<1x4x4xf32>
    %94 = vector.shape_cast %93 : vector<1x4x4xf32> to vector<4x4xf32>
    %c0_55 = arith.constant 0 : index
    %c261_56 = arith.constant 261 : index
    %95 = vector.load %arg6[%c0_55, %c261_56] : memref<4x1024xf32, #tpu.memory_space<vmem>>, vector<4x512xf32>
    %cst_57 = arith.constant dense<0.000000e+00> : vector<4x512xf32>
    %96 = tpu.matmul %94, %95, %cst_57 {dimension_numbers = #tpu.dot_dimension_numbers<[1], [0], [0], [1], [0, 0, 1, 1], [], []>, precision = #tpu.contract_precision<fp32>} : vector<4x4xf32>, vector<4x512xf32>, vector<4x512xf32> -> vector<4x512xf32>
    %97 = arith.addf %92, %96 : vector<4x512xf32>
    %98 = vector.extract_strided_slice %0 {offsets = [6, 0, 0], sizes = [1, 4, 4], strides = [1, 1, 1]} : vector<9x4x4xf32> to vector<1x4x4xf32>
    %99 = vector.shape_cast %98 : vector<1x4x4xf32> to vector<4x4xf32>
    %c0_58 = arith.constant 0 : index
    %c381_59 = arith.constant 381 : index
    %100 = vector.load %arg6[%c0_58, %c381_59] : memref<4x1024xf32, #tpu.memory_space<vmem>>, vector<4x512xf32>
    %cst_60 = arith.constant dense<0.000000e+00> : vector<4x512xf32>
    %101 = tpu.matmul %99, %100, %cst_60 {dimension_numbers = #tpu.dot_dimension_numbers<[1], [0], [0], [1], [0, 0, 1, 1], [], []>, precision = #tpu.contract_precision<fp32>} : vector<4x4xf32>, vector<4x512xf32>, vector<4x512xf32> -> vector<4x512xf32>
    %102 = arith.addf %97, %101 : vector<4x512xf32>
    %103 = vector.extract_strided_slice %0 {offsets = [7, 0, 0], sizes = [1, 4, 4], strides = [1, 1, 1]} : vector<9x4x4xf32> to vector<1x4x4xf32>
    %104 = vector.shape_cast %103 : vector<1x4x4xf32> to vector<4x4xf32>
    %c0_61 = arith.constant 0 : index
    %c386_62 = arith.constant 386 : index
    %105 = vector.load %arg6[%c0_61, %c386_62] : memref<4x1024xf32, #tpu.memory_space<vmem>>, vector<4x512xf32>
    %cst_63 = arith.constant dense<0.000000e+00> : vector<4x512xf32>
    %106 = tpu.matmul %104, %105, %cst_63 {dimension_numbers = #tpu.dot_dimension_numbers<[1], [0], [0], [1], [0, 0, 1, 1], [], []>, precision = #tpu.contract_precision<fp32>} : vector<4x4xf32>, vector<4x512xf32>, vector<4x512xf32> -> vector<4x512xf32>
    %107 = arith.addf %102, %106 : vector<4x512xf32>
    %108 = vector.extract_strided_slice %0 {offsets = [8, 0, 0], sizes = [1, 4, 4], strides = [1, 1, 1]} : vector<9x4x4xf32> to vector<1x4x4xf32>
    %109 = vector.shape_cast %108 : vector<1x4x4xf32> to vector<4x4xf32>
    %c0_64 = arith.constant 0 : index
    %c391_65 = arith.constant 391 : index
    %110 = vector.load %arg6[%c0_64, %c391_65] : memref<4x1024xf32, #tpu.memory_space<vmem>>, vector<4x512xf32>
    %cst_66 = arith.constant dense<0.000000e+00> : vector<4x512xf32>
    %111 = tpu.matmul %109, %110, %cst_66 {dimension_numbers = #tpu.dot_dimension_numbers<[1], [0], [0], [1], [0, 0, 1, 1], [], []>, precision = #tpu.contract_precision<fp32>} : vector<4x4xf32>, vector<4x512xf32>, vector<4x512xf32> -> vector<4x512xf32>
    %112 = arith.addf %107, %111 : vector<4x512xf32>
    %c0_67 = arith.constant 0 : index
    %c0_68 = arith.constant 0 : index
    %c256_69 = arith.constant 256 : index
    %113 = vector.load %arg1[%c0_67, %c0_68, %c256_69] : memref<1x4x1024xf32, #tpu.memory_space<vmem>>, vector<1x4x512xf32>
    %114 = vector.shape_cast %113 : vector<1x4x512xf32> to vector<4x512xf32>
    %115 = arith.addf %112, %114 : vector<4x512xf32>
    %c0_70 = arith.constant 0 : index
    %c0_71 = arith.constant 0 : index
    %c0_72 = arith.constant 0 : index
    %116 = vector.load %arg5[%c0_70, %c0_71, %c0_72] : memref<1x4x512xf32, #tpu.memory_space<vmem>>, vector<1x4x512xf32>
    %117 = vector.shape_cast %116 : vector<1x4x512xf32> to vector<4x512xf32>
    %118 = vector.shape_cast %115 : vector<4x512xf32> to vector<1x4x512xf32>
    tpu.vector_store %arg5[%c0_70, %c0_71, %c0_72], %118 {strides = array<i32>} : memref<1x4x512xf32, #tpu.memory_space<vmem>>, vector<1x4x512xf32>,
    return
  }
  func.func @transform_0(%arg0: i32) -> (i32, i32, i32) {
    %c0_i32 = arith.constant 0 : i32
    %c0_i32_0 = arith.constant 0 : i32
    %c0_i32_1 = arith.constant 0 : i32
    return %arg0, %c0_i32, %c0_i32_0 : i32, i32, i32
  }
  func.func @transform_1(%arg0: i32) -> (i32, i32, i32) {
    %c0_i32 = arith.constant 0 : i32
    %c0_i32_0 = arith.constant 0 : i32
    %c0_i32_1 = arith.constant 0 : i32
    %c0_i32_2 = arith.constant 0 : i32
    return %c0_i32, %c0_i32_0, %c0_i32_1 : i32, i32, i32
  }
  func.func @transform_2(%arg0: i32) -> (i32, i32) {
    %c0_i32 = arith.constant 0 : i32
    %c0_i32_0 = arith.constant 0 : i32
    %c0_i32_1 = arith.constant 0 : i32
    return %c0_i32, %c0_i32_0 : i32, i32
  }
  func.func @transform_3(%arg0: i32) -> (i32, i32) {
    %c0_i32 = arith.constant 0 : i32
    %c0_i32_0 = arith.constant 0 : i32
    %c0_i32_1 = arith.constant 0 : i32
    return %c0_i32, %c0_i32_0 : i32, i32
  }
  func.func @transform_4(%arg0: i32) -> (i32, i32, i32) {
    %c0_i32 = arith.constant 0 : i32
    %c0_i32_0 = arith.constant 0 : i32
    %c0_i32_1 = arith.constant 0 : i32
    return %arg0, %c0_i32, %c0_i32_0 : i32, i32, i32
  }
}

</mosaic_0001>

<bundles_post_ra>
// kernel: tpu_custom_call.1
= control target key start
LH: loop header
LB: loop body
LE: loop exit
PB: predicated region body
PF: predicated region fallthrough
CT: control target
= control target key end

     0   :  { %9 = vsyncpa [#allocation4], 0  ;;  %s19828_s0 = inlined_call_operand.hbm [shape: f32[2,4,1024], index: 0, kind: input, shape index: {}]   ;;  %s19829_s1 = inlined_call_operand.vmem [shape: f32[9,4,4], index: 1, kind: input, shape index: {}]   ;;  %s19830_s2 = inlined_call_operand.vmem [shape: f32[4,1], index: 2, kind: input, shape index: {}]   ;;  %s19831_s3 = inlined_call_operand.vmem [shape: f32[1,512], index: 3, kind: input, shape index: {}]   ;;  %s19832_s4 = inlined_call_operand.hbm [shape: f32[2,4,512], index: 4, kind: output, shape index: {}]  }
   0x1   :  { %11 = vsyncpa [#allocation4 + $0x1], 0 }
   0x2   :  { %12 = vsyncpa [#allocation5], 0 }
   0x3   :  { %14 = vsyncpa [#allocation5 + $0x1], 0  ;;  %s17957_s15 = smov 0   ;;  %s17959_s16 = smov 0  }
   0x4   :  { %s17961_s17 = smov 0   ;;  %s17963_s18 = smov 0  }
   0x5 LB: > { %s17978_s19 = sadd.s32 4294967295, %s17918_s18   ;;  %s17735_s20 = sadd.s32 4294967294, %s17918_s18   ;;  %s17918_s18 = sphi %s17963_s18, %s20090_s18   ;;  %s17914_s17 = sphi %s17961_s17, %s20089_s17   ;;  %s17910_s16 = sphi %s17959_s16, %s20088_s16   ;;  %s17906_s15 = sphi %s17957_s15, %s20087_s15  }
   0x6   : > { %s17982_s21 = sadd.s32 1, %s17918_s18   ;;  %s27_s22 = sadd.s32 1, %s17914_s17 }
   0x7   : > { %s24_s23 = ssub.s32 %s17918_s18, %s17982_s21  ;;  %p34_p0 = scmp.ne.s32.totalorder %s17914_s17, %s17910_s16 }
   0x8   : > { %p25_p1 = scmp.eq.s32.totalorder %s24_s23, 0  ;;  %p35_p2 = scmp.eq.s32.totalorder %s17918_s18, 0 }
   0x9   : > { %p40_p3 = scmp.ne.s32.totalorder %s17910_s16, %s17906_s15  ;;  %p41_p4 = scmp.eq.s32.totalorder %s17978_s19, 0 }
   0xa   : > { %s17994_s24 = scalar_select %p25_p1, %s17914_s17, %s27_s22  }
   0xb   : > { %p17996_p5 = por %p35_p2, %p34_p0  ;;  %p18000_p6 = por %p41_p4, %p40_p3 }
   0xc   : > { %p127_p7 = scmp.eq.s32.totalorder %s17978_s19, 1  ;;  %p133_p8 = scmp.eq.s32.totalorder %s17735_s20, 1 }
   0xd   : > { %s19911_s26 = scalar_select %p18000_p6, 1, 0 }
   0xe   : > { %p17763_p10 = scmp.lt.s32.totalorder %s17918_s18, 2  ;;  %p18007_p11 = por %p127_p7, %p34_p0 }
   0xf   : > { %p18011_p12 = por %p133_p8, %p40_p3  ;;  %s162_s29 = sand.u32 1, %s17914_s17  }
  0x10   : > { %s19912_s27 = scalar_select %p18007_p11, 1, 0 }
  0x11   : > { %s19913_s28 = scalar_select %p18011_p12, 1, 0 }
  0x12   : > { %s17749_s30 = sshll.u32 %s17918_s18, 9  ;;  %s17738_s5 = sshll.u32 %s162_s29, 5 }
  0x13   : > { %s18020_s8 = scalar_lea.hbm %s19828_s0, %s17749_s30  ;;  %s166_s9 = scalar_lea.vmem [#allocation3], %s17738_s5 }
  0x14   : > { %s174_s10 = sshll.u32 %s166_s9, 4  ;;  %p18024_p13 = pnand %p17763_p10, %p17996_p5  ;;  %s18028_s10 = int_to_ptr.vmem [resolvable:$true] %s174_s10 }
  0x15   : > { %s163_s12 = scalar_lea.sflag [#allocation4], %s162_s29  ;;  %s17826_s13 = scalar_lea.hbm %s18020_s8, 512 }
  0x16   : > { %p17827_p2 = scmp.ne.s32.totalorder %s18020_s8, %s17826_s13  ;;  %p17828_p3 = pneg %p18024_p13 }
  0x17   : > { %s17831_s22 = scalar_lea.hbm %s19828_s0, 1024  ;;  %p17832_p5 = scmp.lt.s32.totalorder %s18020_s8, %s19828_s0 }
  0x18   : > { %p17829_p4 = pnand %p17828_p3, %p17827_p2  ;;  %p17833_p8 = scmp.lt.s32.totalorder %s17831_s22, %s17826_s13 }
  0x1a   : > { %p17830_p7 = pneg %p17829_p4  ;;  %p17834_p10 = por %p17833_p8, %p17832_p5 }
  0x1c   : > { %p17835_p9 = pnand %p17834_p10, %p17830_p7 }
  0x1e   : > { %17838 = shalt.err (!%p17835_p9)
}
  0x1f   : > { %s17839_s29 = scalar_lea.vmem %s18028_s10, 512  ;;  %s17920_s30 = smov [#allocation3]  }
  0x20   : > { %p17840_p0 = scmp.ne.s32.totalorder %s18028_s10, %s17839_s29  ;;  %s17844_s5 = sshll.u32 %s17920_s30, 4  ;;  %s17845_s5 = int_to_ptr.vmem [resolvable:$false] %s17844_s5 }
  0x21   : > { %s17846_s6 = scalar_lea.vmem %s17845_s5, 1024  ;;  %p17847_p4 = scmp.lt.s32.totalorder %s18028_s10, %s17845_s5 }
  0x22   : > { %p17842_p1 = pnand %p17840_p0, %p17828_p3  ;;  %p17848_p12 = scmp.lt.s32.totalorder %s17846_s6, %s17839_s29 }
  0x24   : > { %p17843_p2 = pneg %p17842_p1  ;;  %p17849_p11 = por %p17848_p12, %p17847_p4 }
  0x26   : > { %p17850_p6 = pnand %p17849_p11, %p17843_p2 }
  0x28   : > { %17853 = shalt.err (!%p17850_p6)
}
  0x29   : > { %17758 = dma.hbm_to_vmem [thread:$0]  (!%p18024_p13), %s18020_s8, 512, %s18028_s10, %s163_s12  }
  0x2a   : > { %p19915_p9 = scmp.lt.s32.totalorder %s17918_s18, 3  ;;  %p19916_p7 = scmp.ge.s32.totalorder %s17918_s18, 1 }
  0x2c   : > { %p180_p0 = pnand %p19916_p7, %p19915_p9 }
  0x2e   : > { %183 = sbr.rel (%p180_p0) target bundleno = 1161 (0x489), region = 36 }
  0x33   : > { %s18055_s7 = sand.u32 1, %s17910_s16   ;;  %p19917_p6 = scmp.ne.s32.totalorder %s19911_s26, 0 }
  0x34   : > { %s17742_s9 = sshll.u32 %s18055_s7, 5  ;;  %s186_s13 = scalar_lea.sflag [#allocation4], %s18055_s7 }
  0x35   : > { %s18059_s14 = scalar_lea.vmem [#allocation3], %s17742_s9 }
  0x36   : > { %17897 = dma.done.wait (%p19917_p6), %s186_s13, 512  }
  0x37   : > { %17899 = vsyncadd (%p19917_p6), %s186_s13, 4294966784  ;;  %v17921_v0 = vmov 0.0   ;;  %v232_v1 = vld [vmem:[%s18059_s14] sm:$0xff]  ;;  %v18071_v2 = vld [vmem:[%s18059_s14 + $0x8] sm:$0xff]  ;;  %s17922_s8 = smov 7   ;;  %s17923_s26 = smov 2  }
  0x38   : > { %334 = vmatprep.mubr.f32.mxu0 %v17921_v0  ;;  %230 = vst [vmem:[#allocation2] sm:$0xff] %v17921_v0  ;;  %231 = vst [vmem:[#allocation2 + $0x18] sm:$0xff] %v17921_v0  ;;  %420 = vmatprep.mubr.f32.mxu1 %v17921_v0  ;;  %v238_v3 = vcombine.high %v232_v1, %v232_v1  ;;  %v18076_v4 = vcombine.high %v18071_v2, %v18071_v2  ;;  %v234_v5 = vld [vmem:[%s18059_s14 + $0x10] sm:$0xf]  ;;  %v2170_v7 = vld [vmem:[%s18059_s14 + $0x4] sm:$0xff]  ;;  %s17924_s10 = smov 125  }
  0x39   : > { %240 = vrot.lane.b32.xlu1 %v232_v1, %s17922_s8  ;;  %v1204_v6 = vld [vmem:[%s18059_s14 + $0x10] sm:$0xf]  ;;  %v2176_v9 = vcombine.high %v2170_v7, %v2170_v7  ;;  %v2172_v11 = vld [vmem:[%s18059_s14 + $0x14] sm:$0xf]  ;;  %s17925_s11 = smov 5   ;;  %s17926_s12 = smov 123  }
  0x3a   : > { %242 = vrot.lane.b32.xlu0 %v238_v3, %s17922_s8  ;;  %v2171_v8 = vld [vmem:[%s18059_s14 + $0xc] sm:$0xff]  ;;  %v3140_v12 = vld [vmem:[%s18059_s14 + $0x14] sm:$0xf]  ;;  %v5059_v15 = vld [vmem:[%s18059_s14 + $0x18] sm:$0xf]  ;;  %s17927_s20 = smov 3  }
  0x3b   : > { %v2177_v10 = vcombine.high %v2171_v8, %v2171_v8  ;;  %v18107_v13 = vld [vmem:[%s18059_s14 + $0x10] sm:$0xff]  ;;  %v6027_v16 = vld [vmem:[%s18059_s14 + $0x18] sm:$0xf]  ;;  %s17928_s22 = smov 126   ;;  %v6995_v19 = vld [vmem:[%s18059_s14 + $0x1c] sm:$0xf] }
  0x3c   : > { %v18112_v14 = vcombine.high %v18107_v13, %v18107_v13  ;;  %v6994_v17 = vld [vmem:[%s18059_s14 + $0x14] sm:$0xff]  ;;  %s17929_s23 = smov 121   ;;  %v7963_v20 = vld [vmem:[%s18059_s14 + $0x1c] sm:$0xf]  ;;  %v223_v21 = vld [vmem:[%s19830_s2] sm:$0xf] }
  0x3d   : > { %246 = vrot.lane.b32.xlu1 %v18076_v4, %s17922_s8  ;;  %v7000_v18 = vcombine.high %v6994_v17, %v6994_v17  ;;  %v17930_v22 = vmov 0   ;;  %v214_v23 = vld [vmem:[%s19829_s1] sm:$0xf]  ;;  %vm255_vm0 = vcmask 31744   ;;  %vm250_vm1 = vcmask 56320   ;;  %p20084_p12 = scmp.ne.s32.totalorder %s19912_s27, 0 }
  0x3e   : > { %244 = vrot.lane.b32.xlu0 %v18071_v2, %s17922_s8  ;;  %v257_v24 = vsel %vm255_vm0, %v214_v23, 0  ;;  %vm259_vm2 = vcmask 1043456   ;;  %vm1220_vm3 = vcmask 15360   ;;  %v215_v50 = vld [vmem:[%s19829_s1 + $0x4] sm:$0xf]  ;;  %vm2188_vm4 = vcmask 1022976  }
  0x3f   : > { %17807 = vset.pattern.permute.xlu0 %v17930_v22  ;;  %v18156_v25 = vand.u32 4294901760, %v257_v24  ;;  %v1226_v59 = vsel %vm255_vm0, %v215_v50, 0  ;;  %vm3156_vm5 = vcmask 39936   ;;  %vm5075_vm6 = vcmask 1006592   ;;  %s17931_s29 = smov [#allocation6]  }
  0x40   : > { %vm6043_vm7 = vcmask 23552   ;;  %vm7011_vm8 = vcmask 1031168   ;;  %vm7979_vm9 = vcmask 990208   ;;  %s17858_s30 = sshll.u32 %s17931_s29, 4  ;;  %s17859_s30 = int_to_ptr.vmem [resolvable:$false] %s17858_s30 }
  0x41   : > { %1212 = vrot.lane.b32.xlu1 %v238_v3, %s17923_s26  ;;  %19918 = vst [vmem:[#allocation9_spill] sm:$0xff] %v18156_v25  ;;  %v18159_v26 = vsub.f32 %v257_v24, %v18156_v25 }
  0x42   : > { %248 = vrot.lane.b32.xlu0 %v234_v5, %s17922_s8  ;;  %v18197_v5 = vand.u32 4294901760, %v1226_v59 }
  0x43   : > { %19919 = vst [vmem:[#allocation10_spill] sm:$0xff] %v18159_v26  ;;  %v18162_v28 = vand.u32 4294901760, %v18159_v26 }
  0x44   : > { %19922 = vst [vmem:[#allocation13_spill] sm:$0xff] %v18197_v5 }
  0x45   : > { %1210 = vrot.lane.b32.xlu1 %v232_v1, %s17923_s26  ;;  %19920 = vst [vmem:[#allocation11_spill] sm:$0xff] %v18162_v28  ;;  %v338_v34 = vsub.f32 %v18159_v26, %v18162_v28 }
  0x46   : > { %1214 = vrot.lane.b32.xlu0 %v18071_v2, %s17923_s26 }
  0x47   : > { %v18175_v42 = vand.u32 4294901760, %v338_v34 }
  0x49   : > { %1218 = vrot.lane.b32.xlu1 %v1204_v6, %s17923_s26  ;;  %19921 = vst [vmem:[#allocation12_spill] sm:$0xff] %v18175_v42 }
  0x4a   : > { %1216 = vrot.lane.b32.xlu0 %v18076_v4, %s17923_s26 }
  0x4d   : > { %2182 = vrot.lane.b32.xlu1 %v2171_v8, %s17924_s10 }
  0x4e   : > { %2180 = vrot.lane.b32.xlu0 %v2176_v9, %s17924_s10 }
  0x51   : > { %2184 = vrot.lane.b32.xlu1 %v2177_v10, %s17924_s10 }
  0x52   : > { %2178 = vrot.lane.b32.xlu0 %v2170_v7, %s17924_s10 }
  0x55   : > { %3148 = vrot.lane.b32.xlu1 %v2176_v9, %s17925_s11 }
  0x56   : > { %2186 = vrot.lane.b32.xlu0 %v2172_v11, %s17924_s10 }
  0x59   : > { %3146 = vrot.lane.b32.xlu1 %v2170_v7, %s17925_s11 }
  0x5a   : > { %3150 = vrot.lane.b32.xlu0 %v2171_v8, %s17925_s11 }
  0x5d   : > { %3154 = vrot.lane.b32.xlu1 %v3140_v12, %s17925_s11 }
  0x5e   : > { %3152 = vrot.lane.b32.xlu0 %v2177_v10, %s17925_s11 }
  0x61   : > { %5069 = vrot.lane.b32.xlu1 %v18107_v13, %s17926_s12 }
  0x62   : > { %5067 = vrot.lane.b32.xlu0 %v18076_v4, %s17926_s12 }
  0x65   : > { %5071 = vrot.lane.b32.xlu1 %v18112_v14, %s17926_s12 }
  0x66   : > { %5065 = vrot.lane.b32.xlu0 %v18071_v2, %s17926_s12 }
  0x69   : > { %6035 = vrot.lane.b32.xlu1 %v18076_v4, %s17927_s20 }
  0x6a   : > { %5073 = vrot.lane.b32.xlu0 %v5059_v15, %s17926_s12 }
  0x6d   : > { %6033 = vrot.lane.b32.xlu1 %v18071_v2, %s17927_s20 }
  0x6e   : > { %6037 = vrot.lane.b32.xlu0 %v18107_v13, %s17927_s20 }
  0x71   : > { %6041 = vrot.lane.b32.xlu1 %v6027_v16, %s17927_s20 }
  0x72   : > { %6039 = vrot.lane.b32.xlu0 %v18112_v14, %s17927_s20 }
  0x75   : > { %7005 = vrot.lane.b32.xlu1 %v6994_v17, %s17928_s22 }
  0x76   : > { %7003 = vrot.lane.b32.xlu0 %v2177_v10, %s17928_s22 }
  0x79   : > { %7007 = vrot.lane.b32.xlu1 %v7000_v18, %s17928_s22 }
  0x7a   : > { %7001 = vrot.lane.b32.xlu0 %v2171_v8, %s17928_s22 }
  0x7d   : > { %7971 = vrot.lane.b32.xlu1 %v2177_v10, %s17929_s23  ;;  %v18207_v10 = vsub.f32 %v1226_v59, %v18197_v5 }
  0x7e   : > { %7009 = vrot.lane.b32.xlu0 %v6995_v19, %s17928_s22 }
  0x7f   : > { %19923 = vst [vmem:[#allocation14_spill] sm:$0xff] %v18207_v10 }
  0x81   : > { %7969 = vrot.lane.b32.xlu1 %v2171_v8, %s17929_s23 }
  0x82   : > { %7973 = vrot.lane.b32.xlu0 %v6994_v17, %s17929_s23 }
  0x85   : > { %7977 = vrot.lane.b32.xlu1 %v7963_v20, %s17929_s23  ;;  %v18220_v20 = vand.u32 4294901760, %v18207_v10 }
  0x86   : > { %7975 = vrot.lane.b32.xlu0 %v7000_v18, %s17929_s23 }
  0x87   : > { %19924 = vst [vmem:[#allocation15_spill] sm:$0xff] %v18220_v20 }
  0x8a   : > { %226 = vperm.xlu0 %17807, %v223_v21  }
  0x8e   : > { %8976 = vrot.lane.b32.xlu0 %v17921_v0, %s17922_s8 }
  0xab   : > { %v241_v27 = vpop.permute.xlu1 %240 }
  0xac   : > { %v243_v29 = vpop.permute.xlu0 %242 }
  0xad   : > { %v251_v30 = vsel %vm250_vm1, %v241_v27, %v243_v29 }
  0xae   : > { %v260_v31 = vsel %vm259_vm2, %v251_v30, 0 }
  0xaf   : > { %v247_v32 = vpop.permute.xlu1 %246  ;;  %v18166_v33 = vand.u32 4294901760, %v260_v31 }
  0xb0   : > { %v245_v35 = vpop.permute.xlu0 %244 }
  0xb1   : > { %v383_v36 = vsub.f32 %v260_v31, %v18166_v33  ;;  %v252_v37 = vsel %vm250_vm1, %v243_v29, %v245_v35  ;;  %v253_v38 = vsel %vm250_vm1, %v245_v35, %v247_v32  ;;  %v1306_v29 = vsub.f32 %v18207_v10, %v18220_v20 }
  0xb2   : > { %v262_v39 = vsel %vm259_vm2, %v252_v37, 0  ;;  %v264_v40 = vsel %vm259_vm2, %v253_v38, 0 }
  0xb3   : > { %v298_v41 = vand.u32 4294901760, %v262_v39  ;;  %v1213_v43 = vpop.permute.xlu1 %1212  ;;  %v384_v45 = vand.u32 4294901760, %v383_v36  ;;  %v18178_v48 = vand.u32 4294901760, %v264_v40  ;;  %v18241_v35 = vand.u32 4294901760, %v1306_v29 }
  0xb4   : > { %v249_v44 = vpop.permute.xlu0 %248 }
  0xb5   : > { %v377_v46 = vsub.f32 %v262_v39, %v298_v41  ;;  %299 = vmatprep.subr.mxu0 %v298_v41  ;;  %v254_v47 = vsel %vm250_vm1, %v247_v32, %v249_v44  ;;  %v385_v53 = vsub.f32 %v383_v36, %v384_v45  ;;  %v848_v60 = vsub.f32 %v264_v40, %v18178_v48  ;;  %v216_v40 = vld [vmem:[%s19829_s1 + $0x8] sm:$0xf] }
  0xb6   : > { %301 = vmatpush1.msra.mxu0 %v18166_v33  ;;  %v266_v49 = vsel %vm259_vm2, %v254_v47, 0  ;;  %19925 = vst [vmem:[#allocation16_spill] sm:$0xff] %v18241_v35 }
  0xb7   : > { %340 = vmatmul.mubr.f32.vlgmr.msra.gmra.mxu0 %v18175_v42  ;;  %460 = vmatprep.subr.mxu0 %v377_v46  ;;  %v18186_v51 = vand.u32 4294901760, %v266_v49  ;;  %v378_v52 = vand.u32 4294901760, %v377_v46  ;;  %v1211_v58 = vpop.permute.xlu1 %1210  ;;  %v386_v63 = vand.u32 4294901760, %v385_v53  ;;  %v849_v7 = vand.u32 4294901760, %v848_v60 }
  0xb8   : > { %463 = vmatpush1.msra.mxu0 %v383_v36  ;;  %496 = vmatprep.mubr.f32.mxu0 %v17921_v0  ;;  %v1215_v54 = vpop.permute.xlu0 %1214  ;;  %v1221_v3 = vsel %vm1220_vm3, %v1211_v58, %v1213_v43 }
  0xb9   : > { %v842_v55 = vsub.f32 %v266_v49, %v18186_v51  ;;  %614 = vmatprep.subr.mxu0 %v378_v52  ;;  %v379_v56 = vsub.f32 %v377_v46, %v378_v52  ;;  %v1222_v57 = vsel %vm1220_vm3, %v1213_v43, %v1215_v54  ;;  %v1228_v9 = vsel %vm259_vm2, %v1221_v3, 0 }
  0xba   : > { %v1230_v1 = vsel %vm259_vm2, %v1222_v57, 0  ;;  %v18210_v15 = vand.u32 4294901760, %v1228_v9  ;;  %v850_v17 = vsub.f32 %v848_v60, %v849_v7  ;;  %v2194_v46 = vsel %vm255_vm0, %v216_v40, 0 }
  0xbb   : > { %499 = vmatmul.mubr.f32.vlgmr.msra.gmra.mxu0 %v18159_v26  ;;  %v380_v61 = vand.u32 4294901760, %v379_v56  ;;  %v843_v62 = vand.u32 4294901760, %v842_v55  ;;  %v18201_v8 = vand.u32 4294901760, %v1230_v1  ;;  %v1219_v11 = vpop.permute.xlu1 %1218 }
  0xbc   : > { %618 = vmatpush1.msra.mxu0 %v384_v45  ;;  %651 = vmatprep.mubr.f32.mxu0 %v17921_v0  ;;  %v1217_v16 = vpop.permute.xlu0 %1216  ;;  %v1351_v21 = vsub.f32 %v1228_v9, %v18210_v15  ;;  %v851_v22 = vand.u32 4294901760, %v850_v17 }
  0xbd   : > { %381 = vmatprep.subr.mxu1 %v380_v61  ;;  %764 = vmatprep.subr.mxu0 %v18186_v51  ;;  %v844_v6 = vsub.f32 %v842_v55, %v843_v62  ;;  %v1345_v18 = vsub.f32 %v1230_v1, %v18201_v8  ;;  %v1224_v19 = vsel %vm1220_vm3, %v1217_v16, %v1219_v11 }
  0xbe   : > { %387 = vmatpush1.msra.mxu1 %v386_v63  ;;  %v1234_v23 = vsel %vm259_vm2, %v1224_v19, 0  ;;  %v1223_v27 = vsel %vm1220_vm3, %v1215_v54, %v1217_v16  ;;  %v1352_v31 = vand.u32 4294901760, %v1351_v21 }
  0xbf   : > { %422 = vmatmul.mubr.f32.vlgmr.msra.gmra.mxu1 %v18156_v25  ;;  %536 = vmatprep.subr.mxu1 %v298_v41  ;;  %v845_v12 = vand.u32 4294901760, %v844_v6  ;;  %v1346_v24 = vand.u32 4294901760, %v1345_v18  ;;  %v18232_v30 = vand.u32 4294901760, %v1234_v23  ;;  %v1232_v32 = vsel %vm259_vm2, %v1223_v27, 0  ;;  %v18249_v39 = vpop.permute.xlu1 %2182  ;;  %v217_v27 = vld [vmem:[%s19829_s1 + $0xc] sm:$0xf] }
  0xc0   : > { %653 = vmatmul.mubr.f32.vlgmr.msra.gmra.mxu0 %v18156_v25  ;;  %538 = vmatpush1.msra.mxu1 %v18166_v33  ;;  %v2181_v34 = vpop.permute.xlu0 %2180  ;;  %v18246_v37 = vand.u32 4294901760, %v1232_v32  ;;  %v1353_v38 = vsub.f32 %v1351_v21, %v1352_v31 }
  0xc1   : > { %766 = vmatpush1.msra.mxu0 %v18178_v48  ;;  %690 = vmatprep.subr.mxu1 %v298_v41  ;;  %v1810_v36 = vsub.f32 %v1234_v23, %v18232_v30  ;;  %v2190_v43 = vsel %vm2188_vm4, %v2181_v34, %v18249_v39 }
  0xc2   : > { %925 = vmatprep.subr.mxu0 %v842_v55  ;;  %571 = vmatprep.mubr.f32.mxu1 %v17921_v0  ;;  %v1816_v47 = vsub.f32 %v1232_v32, %v18246_v37  ;;  %v1354_v49 = vand.u32 4294901760, %v1353_v38 }
  0xc3   : > { %799 = vmatprep.mubr.f32.mxu0 %v17921_v0  ;;  %575 = vmatmul.mubr.f32.vlgmr.msra.gmra.mxu1 %v18162_v28  ;;  %v1811_v45 = vand.u32 4294901760, %v1810_v36 }
  0xc4   : > { %692 = vmatpush1.msra.mxu1 %v18166_v33  ;;  %805 = vmatmul.mubr.f32.vlgmr.msra.gmra.mxu0 %v18175_v42  ;;  %v1347_v33 = vsub.f32 %v1345_v18, %v1346_v24  ;;  %v2179_v44 = vpop.permute.xlu0 %2178  ;;  %v1817_v53 = vand.u32 4294901760, %v1816_v47 }
  0xc5   : > { %928 = vmatpush1.msra.mxu0 %v848_v60  ;;  %846 = vmatprep.subr.mxu1 %v845_v12  ;;  %v2189_v50 = vsel %vm2188_vm4, %v2179_v44, %v2181_v34  ;;  %v1812_v52 = vsub.f32 %v1810_v36, %v1811_v45  ;;  %v2185_v60 = vpop.permute.xlu1 %2184 }
  0xc6   : > { %1079 = vmatprep.subr.mxu0 %v843_v62  ;;  %725 = vmatprep.mubr.f32.mxu1 %v17921_v0  ;;  %v1348_v41 = vand.u32 4294901760, %v1347_v33  ;;  %v2196_v55 = vsel %vm259_vm2, %v2189_v50, 0  ;;  %v1818_v61 = vsub.f32 %v1816_v47, %v1817_v53  ;;  %v2191_v9 = vsel %vm2188_vm4, %v18249_v39, %v2185_v60 }
  0xc7   : > { %961 = vmatprep.mubr.f32.mxu0 %v17921_v0  ;;  %727 = vmatmul.mubr.f32.vlgmr.msra.gmra.mxu1 %v18156_v25  ;;  %v1813_v58 = vand.u32 4294901760, %v1812_v52  ;;  %v18285_v59 = vand.u32 4294901760, %v2196_v55  ;;  %v2200_v16 = vsel %vm259_vm2, %v2191_v9, 0  ;;  %v3162_v33 = vsel %vm255_vm0, %v217_v27, 0 }
  0xc8   : > { %852 = vmatpush1.msra.mxu1 %v851_v22  ;;  %964 = vmatmul.mubr.f32.vlgmr.msra.gmra.mxu0 %v18159_v26  ;;  %v2187_v57 = vpop.permute.xlu0 %2186  ;;  %v1819_v6 = vand.u32 4294901760, %v1818_v61  ;;  %v18322_v22 = vand.u32 4294901760, %v2200_v16  ;;  %v18344_v39 = vand.u32 4294901760, %v3162_v33  ;;  %v4115_v27 = vsel %vm259_vm2, %v18071_v2, 0 }
  0xc9   : > { %1083 = vmatpush1.msra.mxu0 %v849_v7  ;;  %1001 = vmatprep.subr.mxu1 %v18186_v51  ;;  %v2192_v63 = vsel %vm2188_vm4, %v2185_v60, %v2187_v57  ;;  %v2319_v3 = vsub.f32 %v2196_v55, %v18285_v59 }
  0xca   : > { %885 = vmatprep.mubr.f32.mxu1 %v17921_v0  ;;  %1116 = vmatprep.mubr.f32.mxu0 %v17921_v0  ;;  %v2202_v7 = vsel %vm259_vm2, %v2192_v63, 0  ;;  %v2784_v34 = vsub.f32 %v2200_v16, %v18322_v22  ;;  %19930 = vst [vmem:[#allocation21_spill] sm:$0xff] %v18344_v39 }
  0xcb   : > { %1267 = vmatprep.subr.mxu0 %v18201_v8  ;;  %887 = vmatmul.mubr.f32.vlgmr.msra.gmra.mxu1 %v18156_v25  ;;  %v18308_v12 = vand.u32 4294901760, %v2202_v7 }
  0xcc   : > { %1003 = vmatpush1.msra.mxu1 %v18178_v48  ;;  %1118 = vmatmul.mubr.f32.vlgmr.msra.gmra.mxu0 %v18156_v25 }
  0xcd   : > { %1269 = vmatpush1.msra.mxu0 %v18210_v15  ;;  %1155 = vmatprep.subr.mxu1 %v18186_v51  ;;  %v18268_v51 = vand.u32 4294901760, %v2194_v46 }
  0xce   : > { %1428 = vmatprep.subr.mxu0 %v1345_v18  ;;  %1036 = vmatprep.mubr.f32.mxu1 %v17921_v0  ;;  %v3149_v18 = vpop.permute.xlu1 %3148 }
  0xcf   : > { %1302 = vmatprep.mubr.f32.mxu0 %v17921_v0  ;;  %1040 = vmatmul.mubr.f32.vlgmr.msra.gmra.mxu1 %v18162_v28  ;;  %19926 = vst [vmem:[#allocation17_spill] sm:$0xff] %v18268_v51  ;;  %v18281_v56 = vsub.f32 %v2194_v46, %v18268_v51 }
  0xd0   : > { %1157 = vmatpush1.msra.mxu1 %v18178_v48  ;;  %1308 = vmatmul.mubr.f32.vlgmr.msra.gmra.mxu0 %v18241_v35  ;;  %v2198_v48 = vsel %vm259_vm2, %v2190_v43, 0 }
  0xd1   : > { %1431 = vmatpush1.msra.mxu0 %v1351_v21  ;;  %1349 = vmatprep.subr.mxu1 %v1348_v41  ;;  %v18275_v54 = vand.u32 4294901760, %v2198_v48  ;;  %19927 = vst [vmem:[#allocation18_spill] sm:$0xff] %v18281_v56  ;;  %v18295_v1 = vand.u32 4294901760, %v18281_v56  ;;  %v2778_v21 = vsub.f32 %v2202_v7, %v18308_v12  ;;  %v2785_v41 = vand.u32 4294901760, %v2784_v34 }
  0xd2   : > { %1582 = vmatprep.subr.mxu0 %v1346_v24  ;;  %1190 = vmatprep.mubr.f32.mxu1 %v17921_v0  ;;  %v18325_v24 = vpop.permute.xlu0 %3150 }
  0xd3   : > { %1464 = vmatprep.mubr.f32.mxu0 %v17921_v0  ;;  %1192 = vmatmul.mubr.f32.vlgmr.msra.gmra.mxu1 %v18156_v25  ;;  %v2313_v62 = vsub.f32 %v2198_v48, %v18275_v54  ;;  %19928 = vst [vmem:[#allocation19_spill] sm:$0xff] %v18295_v1  ;;  %v2274_v11 = vsub.f32 %v18281_v56, %v18295_v1  ;;  %v2779_v32 = vand.u32 4294901760, %v2778_v21 }
  0xd4   : > { %1355 = vmatpush1.msra.mxu1 %v1354_v49  ;;  %1467 = vmatmul.mubr.f32.vlgmr.msra.gmra.mxu0 %v18207_v10  ;;  %v2786_v50 = vsub.f32 %v2784_v34, %v2785_v41 }
  0xd5   : > { %1586 = vmatpush1.msra.mxu0 %v1352_v31  ;;  %1504 = vmatprep.subr.mxu1 %v18201_v8  ;;  %v18317_v19 = vand.u32 4294901760, %v2274_v11  ;;  %v3147_v31 = vpop.permute.xlu1 %3146  ;;  %v2780_v40 = vsub.f32 %v2778_v21, %v2779_v32 }
  0xd6   : > { %1388 = vmatprep.mubr.f32.mxu1 %v17921_v0  ;;  %1619 = vmatprep.mubr.f32.mxu0 %v17921_v0  ;;  %v3157_v38 = vsel %vm3156_vm5, %v3147_v31, %v3149_v18  ;;  %v3153_v48 = vpop.permute.xlu0 %3152  ;;  %v2787_v57 = vand.u32 4294901760, %v2786_v50 }
  0xd7   : > { %1732 = vmatprep.subr.mxu0 %v18232_v30  ;;  %1390 = vmatmul.mubr.f32.vlgmr.msra.gmra.mxu1 %v18197_v5  ;;  %19929 = vst [vmem:[#allocation20_spill] sm:$0xff] %v18317_v19  ;;  %v3164_v44 = vsel %vm259_vm2, %v3157_v38, 0  ;;  %v3159_v60 = vsel %vm3156_vm5, %v18325_v24, %v3153_v48 }
  0xd8   : > { %1506 = vmatpush1.msra.mxu1 %v18210_v15  ;;  %1621 = vmatmul.mubr.f32.vlgmr.msra.gmra.mxu0 %v18197_v5  ;;  %v18361_v49 = vand.u32 4294901760, %v3164_v44 }
  0xd9   : > { %1734 = vmatpush1.msra.mxu0 %v18246_v37  ;;  %1658 = vmatprep.subr.mxu1 %v18201_v8  ;;  %v2314_v8 = vand.u32 4294901760, %v2313_v62  ;;  %v3155_v46 = vpop.permute.xlu1 %3154 }
  0xda   : > { %1893 = vmatprep.subr.mxu0 %v1810_v36  ;;  %1539 = vmatprep.mubr.f32.mxu1 %v17921_v0  ;;  %v3287_v55 = vsub.f32 %v3164_v44, %v18361_v49  ;;  %v4119_v44 = vsel %vm259_vm2, %v18107_v13, 0 }
  0xdb   : > { %1767 = vmatprep.mubr.f32.mxu0 %v17921_v0  ;;  %1543 = vmatmul.mubr.f32.vlgmr.msra.gmra.mxu1 %v18220_v20  ;;  %v2315_v17 = vsub.f32 %v2313_v62, %v2314_v8  ;;  %v18467_v13 = vand.u32 4294901760, %v4119_v44 }
  0xdc   : > { %1660 = vmatpush1.msra.mxu1 %v18210_v15  ;;  %1773 = vmatmul.mubr.f32.vlgmr.msra.gmra.mxu0 %v18241_v35  ;;  %v2320_v15 = vand.u32 4294901760, %v2319_v3  ;;  %v3288_v63 = vand.u32 4294901760, %v3287_v55 }
  0xdd   : > { %1896 = vmatpush1.msra.mxu0 %v1816_v47  ;;  %1814 = vmatprep.subr.mxu1 %v1813_v58  ;;  %v2316_v29 = vand.u32 4294901760, %v2315_v17  ;;  %v2781_v47 = vand.u32 4294901760, %v2780_v40 }
  0xde   : > { %2047 = vmatprep.subr.mxu0 %v1811_v45  ;;  %1693 = vmatprep.mubr.f32.mxu1 %v17921_v0  ;;  %v2321_v23 = vsub.f32 %v2319_v3, %v2320_v15  ;;  %v18357_v45 = vsub.f32 %v3162_v33, %v18344_v39  ;;  %v3289_v11 = vsub.f32 %v3287_v55, %v3288_v63 }
  0xdf   : > { %1929 = vmatprep.mubr.f32.mxu0 %v17921_v0  ;;  %1695 = vmatmul.mubr.f32.vlgmr.msra.gmra.mxu1 %v18197_v5 }
  0xe0   : > { %1820 = vmatpush1.msra.mxu1 %v1819_v6  ;;  %1932 = vmatmul.mubr.f32.vlgmr.msra.gmra.mxu0 %v18207_v10  ;;  %v2322_v36 = vand.u32 4294901760, %v2321_v23  ;;  %19931 = vst [vmem:[#allocation22_spill] sm:$0xff] %v18357_v45 }
  0xe1   : > { %2051 = vmatpush1.msra.mxu0 %v1817_v53  ;;  %1969 = vmatprep.subr.mxu1 %v18232_v30  ;;  %v3160_v53 = vsel %vm3156_vm5, %v3153_v48, %v3155_v46 }
  0xe2   : > { %1853 = vmatprep.mubr.f32.mxu1 %v17921_v0  ;;  %2084 = vmatprep.mubr.f32.mxu0 %v17921_v0  ;;  %v3170_v58 = vsel %vm259_vm2, %v3160_v53, 0  ;;  %v219_v53 = vld [vmem:[%s19829_s1 + $0x14] sm:$0xf] }
  0xe3   : > { %2235 = vmatprep.subr.mxu0 %v18275_v54  ;;  %1855 = vmatmul.mubr.f32.vlgmr.msra.gmra.mxu1 %v18197_v5 }
  0xe4   : > { %1971 = vmatpush1.msra.mxu1 %v18246_v37  ;;  %2086 = vmatmul.mubr.f32.vlgmr.msra.gmra.mxu0 %v18197_v5 }
  0xe5   : > { %2237 = vmatpush1.msra.mxu0 %v18285_v59  ;;  %2123 = vmatprep.subr.mxu1 %v18232_v30  ;;  %v3158_v30 = vsel %vm3156_vm5, %v3149_v18, %v18325_v24 }
  0xe6   : > { %2396 = vmatprep.subr.mxu0 %v2313_v62  ;;  %2004 = vmatprep.mubr.f32.mxu1 %v17921_v0  ;;  %v18384_v62 = vand.u32 4294901760, %v3170_v58 }
  0xe7   : > { %2270 = vmatprep.mubr.f32.mxu0 %v17921_v0  ;;  %2008 = vmatmul.mubr.f32.vlgmr.msra.gmra.mxu1 %v18220_v20 }
  0xe8   : > { %2125 = vmatpush1.msra.mxu1 %v18246_v37  ;;  %2276 = vmatmul.mubr.f32.vlgmr.msra.gmra.mxu0 %v18317_v19  ;;  %v3166_v37 = vsel %vm259_vm2, %v3158_v30, 0 }
  0xe9   : > { %2399 = vmatpush1.msra.mxu0 %v2319_v3  ;;  %2317 = vmatprep.subr.mxu1 %v2316_v29  ;;  %v18351_v43 = vand.u32 4294901760, %v3166_v37  ;;  %v3168_v3 = vsel %vm259_vm2, %v3159_v60, 0 }
  0xea   : > { %2550 = vmatprep.subr.mxu0 %v2314_v8  ;;  %2158 = vmatprep.mubr.f32.mxu1 %v17921_v0  ;;  %v3746_v8 = vsub.f32 %v3170_v58, %v18384_v62  ;;  %v18398_v9 = vand.u32 4294901760, %v3168_v3  ;;  %v4703_v58 = vsub.f32 %v4119_v44, %v18467_v13 }
  0xeb   : > { %2432 = vmatprep.mubr.f32.mxu0 %v17921_v0  ;;  %2160 = vmatmul.mubr.f32.vlgmr.msra.gmra.mxu1 %v18197_v5  ;;  %v3281_v52 = vsub.f32 %v3166_v37, %v18351_v43 }
  0xec   : > { %2323 = vmatpush1.msra.mxu1 %v2322_v36  ;;  %2435 = vmatmul.mubr.f32.vlgmr.msra.gmra.mxu0 %v18281_v56  ;;  %v3752_v18 = vsub.f32 %v3168_v3, %v18398_v9 }
  0xed   : > { %2554 = vmatpush1.msra.mxu0 %v2320_v15  ;;  %2472 = vmatprep.subr.mxu1 %v18275_v54  ;;  %v218_v15 = vld [vmem:[%s19829_s1 + $0x10] sm:$0xf] }
  0xee   : > { %2356 = vmatprep.mubr.f32.mxu1 %v17921_v0  ;;  %2587 = vmatprep.mubr.f32.mxu0 %v17921_v0  ;;  %v4113_v17 = vsel %vm255_vm0, %v218_v15, 0  ;;  %v3753_v29 = vand.u32 4294901760, %v3752_v18 }
  0xef   : > { %2700 = vmatprep.subr.mxu0 %v18308_v12  ;;  %2358 = vmatmul.mubr.f32.vlgmr.msra.gmra.mxu1 %v18268_v51  ;;  %v18416_v23 = vand.u32 4294901760, %v4113_v17 }
  0xf0   : > { %2474 = vmatpush1.msra.mxu1 %v18285_v59  ;;  %2589 = vmatmul.mubr.f32.vlgmr.msra.gmra.mxu0 %v18268_v51 }
  0xf1   : > { %2702 = vmatpush1.msra.mxu0 %v18322_v22  ;;  %2626 = vmatprep.subr.mxu1 %v18275_v54  ;;  %v18371_v54 = vand.u32 4294901760, %v18357_v45  ;;  %19934 = vst [vmem:[#allocation25_spill] sm:$0xff] %v18416_v23  ;;  %v18432_v31 = vsub.f32 %v4113_v17, %v18416_v23 }
  0xf2   : > { %2861 = vmatprep.subr.mxu0 %v2778_v21  ;;  %2507 = vmatprep.mubr.f32.mxu1 %v17921_v0  ;;  %v3290_v21 = vand.u32 4294901760, %v3289_v11 }
  0xf3   : > { %2735 = vmatprep.mubr.f32.mxu0 %v17921_v0  ;;  %2511 = vmatmul.mubr.f32.vlgmr.msra.gmra.mxu1 %v18295_v1  ;;  %19932 = vst [vmem:[#allocation23_spill] sm:$0xff] %v18371_v54  ;;  %v3242_v61 = vsub.f32 %v18357_v45, %v18371_v54  ;;  %19935 = vst [vmem:[#allocation26_spill] sm:$0xff] %v18432_v31 }
  0xf4   : > { %2628 = vmatpush1.msra.mxu1 %v18285_v59  ;;  %2741 = vmatmul.mubr.f32.vlgmr.msra.gmra.mxu0 %v18317_v19  ;;  %v3282_v59 = vand.u32 4294901760, %v3281_v52 }
  0xf5   : > { %2864 = vmatpush1.msra.mxu0 %v2784_v34  ;;  %2782 = vmatprep.subr.mxu1 %v2781_v47  ;;  %v18393_v7 = vand.u32 4294901760, %v3242_v61  ;;  %v18443_v34 = vand.u32 4294901760, %v18432_v31  ;;  %v5068_v47 = vpop.permute.xlu0 %5067  ;;  %v5081_v61 = vsel %vm255_vm0, %v219_v53, 0 }
  0xf6   : > { %3015 = vmatprep.subr.mxu0 %v2779_v32  ;;  %2661 = vmatprep.mubr.f32.mxu1 %v17921_v0  ;;  %v3283_v6 = vsub.f32 %v3281_v52, %v3282_v59  ;;  %v3754_v32 = vsub.f32 %v3752_v18, %v3753_v29 }
  0xf7   : > { %2897 = vmatprep.mubr.f32.mxu0 %v17921_v0  ;;  %2663 = vmatmul.mubr.f32.vlgmr.msra.gmra.mxu1 %v18268_v51  ;;  %19933 = vst [vmem:[#allocation24_spill] sm:$0xff] %v18393_v7  ;;  %19936 = vst [vmem:[#allocation27_spill] sm:$0xff] %v18443_v34  ;;  %v4193_v40 = vsub.f32 %v18432_v31, %v18443_v34 }
  0xf8   : > { %2788 = vmatpush1.msra.mxu1 %v2787_v57  ;;  %2900 = vmatmul.mubr.f32.vlgmr.msra.gmra.mxu0 %v18281_v56  ;;  %v3284_v16 = vand.u32 4294901760, %v3283_v6  ;;  %v3755_v37 = vand.u32 4294901760, %v3754_v32  ;;  %v4704_v6 = vand.u32 4294901760, %v4703_v58 }
  0xf9   : > { %3019 = vmatpush1.msra.mxu0 %v2785_v41  ;;  %2937 = vmatprep.subr.mxu1 %v18308_v12  ;;  %v5066_v60 = vpop.permute.xlu0 %5065 }
  0xfa   : > { %2821 = vmatprep.mubr.f32.mxu1 %v17921_v0  ;;  %3052 = vmatprep.mubr.f32.mxu0 %v17921_v0  ;;  %v5076_v3 = vsel %vm5075_vm6, %v5066_v60, %v5068_v47 }
  0xfb   : > { %3203 = vmatprep.subr.mxu0 %v18351_v43  ;;  %2823 = vmatmul.mubr.f32.vlgmr.msra.gmra.mxu1 %v18268_v51  ;;  %v5083_v11 = vsel %vm259_vm2, %v5076_v3, 0 }
  0xfc   : > { %2939 = vmatpush1.msra.mxu1 %v18322_v22  ;;  %3054 = vmatmul.mubr.f32.vlgmr.msra.gmra.mxu0 %v18268_v51 }
  0xfd   : > { %3205 = vmatpush1.msra.mxu0 %v18361_v49  ;;  %3091 = vmatprep.subr.mxu1 %v18308_v12  ;;  %v3747_v12 = vand.u32 4294901760, %v3746_v8  ;;  %v5074_v17 = vpop.permute.xlu0 %5073 }
  0xfe   : > { %3364 = vmatprep.subr.mxu0 %v3281_v52  ;;  %2972 = vmatprep.mubr.f32.mxu1 %v17921_v0  ;;  %v18473_v52 = vpop.permute.xlu1 %5069 }
  0xff   : > { %3238 = vmatprep.mubr.f32.mxu0 %v17921_v0  ;;  %2976 = vmatmul.mubr.f32.vlgmr.msra.gmra.mxu1 %v18295_v1  ;;  %v3748_v24 = vsub.f32 %v3746_v8, %v3747_v12 }
 0x100   : > { %3093 = vmatpush1.msra.mxu1 %v18322_v22  ;;  %3244 = vmatmul.mubr.f32.vlgmr.msra.gmra.mxu0 %v18393_v7  ;;  %v4117_v22 = vsel %vm259_vm2, %v18076_v4, 0  ;;  %v18429_v4 = vand.u32 4294901760, %v4115_v27 }
 0x101   : > { %3367 = vmatpush1.msra.mxu0 %v3287_v55  ;;  %3285 = vmatprep.subr.mxu1 %v3284_v16  ;;  %v18423_v30 = vand.u32 4294901760, %v4117_v22  ;;  %v3749_v2 = vand.u32 4294901760, %v3748_v24  ;;  %v4705_v16 = vsub.f32 %v4703_v58, %v4704_v6 }
 0x102   : > { %3518 = vmatprep.subr.mxu0 %v3282_v59  ;;  %3126 = vmatprep.mubr.f32.mxu1 %v17921_v0  ;;  %v4238_v36 = vsub.f32 %v4115_v27, %v18429_v4  ;;  %v5077_v59 = vsel %vm5075_vm6, %v5068_v47, %v18473_v52 }
 0x103   : > { %3400 = vmatprep.mubr.f32.mxu0 %v17921_v0  ;;  %3128 = vmatmul.mubr.f32.vlgmr.msra.gmra.mxu1 %v18268_v51  ;;  %v4232_v33 = vsub.f32 %v4117_v22, %v18423_v30 }
 0x104   : > { %3291 = vmatpush1.msra.mxu1 %v3290_v21  ;;  %3403 = vmatmul.mubr.f32.vlgmr.msra.gmra.mxu0 %v18357_v45  ;;  %v4239_v41 = vand.u32 4294901760, %v4238_v36  ;;  %v5072_v21 = vpop.permute.xlu1 %5071 }
 0x105   : > { %3522 = vmatpush1.msra.mxu0 %v3288_v63  ;;  %3440 = vmatprep.subr.mxu1 %v18351_v43  ;;  %v4233_v38 = vand.u32 4294901760, %v4232_v33  ;;  %v5085_v63 = vsel %vm259_vm2, %v5077_v59, 0  ;;  %v5079_v27 = vsel %vm5075_vm6, %v5072_v21, %v5074_v17 }
 0x106   : > { %3324 = vmatprep.mubr.f32.mxu1 %v17921_v0  ;;  %3555 = vmatprep.mubr.f32.mxu0 %v17921_v0  ;;  %v4240_v48 = vsub.f32 %v4238_v36, %v4239_v41  ;;  %v5089_v32 = vsel %vm259_vm2, %v5079_v27, 0 }
 0x107   : > { %3668 = vmatprep.subr.mxu0 %v18384_v62  ;;  %3326 = vmatmul.mubr.f32.vlgmr.msra.gmra.mxu1 %v18344_v39  ;;  %v4234_v46 = vsub.f32 %v4232_v33, %v4233_v38 }
 0x108   : > { %3442 = vmatpush1.msra.mxu1 %v18361_v49  ;;  %3557 = vmatmul.mubr.f32.vlgmr.msra.gmra.mxu0 %v18344_v39  ;;  %v4241_v57 = vand.u32 4294901760, %v4240_v48 }
 0x109   : > { %3670 = vmatpush1.msra.mxu0 %v18398_v9  ;;  %3594 = vmatprep.subr.mxu1 %v18351_v43  ;;  %v4121_v43 = vsel %vm259_vm2, %v18112_v14, 0  ;;  %v18465_v14 = vand.u32 4294901760, %v4193_v40  ;;  %v4235_v50 = vand.u32 4294901760, %v4234_v46 }
 0x10a   : > { %3829 = vmatprep.subr.mxu0 %v3746_v8  ;;  %3475 = vmatprep.mubr.f32.mxu1 %v17921_v0  ;;  %v18492_v8 = vand.u32 4294901760, %v5081_v61 }
 0x10b   : > { %3703 = vmatprep.mubr.f32.mxu0 %v17921_v0  ;;  %3479 = vmatmul.mubr.f32.vlgmr.msra.gmra.mxu1 %v18371_v54  ;;  %19937 = vst [vmem:[#allocation28_spill] sm:$0xff] %v18465_v14 }
 0x10c   : > { %3596 = vmatpush1.msra.mxu1 %v18361_v49  ;;  %3709 = vmatmul.mubr.f32.vlgmr.msra.gmra.mxu0 %v18393_v7  ;;  %v18461_v49 = vand.u32 4294901760, %v4121_v43  ;;  %19938 = vst [vmem:[#allocation29_spill] sm:$0xff] %v18492_v8 }
 0x10d   : > { %3832 = vmatpush1.msra.mxu0 %v3752_v18  ;;  %3750 = vmatprep.subr.mxu1 %v3749_v2  ;;  %v18509_v18 = vand.u32 4294901760, %v5083_v11 }
 0x10e   : > { %3983 = vmatprep.subr.mxu0 %v3747_v12  ;;  %3629 = vmatprep.mubr.f32.mxu1 %v17921_v0  ;;  %v4697_v55 = vsub.f32 %v4121_v43, %v18461_v49  ;;  %v18505_v12 = vsub.f32 %v5081_v61, %v18492_v8  ;;  %v6036_v43 = vpop.permute.xlu1 %6035 }
 0x10f   : > { %3865 = vmatprep.mubr.f32.mxu0 %v17921_v0  ;;  %3631 = vmatmul.mubr.f32.vlgmr.msra.gmra.mxu1 %v18344_v39 }
 0x110   : > { %3756 = vmatpush1.msra.mxu1 %v3755_v37  ;;  %3868 = vmatmul.mubr.f32.vlgmr.msra.gmra.mxu0 %v18357_v45  ;;  %19939 = vst [vmem:[#allocation30_spill] sm:$0xff] %v18505_v12  ;;  %v18519_v2 = vand.u32 4294901760, %v18505_v12  ;;  %v18531_v37 = vld [vmem:[#allocation2] sm:$0xff] }
 0x111   : > { %3987 = vmatpush1.msra.mxu0 %v3753_v29  ;;  %3905 = vmatprep.subr.mxu1 %v18384_v62  ;;  %v4706_v29 = vand.u32 4294901760, %v4705_v16 }
 0x112   : > { %3789 = vmatprep.mubr.f32.mxu1 %v17921_v0  ;;  %4020 = vmatprep.mubr.f32.mxu0 %v17921_v0  ;;  %19940 = vst [vmem:[#allocation31_spill] sm:$0xff] %v18519_v2 }
 0x113   : > { %3791 = vmatmul.mubr.f32.vlgmr.msra.gmra.mxu1 %v18344_v39  ;;  %4154 = vmatprep.subr.mxu0 %v18423_v30 }
 0x114   : > { %3907 = vmatpush1.msra.mxu1 %v18398_v9  ;;  %4022 = vmatmul.mubr.f32.vlgmr.msra.gmra.mxu0 %v18344_v39 }
 0x115   : > { %4059 = vmatprep.subr.mxu1 %v18384_v62  ;;  %3940 = vmatprep.mubr.f32.mxu1 %v17921_v0  ;;  %v4698_v62 = vand.u32 4294901760, %v4697_v55 }
 0x116   : > { %4156 = vmatpush1.msra.mxu0 %v18429_v4  ;;  %4189 = vmatprep.mubr.f32.mxu0 %v17921_v0 }
 0x117   : > { %3944 = vmatmul.mubr.f32.vlgmr.msra.gmra.mxu1 %v18371_v54  ;;  %4315 = vmatprep.subr.mxu0 %v4232_v33  ;;  %v4699_v15 = vsub.f32 %v4697_v55, %v4698_v62 }
 0x118   : > { %4061 = vmatpush1.msra.mxu1 %v18398_v9  ;;  %4195 = vmatmul.mubr.f32.vlgmr.msra.gmra.mxu0 %v18465_v14  ;;  %v18498_v9 = vand.u32 4294901760, %v5085_v63 }
 0x119   : > { %4094 = vmatprep.mubr.f32.mxu1 %v17921_v0  ;;  %4318 = vmatpush1.msra.mxu0 %v4238_v36  ;;  %v4700_v24 = vand.u32 4294901760, %v4699_v15  ;;  %v5161_v36 = vsub.f32 %v18505_v12, %v18519_v2 }
 0x11a   : > { %4351 = vmatprep.mubr.f32.mxu0 %v17921_v0  ;;  %4236 = vmatprep.subr.mxu1 %v4235_v50  ;;  %v5200_v22 = vsub.f32 %v5085_v63, %v18498_v9  ;;  %v18551_v50 = vpop.permute.xlu0 %6037 }
 0x11b   : > { %4096 = vmatmul.mubr.f32.vlgmr.msra.gmra.mxu1 %v18344_v39  ;;  %4469 = vmatprep.subr.mxu0 %v4233_v38  ;;  %v18543_v44 = vand.u32 4294901760, %v5161_v36 }
 0x11c   : > { %4354 = vmatmul.mubr.f32.vlgmr.msra.gmra.mxu0 %v18432_v31  ;;  %4242 = vmatpush1.msra.mxu1 %v4241_v57  ;;  %v5201_v33 = vand.u32 4294901760, %v5200_v22 }
 0x11d   : > { %4275 = vmatprep.mubr.f32.mxu1 %v17921_v0  ;;  %4473 = vmatpush1.msra.mxu0 %v4239_v41  ;;  %19941 = vst [vmem:[#allocation32_spill] sm:$0xff] %v18543_v44 }
 0x11e   : > { %4506 = vmatprep.mubr.f32.mxu0 %v17921_v0  ;;  %4391 = vmatprep.subr.mxu1 %v18423_v30  ;;  %v5202_v41 = vsub.f32 %v5200_v22, %v5201_v33 }
 0x11f   : > { %4277 = vmatmul.mubr.f32.vlgmr.msra.gmra.mxu1 %v18416_v23  ;;  %4619 = vmatprep.subr.mxu0 %v18461_v49 }
 0x120   : > { %4508 = vmatmul.mubr.f32.vlgmr.msra.gmra.mxu0 %v18416_v23  ;;  %4393 = vmatpush1.msra.mxu1 %v18429_v4  ;;  %v5203_v53 = vand.u32 4294901760, %v5202_v41 }
 0x121   : > { %4426 = vmatprep.mubr.f32.mxu1 %v17921_v0  ;;  %4621 = vmatpush1.msra.mxu0 %v18467_v13 }
 0x122   : > { %4654 = vmatprep.mubr.f32.mxu0 %v17921_v0  ;;  %4545 = vmatprep.subr.mxu1 %v18423_v30  ;;  %v5206_v30 = vsub.f32 %v5083_v11, %v18509_v18 }
 0x123   : > { %4430 = vmatmul.mubr.f32.vlgmr.msra.gmra.mxu1 %v18443_v34  ;;  %4780 = vmatprep.subr.mxu0 %v4697_v55  ;;  %v6034_v55 = vpop.permute.xlu1 %6033 }
 0x124   : > { %4660 = vmatmul.mubr.f32.vlgmr.msra.gmra.mxu0 %v18465_v14  ;;  %4547 = vmatpush1.msra.mxu1 %v18429_v4  ;;  %v5078_v4 = vsel %vm5075_vm6, %v18473_v52, %v5072_v21  ;;  %v5207_v38 = vand.u32 4294901760, %v5206_v30  ;;  %v220_v52 = vld [vmem:[%s19829_s1 + $0x18] sm:$0xf]  ;;  %v6044_v61 = vsel %vm6043_vm7, %v6034_v55, %v6036_v43  ;;  %v221_v55 = vld [vmem:[%s19829_s1 + $0x1c] sm:$0xf] }
 0x125   : > { %4580 = vmatprep.mubr.f32.mxu1 %v17921_v0  ;;  %4783 = vmatpush1.msra.mxu0 %v4703_v58  ;;  %v5087_v40 = vsel %vm259_vm2, %v5078_v4, 0  ;;  %v6049_v58 = vsel %vm255_vm0, %v220_v52, 0  ;;  %v6051_v11 = vsel %vm259_vm2, %v6044_v61, 0 }
 0x126   : > { %4816 = vmatprep.mubr.f32.mxu0 %v17921_v0  ;;  %4934 = vmatprep.subr.mxu0 %v4698_v62  ;;  %v18534_v0 = vand.u32 4294901760, %v5089_v32  ;;  %v18548_v47 = vand.u32 4294901760, %v5087_v40  ;;  %v5208_v48 = vsub.f32 %v5206_v30, %v5207_v38  ;;  %v18570_v62 = vand.u32 4294901760, %v6049_v58 }
 0x127   : > { %4582 = vmatmul.mubr.f32.vlgmr.msra.gmra.mxu1 %v18416_v23  ;;  %4701 = vmatprep.subr.mxu1 %v4700_v24  ;;  %v6042_v16 = vpop.permute.xlu1 %6041  ;;  %v18587_v21 = vand.u32 4294901760, %v6051_v11 }
 0x128   : > { %4819 = vmatmul.mubr.f32.vlgmr.msra.gmra.mxu0 %v18432_v31  ;;  %4707 = vmatpush1.msra.mxu1 %v4706_v29  ;;  %v5665_v46 = vsub.f32 %v5089_v32, %v18534_v0  ;;  %v5671_v59 = vsub.f32 %v5087_v40, %v18548_v47  ;;  %v5209_v60 = vand.u32 4294901760, %v5208_v48  ;;  %19942 = vst [vmem:[#allocation33_spill] sm:$0xff] %v18570_v62 }
 0x129   : > { %4938 = vmatpush1.msra.mxu0 %v4704_v6  ;;  %4740 = vmatprep.mubr.f32.mxu1 %v18531_v37  ;;  %v18583_v15 = vsub.f32 %v6049_v58, %v18570_v62 }
 0x12a   : > { %4971 = vmatprep.mubr.f32.mxu0 %v18531_v37  ;;  %5122 = vmatprep.subr.mxu0 %v18498_v9  ;;  %v5666_v57 = vand.u32 4294901760, %v5665_v46  ;;  %v5672_v3 = vand.u32 4294901760, %v5671_v59 }
 0x12b   : > { %4742 = vmatmul.mubr.f32.vlgmr.msra.gmra.mxu1 %v18416_v23  ;;  %4856 = vmatprep.subr.mxu1 %v18461_v49  ;;  %19943 = vst [vmem:[#allocation34_spill] sm:$0xff] %v18583_v15 }
 0x12c   : > { %4973 = vmatmul.mubr.f32.vlgmr.msra.gmra.mxu0 %v18416_v23  ;;  %4858 = vmatpush1.msra.mxu1 %v18467_v13  ;;  %v5667_v63 = vsub.f32 %v5665_v46, %v5666_v57  ;;  %v5673_v24 = vsub.f32 %v5671_v59, %v5672_v3 }
 0x12d   : > { %5124 = vmatpush1.msra.mxu0 %v18509_v18  ;;  %4891 = vmatprep.mubr.f32.mxu1 %v18531_v37 }
 0x12e   : > { %5283 = vmatprep.subr.mxu0 %v5200_v22  ;;  %5010 = vmatprep.subr.mxu1 %v18461_v49  ;;  %v6045_v49 = vsel %vm6043_vm7, %v6036_v43, %v18551_v50  ;;  %v5668_v17 = vand.u32 4294901760, %v5667_v63  ;;  %v6040_v22 = vpop.permute.xlu0 %6039  ;;  %v5674_v32 = vand.u32 4294901760, %v5673_v24 }
 0x12f   : > { %5157 = vmatprep.mubr.f32.mxu0 %v18531_v37  ;;  %4895 = vmatmul.mubr.f32.vlgmr.msra.gmra.mxu1 %v18443_v34  ;;  %v6047_v29 = vsel %vm6043_vm7, %v6040_v22, %v6042_v16  ;;  %v6046_v4 = vsel %vm6043_vm7, %v18551_v50, %v6040_v22 }
 0x130   : > { %5012 = vmatpush1.msra.mxu1 %v18467_v13  ;;  %5163 = vmatmul.mubr.f32.vlgmr.msra.gmra.mxu0 %v18543_v44  ;;  %v6053_v13 = vsel %vm259_vm2, %v6045_v49, 0  ;;  %v6055_v41 = vsel %vm259_vm2, %v6046_v4, 0  ;;  %v18627_v49 = vpop.permute.xlu1 %7005 }
 0x131   : > { %5286 = vmatpush1.msra.mxu0 %v5206_v30  ;;  %5204 = vmatprep.subr.mxu1 %v5203_v53  ;;  %v18577_v6 = vand.u32 4294901760, %v6053_v13  ;;  %v6174_v30 = vsub.f32 %v6051_v11, %v18587_v21  ;;  %v18624_v52 = vand.u32 4294901760, %v6055_v41 }
 0x132   : > { %5437 = vmatprep.subr.mxu0 %v5201_v33  ;;  %5045 = vmatprep.mubr.f32.mxu1 %v18531_v37  ;;  %v6057_v33 = vsel %vm259_vm2, %v6047_v29, 0 }
 0x133   : > { %5319 = vmatprep.mubr.f32.mxu0 %v18531_v37  ;;  %5047 = vmatmul.mubr.f32.vlgmr.msra.gmra.mxu1 %v18416_v23  ;;  %v6168_v27 = vsub.f32 %v6053_v13, %v18577_v6  ;;  %v6175_v40 = vand.u32 4294901760, %v6174_v30  ;;  %v6639_v13 = vsub.f32 %v6055_v41, %v18624_v52 }
 0x134   : > { %5210 = vmatpush1.msra.mxu1 %v5209_v60  ;;  %5322 = vmatmul.mubr.f32.vlgmr.msra.gmra.mxu0 %v18505_v12  ;;  %v7017_v60 = vsel %vm255_vm0, %v221_v55, 0 }
 0x135   : > { %5441 = vmatpush1.msra.mxu0 %v5207_v38  ;;  %5359 = vmatprep.subr.mxu1 %v18498_v9  ;;  %v18610_v38 = vand.u32 4294901760, %v6057_v33  ;;  %v6176_v53 = vsub.f32 %v6174_v30, %v6175_v40  ;;  %v6640_v16 = vand.u32 4294901760, %v6639_v13 }
 0x136   : > { %5243 = vmatprep.mubr.f32.mxu1 %v18531_v37  ;;  %5474 = vmatprep.mubr.f32.mxu0 %v18531_v37 }
 0x137   : > { %5587 = vmatprep.subr.mxu0 %v18534_v0  ;;  %5245 = vmatmul.mubr.f32.vlgmr.msra.gmra.mxu1 %v18492_v8  ;;  %v6633_v50 = vsub.f32 %v6057_v33, %v18610_v38  ;;  %v6177_v61 = vand.u32 4294901760, %v6176_v53  ;;  %v6641_v33 = vsub.f32 %v6639_v13, %v6640_v16 }
 0x138   : > { %5361 = vmatpush1.msra.mxu1 %v18509_v18  ;;  %5476 = vmatmul.mubr.f32.vlgmr.msra.gmra.mxu0 %v18492_v8 }
 0x139   : > { %5589 = vmatpush1.msra.mxu0 %v18548_v47  ;;  %5513 = vmatprep.subr.mxu1 %v18498_v9  ;;  %v18597_v9 = vand.u32 4294901760, %v18583_v15 }
 0x13a   : > { %5748 = vmatprep.subr.mxu0 %v5665_v46  ;;  %5394 = vmatprep.mubr.f32.mxu1 %v18531_v37  ;;  %v7004_v46 = vpop.permute.xlu0 %7003 }
 0x13b   : > { %5622 = vmatprep.mubr.f32.mxu0 %v18531_v37  ;;  %5398 = vmatmul.mubr.f32.vlgmr.msra.gmra.mxu1 %v18519_v2  ;;  %19944 = vst [vmem:[#allocation35_spill] sm:$0xff] %v18597_v9  ;;  %v6129_v36 = vsub.f32 %v18583_v15, %v18597_v9 }
 0x13c   : > { %5515 = vmatpush1.msra.mxu1 %v18509_v18  ;;  %5628 = vmatmul.mubr.f32.vlgmr.msra.gmra.mxu0 %v18543_v44  ;;  %v6169_v18 = vand.u32 4294901760, %v6168_v27 }
 0x13d   : > { %5751 = vmatpush1.msra.mxu0 %v5671_v59  ;;  %5669 = vmatprep.subr.mxu1 %v5668_v17  ;;  %v18619_v48 = vand.u32 4294901760, %v6129_v36  ;;  %v6634_v59 = vand.u32 4294901760, %v6633_v50 }
 0x13e   : > { %5902 = vmatprep.subr.mxu0 %v5666_v57  ;;  %5548 = vmatprep.mubr.f32.mxu1 %v18531_v37  ;;  %v6170_v43 = vsub.f32 %v6168_v27, %v6169_v18  ;;  %v7013_v57 = vsel %vm7011_vm8, %v7004_v46, %v18627_v49  ;;  %v7002_v58 = vpop.permute.xlu0 %7001 }
 0x13f   : > { %5784 = vmatprep.mubr.f32.mxu0 %v18531_v37  ;;  %5550 = vmatmul.mubr.f32.vlgmr.msra.gmra.mxu1 %v18492_v8  ;;  %19945 = vst [vmem:[#allocation36_spill] sm:$0xff] %v18619_v48  ;;  %v7012_v63 = vsel %vm7011_vm8, %v7002_v58, %v7004_v46  ;;  %v6635_v11 = vsub.f32 %v6633_v50, %v6634_v59 }
 0x140   : > { %5675 = vmatpush1.msra.mxu1 %v5674_v32  ;;  %5787 = vmatmul.mubr.f32.vlgmr.msra.gmra.mxu0 %v18505_v12  ;;  %v7019_v22 = vsel %vm259_vm2, %v7012_v63, 0  ;;  %v7008_v32 = vpop.permute.xlu1 %7007 }
 0x141   : > { %5906 = vmatpush1.msra.mxu0 %v5672_v3  ;;  %5824 = vmatprep.subr.mxu1 %v18534_v0  ;;  %v18646_v3 = vand.u32 4294901760, %v7017_v60  ;;  %v6636_v29 = vand.u32 4294901760, %v6635_v11 }
 0x142   : > { %5708 = vmatprep.mubr.f32.mxu1 %v18531_v37  ;;  %5939 = vmatprep.mubr.f32.mxu0 %v18531_v37 }
 0x143   : > { %6090 = vmatprep.subr.mxu0 %v18577_v6  ;;  %5710 = vmatmul.mubr.f32.vlgmr.msra.gmra.mxu1 %v18492_v8  ;;  %19946 = vst [vmem:[#allocation37_spill] sm:$0xff] %v18646_v3  ;;  %v18659_v24 = vsub.f32 %v7017_v60, %v18646_v3 }
 0x144   : > { %5826 = vmatpush1.msra.mxu1 %v18548_v47  ;;  %5941 = vmatmul.mubr.f32.vlgmr.msra.gmra.mxu0 %v18492_v8 }
 0x145   : > { %6092 = vmatpush1.msra.mxu0 %v18587_v21  ;;  %5978 = vmatprep.subr.mxu1 %v18534_v0  ;;  %v6171_v0 = vand.u32 4294901760, %v6170_v43  ;;  %19947 = vst [vmem:[#allocation38_spill] sm:$0xff] %v18659_v24  ;;  %v7014_v43 = vsel %vm7011_vm8, %v18627_v49, %v7008_v32 }
 0x146   : > { %6251 = vmatprep.subr.mxu0 %v6168_v27  ;;  %5859 = vmatprep.mubr.f32.mxu1 %v18531_v37  ;;  %v7010_v27 = vpop.permute.xlu0 %7009  ;;  %v7023_v55 = vsel %vm259_vm2, %v7014_v43, 0 }
 0x147   : > { %6125 = vmatprep.mubr.f32.mxu0 %v18531_v37  ;;  %5863 = vmatmul.mubr.f32.vlgmr.msra.gmra.mxu1 %v18519_v2  ;;  %v7015_v4 = vsel %vm7011_vm8, %v7008_v32, %v7010_v27 }
 0x148   : > { %5980 = vmatpush1.msra.mxu1 %v18548_v47  ;;  %6131 = vmatmul.mubr.f32.vlgmr.msra.gmra.mxu0 %v18619_v48  ;;  %v7021_v47 = vsel %vm259_vm2, %v7013_v57, 0  ;;  %v7025_v41 = vsel %vm259_vm2, %v7015_v4, 0 }
 0x149   : > { %6254 = vmatpush1.msra.mxu0 %v6174_v30  ;;  %6172 = vmatprep.subr.mxu1 %v6171_v0  ;;  %v18653_v17 = vand.u32 4294901760, %v7021_v47  ;;  %v18663_v30 = vand.u32 4294901760, %v7019_v22  ;;  %v7972_v0 = vpop.permute.xlu1 %7971 }
 0x14a   : > { %6405 = vmatprep.subr.mxu0 %v6169_v18  ;;  %6013 = vmatprep.mubr.f32.mxu1 %v18531_v37 }
 0x14b   : > { %6287 = vmatprep.mubr.f32.mxu0 %v18531_v37  ;;  %6015 = vmatmul.mubr.f32.vlgmr.msra.gmra.mxu1 %v18492_v8  ;;  %v7136_v18 = vsub.f32 %v7021_v47, %v18653_v17  ;;  %v7142_v36 = vsub.f32 %v7019_v22, %v18663_v30 }
 0x14c   : > { %6178 = vmatpush1.msra.mxu1 %v6177_v61  ;;  %6290 = vmatmul.mubr.f32.vlgmr.msra.gmra.mxu0 %v18583_v15  ;;  %v222_v61 = vld [vmem:[%s19829_s1 + $0x20] sm:$0xf] }
 0x14d   : > { %6409 = vmatpush1.msra.mxu0 %v6175_v40  ;;  %6327 = vmatprep.subr.mxu1 %v18577_v6  ;;  %v6642_v40 = vand.u32 4294901760, %v6641_v33  ;;  %v7143_v53 = vand.u32 4294901760, %v7142_v36  ;;  %v7970_v63 = vpop.permute.xlu1 %7969 }
 0x14e   : > { %6211 = vmatprep.mubr.f32.mxu1 %v18531_v37  ;;  %6442 = vmatprep.mubr.f32.mxu0 %v18531_v37 }
 0x14f   : > { %6555 = vmatprep.subr.mxu0 %v18610_v38  ;;  %6213 = vmatmul.mubr.f32.vlgmr.msra.gmra.mxu1 %v18570_v62  ;;  %v7144_v60 = vsub.f32 %v7142_v36, %v7143_v53 }
 0x150   : > { %6329 = vmatpush1.msra.mxu1 %v18587_v21  ;;  %6444 = vmatmul.mubr.f32.vlgmr.msra.gmra.mxu0 %v18570_v62 }
 0x151   : > { %6557 = vmatpush1.msra.mxu0 %v18624_v52  ;;  %6481 = vmatprep.subr.mxu1 %v18577_v6  ;;  %v18673_v6 = vand.u32 4294901760, %v18659_v24  ;;  %v7145_v27 = vand.u32 4294901760, %v7144_v60 }
 0x152   : > { %6716 = vmatprep.subr.mxu0 %v6633_v50  ;;  %6362 = vmatprep.mubr.f32.mxu1 %v18531_v37  ;;  %v18686_v50 = vand.u32 4294901760, %v7025_v41 }
 0x153   : > { %6590 = vmatprep.mubr.f32.mxu0 %v18531_v37  ;;  %6366 = vmatmul.mubr.f32.vlgmr.msra.gmra.mxu1 %v18597_v9  ;;  %19948 = vst [vmem:[#allocation39_spill] sm:$0xff] %v18673_v6  ;;  %v7097_v46 = vsub.f32 %v18659_v24, %v18673_v6 }
 0x154   : > { %6483 = vmatpush1.msra.mxu1 %v18587_v21  ;;  %6596 = vmatmul.mubr.f32.vlgmr.msra.gmra.mxu0 %v18619_v48  ;;  %v7137_v21 = vand.u32 4294901760, %v7136_v18  ;;  %v7601_v58 = vsub.f32 %v7025_v41, %v18686_v50  ;;  %v7978_v41 = vpop.permute.xlu1 %7977 }
 0x155   : > { %6719 = vmatpush1.msra.mxu0 %v6639_v13  ;;  %6637 = vmatprep.subr.mxu1 %v6636_v29  ;;  %v18695_v57 = vand.u32 4294901760, %v7097_v46  ;;  %v18703_v13 = vpop.permute.xlu0 %7973  ;;  %v7980_v29 = vsel %vm7979_vm9, %v7970_v63, %v7972_v0 }
 0x156   : > { %6870 = vmatprep.subr.mxu0 %v6634_v59  ;;  %6516 = vmatprep.mubr.f32.mxu1 %v18531_v37  ;;  %v7138_v49 = vsub.f32 %v7136_v18, %v7137_v21  ;;  %v18700_v59 = vand.u32 4294901760, %v7023_v55  ;;  %v7981_v47 = vsel %vm7979_vm9, %v7972_v0, %v18703_v13  ;;  %v7602_v11 = vand.u32 4294901760, %v7601_v58 }
 0x157   : > { %6752 = vmatprep.mubr.f32.mxu0 %v18531_v37  ;;  %6518 = vmatmul.mubr.f32.vlgmr.msra.gmra.mxu1 %v18570_v62  ;;  %19949 = vst [vmem:[#allocation40_spill] sm:$0xff] %v18695_v57 }
 0x158   : > { %6643 = vmatpush1.msra.mxu1 %v6642_v40  ;;  %6755 = vmatmul.mubr.f32.vlgmr.msra.gmra.mxu0 %v18583_v15  ;;  %v7607_v22 = vsub.f32 %v7023_v55, %v18700_v59  ;;  %v7603_v33 = vsub.f32 %v7601_v58, %v7602_v11 }
 0x159   : > { %6874 = vmatpush1.msra.mxu0 %v6640_v16  ;;  %6792 = vmatprep.subr.mxu1 %v18610_v38  ;;  %v7985_v16 = vsel %vm255_vm0, %v222_v61, 0  ;;  %v7976_v46 = vpop.permute.xlu0 %7975 }
 0x15a   : > { %6676 = vmatprep.mubr.f32.mxu1 %v18531_v37  ;;  %6907 = vmatprep.mubr.f32.mxu0 %v18531_v37  ;;  %v18722_v32 = vand.u32 4294901760, %v7985_v16  ;;  %v7982_v61 = vsel %vm7979_vm9, %v18703_v13, %v7976_v46 }
 0x15b   : > { %7058 = vmatprep.subr.mxu0 %v18653_v17  ;;  %6678 = vmatmul.mubr.f32.vlgmr.msra.gmra.mxu1 %v18570_v62 }
 0x15c   : > { %6794 = vmatpush1.msra.mxu1 %v18624_v52  ;;  %6909 = vmatmul.mubr.f32.vlgmr.msra.gmra.mxu0 %v18570_v62  ;;  %19950 = vst [vmem:[#allocation41_spill] sm:$0xff] %v18722_v32  ;;  %v18735_v40 = vsub.f32 %v7985_v16, %v18722_v32 }
 0x15d   : > { %7060 = vmatpush1.msra.mxu0 %v18663_v30  ;;  %6946 = vmatprep.subr.mxu1 %v18610_v38  ;;  %v7139_v38 = vand.u32 4294901760, %v7138_v49  ;;  %v7983_v49 = vsel %vm7979_vm9, %v7976_v46, %v7978_v41 }
 0x15e   : > { %7219 = vmatprep.subr.mxu0 %v7136_v18  ;;  %6827 = vmatprep.mubr.f32.mxu1 %v18531_v37  ;;  %v7608_v18 = vand.u32 4294901760, %v7607_v22  ;;  %19951 = vst [vmem:[#allocation42_spill] sm:$0xff] %v18735_v40  ;;  %v7993_v60 = vsel %vm259_vm2, %v7983_v49, 0 }
 0x15f   : > { %7093 = vmatprep.mubr.f32.mxu0 %v18531_v37  ;;  %6831 = vmatmul.mubr.f32.vlgmr.msra.gmra.mxu1 %v18597_v9 }
 0x160   : > { %6948 = vmatpush1.msra.mxu1 %v18624_v52  ;;  %7099 = vmatmul.mubr.f32.vlgmr.msra.gmra.mxu0 %v18695_v57  ;;  %v7989_v52 = vsel %vm259_vm2, %v7981_v47, 0  ;;  %v18762_v47 = vand.u32 4294901760, %v7993_v60 }
 0x161   : > { %7222 = vmatpush1.msra.mxu0 %v7142_v36  ;;  %7140 = vmatprep.subr.mxu1 %v7139_v38  ;;  %v18729_v4 = vand.u32 4294901760, %v7989_v52  ;;  %v7987_v36 = vsel %vm259_vm2, %v7980_v29, 0 }
 0x162   : > { %7373 = vmatprep.subr.mxu0 %v7137_v21  ;;  %6981 = vmatprep.mubr.f32.mxu1 %v18531_v37  ;;  %v7604_v21 = vand.u32 4294901760, %v7603_v33  ;;  %v18739_v43 = vand.u32 4294901760, %v7987_v36 }
 0x163   : > { %7255 = vmatprep.mubr.f32.mxu0 %v18531_v37  ;;  %6983 = vmatmul.mubr.f32.vlgmr.msra.gmra.mxu1 %v18570_v62  ;;  %v8104_v55 = vsub.f32 %v7989_v52, %v18729_v4 }
 0x164   : > { %7146 = vmatpush1.msra.mxu1 %v7145_v27  ;;  %7258 = vmatmul.mubr.f32.vlgmr.msra.gmra.mxu0 %v18659_v24  ;;  %v8110_v0 = vsub.f32 %v7987_v36, %v18739_v43 }
 0x165   : > { %7377 = vmatpush1.msra.mxu0 %v7143_v53  ;;  %7295 = vmatprep.subr.mxu1 %v18653_v17  ;;  %v7609_v53 = vsub.f32 %v7607_v22, %v7608_v18 }
 0x166   : > { %7179 = vmatprep.mubr.f32.mxu1 %v18531_v37  ;;  %7410 = vmatprep.mubr.f32.mxu0 %v18531_v37  ;;  %v8111_v63 = vand.u32 4294901760, %v8110_v0 }
 0x167   : > { %7523 = vmatprep.subr.mxu0 %v18686_v50  ;;  %7181 = vmatmul.mubr.f32.vlgmr.msra.gmra.mxu1 %v18646_v3 }
 0x168   : > { %7297 = vmatpush1.msra.mxu1 %v18663_v30  ;;  %7412 = vmatmul.mubr.f32.vlgmr.msra.gmra.mxu0 %v18646_v3  ;;  %v8112_v52 = vsub.f32 %v8110_v0, %v8111_v63 }
 0x169   : > { %7525 = vmatpush1.msra.mxu0 %v18700_v59  ;;  %7449 = vmatprep.subr.mxu1 %v18653_v17  ;;  %v18749_v17 = vand.u32 4294901760, %v18735_v40 }
 0x16a   : > { %7684 = vmatprep.subr.mxu0 %v7601_v58  ;;  %7330 = vmatprep.mubr.f32.mxu1 %v18531_v37  ;;  %v7610_v58 = vand.u32 4294901760, %v7609_v53  ;;  %v8113_v41 = vand.u32 4294901760, %v8112_v52 }
 0x16b   : > { %7558 = vmatprep.mubr.f32.mxu0 %v18531_v37  ;;  %7334 = vmatmul.mubr.f32.vlgmr.msra.gmra.mxu1 %v18673_v6  ;;  %19952 = vst [vmem:[#allocation43_spill] sm:$0xff] %v18749_v17  ;;  %v8065_v38 = vsub.f32 %v18735_v40, %v18749_v17 }
 0x16c   : > { %7451 = vmatpush1.msra.mxu1 %v18663_v30  ;;  %7564 = vmatmul.mubr.f32.vlgmr.msra.gmra.mxu0 %v18695_v57  ;;  %v8105_v30 = vand.u32 4294901760, %v8104_v55 }
 0x16d   : > { %7687 = vmatpush1.msra.mxu0 %v7607_v22  ;;  %7605 = vmatprep.subr.mxu1 %v7604_v21  ;;  %v18771_v16 = vand.u32 4294901760, %v8065_v38  ;;  %v8569_v22 = vsub.f32 %v7993_v60, %v18762_v47 }
 0x16e   : > { %7838 = vmatprep.subr.mxu0 %v7602_v11  ;;  %7484 = vmatprep.mubr.f32.mxu1 %v18531_v37  ;;  %v7991_v11 = vsel %vm259_vm2, %v7982_v61, 0  ;;  %v8106_v13 = vsub.f32 %v8104_v55, %v8105_v30 }
 0x16f   : > { %7720 = vmatprep.mubr.f32.mxu0 %v18531_v37  ;;  %7486 = vmatmul.mubr.f32.vlgmr.msra.gmra.mxu1 %v18646_v3  ;;  %19953 = vst [vmem:[#allocation44_spill] sm:$0xff] %v18771_v16  ;;  %v18776_v27 = vand.u32 4294901760, %v7991_v11 }
 0x170   : > { %7611 = vmatpush1.msra.mxu1 %v7610_v58  ;;  %7723 = vmatmul.mubr.f32.vlgmr.msra.gmra.mxu0 %v18659_v24  ;;  %v8107_v29 = vand.u32 4294901760, %v8106_v13 }
 0x171   : > { %7842 = vmatpush1.msra.mxu0 %v7608_v18  ;;  %7760 = vmatprep.subr.mxu1 %v18686_v50  ;;  %v8570_v18 = vand.u32 4294901760, %v8569_v22  ;;  %v8575_v36 = vsub.f32 %v7991_v11, %v18776_v27 }
 0x172   : > { %7644 = vmatprep.mubr.f32.mxu1 %v18531_v37  ;;  %7875 = vmatprep.mubr.f32.mxu0 %v18531_v37 }
 0x173   : > { %8026 = vmatprep.subr.mxu0 %v18729_v4  ;;  %7646 = vmatmul.mubr.f32.vlgmr.msra.gmra.mxu1 %v18646_v3  ;;  %v8571_v46 = vsub.f32 %v8569_v22, %v8570_v18  ;;  %v8576_v53 = vand.u32 4294901760, %v8575_v36 }
 0x174   : > { %7762 = vmatpush1.msra.mxu1 %v18700_v59  ;;  %7877 = vmatmul.mubr.f32.vlgmr.msra.gmra.mxu0 %v18646_v3 }
 0x175   : > { %8028 = vmatpush1.msra.mxu0 %v18739_v43  ;;  %7914 = vmatprep.subr.mxu1 %v18686_v50  ;;  %v8572_v60 = vand.u32 4294901760, %v8571_v46  ;;  %v8577_v38 = vsub.f32 %v8575_v36, %v8576_v53 }
 0x176   : > { %8187 = vmatprep.subr.mxu0 %v8104_v55  ;;  %7795 = vmatprep.mubr.f32.mxu1 %v18531_v37 }
 0x177   : > { %8061 = vmatprep.mubr.f32.mxu0 %v18531_v37  ;;  %7799 = vmatmul.mubr.f32.vlgmr.msra.gmra.mxu1 %v18673_v6  ;;  %v341_v33 = vpop.f32.mrf.mxu0  ;;  %v8578_v52 = vand.u32 4294901760, %v8577_v38 }
 0x178   : > { %7916 = vmatpush1.msra.mxu1 %v18700_v59  ;;  %8067 = vmatmul.mubr.f32.vlgmr.msra.gmra.mxu0 %v18771_v16 }
 0x179   : > { %8190 = vmatpush1.msra.mxu0 %v8110_v0  ;;  %8108 = vmatprep.subr.mxu1 %v8107_v29  ;;  %v18783_v50 = vpop.f32.mrf.mxu0 }
 0x17a   : > { %8341 = vmatprep.subr.mxu0 %v8105_v30  ;;  %7949 = vmatprep.mubr.f32.mxu1 %v18531_v37 }
 0x17b   : > { %8223 = vmatprep.mubr.f32.mxu0 %v18531_v37  ;;  %7951 = vmatmul.mubr.f32.vlgmr.msra.gmra.mxu1 %v18646_v3  ;;  %v500_v21 = vpop.f32.mrf.mxu0 }
 0x17c   : > { %8114 = vmatpush1.msra.mxu1 %v8113_v41  ;;  %8226 = vmatmul.mubr.f32.vlgmr.msra.gmra.mxu0 %v18735_v40 }
 0x17d   : > { %8345 = vmatpush1.msra.mxu0 %v8111_v63  ;;  %8263 = vmatprep.subr.mxu1 %v18729_v4  ;;  %v18791_v59 = vpop.f32.mrf.mxu0 }
 0x17e   : > { %8147 = vmatprep.mubr.f32.mxu1 %v18531_v37  ;;  %8378 = vmatprep.mubr.f32.mxu0 %v18531_v37 }
 0x17f   : > { %8491 = vmatprep.subr.mxu0 %v18762_v47  ;;  %v423_v55 = vpop.f32.mrf.mxu1  ;;  %8149 = vmatmul.mubr.f32.vlgmr.msra.gmra.mxu1 %v18722_v32 }
 0x180   : > { %v424_v49 = vadd.f32 %v423_v55, %v341_v33  ;;  %8265 = vmatpush1.msra.mxu1 %v18739_v43  ;;  %8380 = vmatmul.mubr.f32.vlgmr.msra.gmra.mxu0 %v18722_v32  ;;  %v654_v0 = vpop.f32.mrf.mxu0 }
 0x181   : > { %8493 = vmatpush1.msra.mxu0 %v18776_v27  ;;  %8417 = vmatprep.subr.mxu1 %v18729_v4  ;;  %v18801_v58 = vpop.f32.mrf.mxu1 }
 0x182   : > { %v501_v30 = vadd.f32 %v500_v21, %v424_v49  ;;  %8652 = vmatprep.subr.mxu0 %v8569_v22  ;;  %8298 = vmatprep.mubr.f32.mxu1 %v18531_v37  ;;  %v18804_v61 = vpop.f32.mrf.mxu0 }
 0x183   : > { %8526 = vmatprep.mubr.f32.mxu0 %v18531_v37  ;;  %v576_v63 = vpop.f32.mrf.mxu1  ;;  %8302 = vmatmul.mubr.f32.vlgmr.msra.gmra.mxu1 %v18749_v17 }
 0x184   : > { %v577_v11 = vadd.f32 %v576_v63, %v501_v30  ;;  %8419 = vmatpush1.msra.mxu1 %v18739_v43  ;;  %8532 = vmatmul.mubr.f32.vlgmr.msra.gmra.mxu0 %v18771_v16  ;;  %v806_v4 = vpop.f32.mrf.mxu0 }
 0x185   : > { %8655 = vmatpush1.msra.mxu0 %v8575_v36  ;;  %v18810_v13 = vpop.f32.mrf.mxu1  ;;  %8573 = vmatprep.subr.mxu1 %v8572_v60 }
 0x186   : > { %v655_v22 = vadd.f32 %v654_v0, %v577_v11  ;;  %8806 = vmatprep.subr.mxu0 %v8570_v18  ;;  %8452 = vmatprep.mubr.f32.mxu1 %v18531_v37  ;;  %v18813_v29 = vpop.f32.mrf.mxu0 }
 0x187   : > { %8688 = vmatprep.mubr.f32.mxu0 %v18531_v37  ;;  %v728_v33 = vpop.f32.mrf.mxu1  ;;  %8454 = vmatmul.mubr.f32.vlgmr.msra.gmra.mxu1 %v18722_v32 }
 0x188   : > { %v729_v43 = vadd.f32 %v728_v33, %v655_v22  ;;  %8579 = vmatpush1.msra.mxu1 %v8578_v52  ;;  %8691 = vmatmul.mubr.f32.vlgmr.msra.gmra.mxu0 %v18735_v40  ;;  %v965_v36 = vpop.f32.mrf.mxu0 }
 0x189   : > { %8810 = vmatpush1.msra.mxu0 %v8576_v53  ;;  %8728 = vmatprep.subr.mxu1 %v18762_v47  ;;  %v18819_v41 = vpop.f32.mrf.mxu1 }
 0x18a   : > { %8612 = vmatprep.mubr.f32.mxu1 %v18531_v37  ;;  %v18822_v18 = vpop.f32.mrf.mxu0  ;;  %8843 = vmatprep.mubr.f32.mxu0 %v18531_v37 }
 0x18b   : > { %v888_v21 = vpop.f32.mrf.mxu1  ;;  %8614 = vmatmul.mubr.f32.vlgmr.msra.gmra.mxu1 %v18722_v32 }
 0x18c   : > { %v889_v46 = vadd.f32 %v888_v21, %v806_v4  ;;  %8730 = vmatpush1.msra.mxu1 %v18776_v27  ;;  %8763 = vmatprep.mubr.f32.mxu1 %v18531_v37  ;;  %v1119_v55 = vpop.f32.mrf.mxu0 }
 0x18d   : > { %8882 = vmatprep.subr.mxu1 %v18762_v47  ;;  %v18829_v53 = vpop.f32.mrf.mxu1  ;;  %8845 = vmatmul.mubr.f32.vlgmr.msra.gmra.mxu0 %v18722_v32 }
 0x18e   : > { %v966_v49 = vadd.f32 %v965_v36, %v889_v46  ;;  %v18832_v0 = vpop.f32.mrf.mxu0  ;;  %9064 = vmatprep.mubr.f32.mxu0 %v18531_v37 }
 0x18f   : > { %v1041_v60 = vpop.f32.mrf.mxu1  ;;  %8767 = vmatmul.mubr.f32.vlgmr.msra.gmra.mxu1 %v18749_v17 }
 0x190   : > { %v1042_v30 = vadd.f32 %v1041_v60, %v966_v49  ;;  %8884 = vmatpush1.msra.mxu1 %v18776_v27  ;;  %8917 = vmatprep.mubr.f32.mxu1 %v18531_v37  ;;  %v1309_v38 = vpop.f32.mrf.mxu0 }
 0x191   : > { %v18838_v63 = vpop.f32.mrf.mxu1 }
 0x192   : > { %v1120_v47 = vadd.f32 %v1119_v55, %v1042_v30  ;;  %v18840_v11 = vpop.f32.mrf.mxu0 }
 0x193   : > { %v1193_v4 = vpop.f32.mrf.mxu1  ;;  %8919 = vmatmul.mubr.f32.vlgmr.msra.gmra.mxu1 %v18722_v32  ;;  %v18852_v32 = vpop.permute.xlu0 %226 }
 0x194   : > { %v1194_v22 = vadd.f32 %v1193_v4, %v1120_v47  ;;  %v1468_v52 = vpop.f32.mrf.mxu0  ;;  %9150 = vmatprep.mubr.f32.mxu1 %v18531_v37  ;;  %19954 = vst [vmem:[#allocation45_spill] sm:$0xff] %v18852_v32  ;;  %v1198_v3 = vadd.f32 %v729_v43, %v18852_v32 }
 0x195   : > { %v18844_v33 = vpop.f32.mrf.mxu1 }
 0x196   : > { %v18846_v36 = vpop.f32.mrf.mxu0 }
 0x197   : > { %v1391_v27 = vpop.f32.mrf.mxu1 }
 0x198   : > { %v1392_v21 = vadd.f32 %v1391_v27, %v1309_v38  ;;  %v1622_v46 = vpop.f32.mrf.mxu0 }
 0x199   : > { %v18848_v49 = vpop.f32.mrf.mxu1 }
 0x19a   : > { %v1469_v60 = vadd.f32 %v1468_v52, %v1392_v21  ;;  %v18850_v55 = vpop.f32.mrf.mxu0 }
 0x19b   : > { %v1544_v30 = vpop.f32.mrf.mxu1 }
 0x19c   : > { %v1545_v17 = vadd.f32 %v1544_v30, %v1469_v60  ;;  %v1774_v40 = vpop.f32.mrf.mxu0 }
 0x19d   : > { %v18854_v47 = vpop.f32.mrf.mxu1 }
 0x19e   : > { %v1623_v4 = vadd.f32 %v1622_v46, %v1545_v17  ;;  %v18856_v16 = vpop.f32.mrf.mxu0 }
 0x19f   : > { %v1696_v6 = vpop.f32.mrf.mxu1 }
 0x1a0   : > { %v1697_v38 = vadd.f32 %v1696_v6, %v1623_v4  ;;  %v1933_v27 = vpop.f32.mrf.mxu0 }
 0x1a1   : > { %v18859_v24 = vpop.f32.mrf.mxu1 }
 0x1a2   : > { %v2166_v52 = vadd.f32 %v1697_v38, %v1198_v3  ;;  %v18861_v21 = vpop.f32.mrf.mxu0  ;;  %v1200_v3 = vadd.f32 %v1194_v22, %v18852_v32 }
 0x1a3   : > { %v1856_v57 = vpop.f32.mrf.mxu1 }
 0x1a4   : > { %v1857_v60 = vadd.f32 %v1856_v57, %v1774_v40  ;;  %v2087_v30 = vpop.f32.mrf.mxu0 }
 0x1a5   : > { %v18863_v9 = vpop.f32.mrf.mxu1 }
 0x1a6   : > { %v1934_v62 = vadd.f32 %v1933_v27, %v1857_v60  ;;  %v18865_v15 = vpop.f32.mrf.mxu0 }
 0x1a7   : > { %v2009_v17 = vpop.f32.mrf.mxu1 }
 0x1a8   : > { %v2010_v46 = vadd.f32 %v2009_v17, %v1934_v62  ;;  %v2277_v48 = vpop.f32.mrf.mxu0 }
 0x1a9   : > { %v18867_v2 = vpop.f32.mrf.mxu1 }
 0x1aa   : > { %v2088_v6 = vadd.f32 %v2087_v30, %v2010_v46  ;;  %v18869_v43 = vpop.f32.mrf.mxu0 }
 0x1ab   : > { %v2161_v4 = vpop.f32.mrf.mxu1 }
 0x1ac   : > { %v2162_v38 = vadd.f32 %v2161_v4, %v2088_v6  ;;  %v2436_v8 = vpop.f32.mrf.mxu0 }
 0x1ad   : > { %v18872_v57 = vpop.f32.mrf.mxu1 }
 0x1ae   : > { %19955 = vst [vmem:[#allocation46_spill] sm:$0xff] %v18872_v57  ;;  %v2168_v40 = vadd.f32 %v2162_v38, %v1200_v3  ;;  %v18874_v12 = vpop.f32.mrf.mxu0 }
 0x1af   : > { %v2359_v27 = vpop.f32.mrf.mxu1 }
 0x1b0   : > { %v2360_v60 = vadd.f32 %v2359_v27, %v2277_v48  ;;  %v2590_v44 = vpop.f32.mrf.mxu0 }
 0x1b1   : > { %v18876_v62 = vpop.f32.mrf.mxu1 }
 0x1b2   : > { %v2437_v17 = vadd.f32 %v2436_v8, %v2360_v60  ;;  %v18878_v34 = vpop.f32.mrf.mxu0 }
 0x1b3   : > { %v2512_v30 = vpop.f32.mrf.mxu1 }
 0x1b4   : > { %v2513_v46 = vadd.f32 %v2512_v30, %v2437_v17  ;;  %v2742_v23 = vpop.f32.mrf.mxu0 }
 0x1b5   : > { %v18880_v31 = vpop.f32.mrf.mxu1 }
 0x1b6   : > { %v2591_v22 = vadd.f32 %v2590_v44, %v2513_v46  ;;  %v18882_v6 = vpop.f32.mrf.mxu0 }
 0x1b7   : > { %v2664_v4 = vpop.f32.mrf.mxu1 }
 0x1b8   : > { %v2665_v3 = vadd.f32 %v2664_v4, %v2591_v22  ;;  %v2901_v38 = vpop.f32.mrf.mxu0 }
 0x1b9   : > { %v18884_v14 = vpop.f32.mrf.mxu1 }
 0x1ba   : > { %19956 = vst [vmem:[#allocation47_spill] sm:$0xff] %v18884_v14  ;;  %v3134_v48 = vadd.f32 %v2665_v3, %v2166_v52  ;;  %v18886_v27 = vpop.f32.mrf.mxu0 }
 0x1bb   : > { %v2824_v54 = vpop.f32.mrf.mxu1 }
 0x1bc   : > { %v2825_v8 = vadd.f32 %v2824_v54, %v2742_v23  ;;  %v3055_v60 = vpop.f32.mrf.mxu0 }
 0x1bd   : > { %v18888_v39 = vpop.f32.mrf.mxu1 }
 0x1be   : > { %v2902_v17 = vadd.f32 %v2901_v38, %v2825_v8  ;;  %v18890_v30 = vpop.f32.mrf.mxu0 }
 0x1bf   : > { %19957 = vst [vmem:[#allocation48_spill] sm:$0xff] %v18890_v30  ;;  %v2977_v45 = vpop.f32.mrf.mxu1 }
 0x1c0   : > { %v2978_v44 = vadd.f32 %v2977_v45, %v2902_v17  ;;  %v3245_v46 = vpop.f32.mrf.mxu0 }
 0x1c1   : > { %v18892_v7 = vpop.f32.mrf.mxu1 }
 0x1c2   : > { %v3056_v22 = vadd.f32 %v3055_v60, %v2978_v44  ;;  %v18894_v4 = vpop.f32.mrf.mxu0 }
 0x1c3   : > { %v3129_v1 = vpop.f32.mrf.mxu1 }
 0x1c4   : > { %v3130_v52 = vadd.f32 %v3129_v1, %v3056_v22  ;;  %v3404_v3 = vpop.f32.mrf.mxu0 }
 0x1c5   : > { %v18896_v51 = vpop.f32.mrf.mxu1 }
 0x1c6   : > { %19958 = vst [vmem:[#allocation49_spill] sm:$0xff] %v18896_v51  ;;  %v3136_v54 = vadd.f32 %v3130_v52, %v2168_v40  ;;  %v18898_v23 = vpop.f32.mrf.mxu0 }
 0x1c7   : > { %v3327_v56 = vpop.f32.mrf.mxu1 }
 0x1c8   : > { %v3328_v38 = vadd.f32 %v3327_v56, %v3245_v46  ;;  %v3558_v8 = vpop.f32.mrf.mxu0  ;;  %v18910_v56 = vcombine.high %v18531_v37, %v18531_v37 }
 0x1c9   : > { %v18900_v19 = vpop.f32.mrf.mxu1 }
 0x1ca   : > { %v3405_v45 = vadd.f32 %v3404_v3, %v3328_v38  ;;  %v18902_v17 = vpop.f32.mrf.mxu0  ;;  %19960 = vst [vmem:[#allocation51_spill] sm:$0xff] %v18910_v56  ;;  %8978 = vrot.lane.b32.xlu1 %v18910_v56, %s17922_s8 }
 0x1cb   : > { %19959 = vst [vmem:[#allocation50_spill] sm:$0xff] %v18902_v17  ;;  %v3480_v20 = vpop.f32.mrf.mxu1 }
 0x1cc   : > { %v3481_v60 = vadd.f32 %v3480_v20, %v3405_v45  ;;  %v3710_v44 = vpop.f32.mrf.mxu0 }
 0x1cd   : > { %v18904_v5 = vpop.f32.mrf.mxu1 }
 0x1ce   : > { %v3559_v1 = vadd.f32 %v3558_v8, %v3481_v60  ;;  %v18906_v22 = vpop.f32.mrf.mxu0 }
 0x1cf   : > { %v3632_v10 = vpop.f32.mrf.mxu1 }
 0x1d0   : > { %v3633_v40 = vadd.f32 %v3632_v10, %v3559_v1  ;;  %v3869_v52 = vpop.f32.mrf.mxu0 }
 0x1d1   : > { %v18912_v46 = vpop.f32.mrf.mxu1 }
 0x1d2   : > { %19961 = vst [vmem:[#allocation52_spill] sm:$0xff] %v18912_v46  ;;  %v4102_v3 = vadd.f32 %v3633_v40, %v3134_v48  ;;  %v18914_v38 = vpop.f32.mrf.mxu0 }
 0x1d3   : > { %19962 = vst [vmem:[#allocation53_spill] sm:$0xff] %v18914_v38  ;;  %v3792_v20 = vpop.f32.mrf.mxu1 }
 0x1d4   : > { %v3793_v45 = vadd.f32 %v3792_v20, %v3710_v44  ;;  %v4023_v8 = vpop.f32.mrf.mxu0 }
 0x1d5   : > { %v18918_v60 = vpop.f32.mrf.mxu1 }
 0x1d6   : > { %v3870_v35 = vadd.f32 %v3869_v52, %v3793_v45  ;;  %v18920_v10 = vpop.f32.mrf.mxu0 }
 0x1d7   : > { %19963 = vst [vmem:[#allocation54_spill] sm:$0xff] %v18920_v10  ;;  %v3945_v1 = vpop.f32.mrf.mxu1 }
 0x1d8   : > { %v3946_v28 = vadd.f32 %v3945_v1, %v3870_v35  ;;  %v4196_v37 = vpop.f32.mrf.mxu0 }
 0x1d9   : > { %v18922_v25 = vpop.f32.mrf.mxu1 }
 0x1da   : > { %19964 = vst [vmem:[#allocation55_spill] sm:$0xff] %v18922_v25  ;;  %v4024_v26 = vadd.f32 %v4023_v8, %v3946_v28  ;;  %v18924_v48 = vpop.f32.mrf.mxu0 }
 0x1db   : > { %v4097_v40 = vpop.f32.mrf.mxu1 }
 0x1dc   : > { %v4098_v42 = vadd.f32 %v4097_v40, %v4024_v26  ;;  %v4355_v51 = vpop.f32.mrf.mxu0 }
 0x1dd   : > { %v18926_v56 = vpop.f32.mrf.mxu1 }
 0x1de   : > { %19965 = vst [vmem:[#allocation56_spill] sm:$0xff] %v18926_v56  ;;  %v4104_v44 = vadd.f32 %v4098_v42, %v3136_v54  ;;  %v18928_v20 = vpop.f32.mrf.mxu0 }
 0x1df   : > { %v4278_v46 = vpop.f32.mrf.mxu1 }
 0x1e0   : > { %v4279_v52 = vadd.f32 %v4278_v46, %v4196_v37  ;;  %v4509_v45 = vpop.f32.mrf.mxu0 }
 0x1e1   : > { %v18930_v10 = vpop.f32.mrf.mxu1 }
 0x1e2   : > { %v4356_v35 = vadd.f32 %v4355_v51, %v4279_v52  ;;  %v18932_v1 = vpop.f32.mrf.mxu0 }
 0x1e3   : > { %19966 = vst [vmem:[#allocation57_spill] sm:$0xff] %v18932_v1  ;;  %v4431_v25 = vpop.f32.mrf.mxu1 }
 0x1e4   : > { %v4432_v28 = vadd.f32 %v4431_v25, %v4356_v35  ;;  %v4661_v8 = vpop.f32.mrf.mxu0 }
 0x1e5   : > { %v18934_v30 = vpop.f32.mrf.mxu1 }
 0x1e6   : > { %19967 = vst [vmem:[#allocation58_spill] sm:$0xff] %v18934_v30  ;;  %v4510_v26 = vadd.f32 %v4509_v45, %v4432_v28  ;;  %v18936_v40 = vpop.f32.mrf.mxu0 }
 0x1e7   : > { %19968 = vst [vmem:[#allocation59_spill] sm:$0xff] %v18936_v40  ;;  %v4583_v56 = vpop.f32.mrf.mxu1 }
 0x1e8   : > { %v4584_v42 = vadd.f32 %v4583_v56, %v4510_v26  ;;  %v4820_v54 = vpop.f32.mrf.mxu0 }
 0x1e9   : > { %v18938_v38 = vpop.f32.mrf.mxu1 }
 0x1ea   : > { %19969 = vst [vmem:[#allocation60_spill] sm:$0xff] %v18938_v38  ;;  %v5053_v46 = vadd.f32 %v4584_v42, %v4102_v3  ;;  %v18940_v37 = vpop.f32.mrf.mxu0 }
 0x1eb   : > { %19970 = vst [vmem:[#allocation61_spill] sm:$0xff] %v18940_v37  ;;  %v4743_v14 = vpop.f32.mrf.mxu1 }
 0x1ec   : > { %v4744_v51 = vadd.f32 %v4743_v14, %v4661_v8  ;;  %v4974_v52 = vpop.f32.mrf.mxu0 }
 0x1ed   : > { %v18942_v1 = vpop.f32.mrf.mxu1 }
 0x1ee   : > { %19971 = vst [vmem:[#allocation62_spill] sm:$0xff] %v18942_v1  ;;  %v4821_v25 = vadd.f32 %v4820_v54, %v4744_v51  ;;  %v18944_v35 = vpop.f32.mrf.mxu0 }
 0x1ef   : > { %19972 = vst [vmem:[#allocation63_spill] sm:$0xff] %v18944_v35  ;;  %v4896_v30 = vpop.f32.mrf.mxu1 }
 0x1f0   : > { %v4897_v45 = vadd.f32 %v4896_v30, %v4821_v25  ;;  %v5164_v28 = vpop.f32.mrf.mxu0 }
 0x1f1   : > { %v18946_v40 = vpop.f32.mrf.mxu1 }
 0x1f2   : > { %19973 = vst [vmem:[#allocation64_spill] sm:$0xff] %v18946_v40  ;;  %v4975_v56 = vadd.f32 %v4974_v52, %v4897_v45  ;;  %v18948_v26 = vpop.f32.mrf.mxu0 }
 0x1f3   : > { %v5048_v38 = vpop.f32.mrf.mxu1 }
 0x1f4   : > { %v5049_v3 = vadd.f32 %v5048_v38, %v4975_v56  ;;  %v5323_v42 = vpop.f32.mrf.mxu0 }
 0x1f5   : > { %v18950_v37 = vpop.f32.mrf.mxu1 }
 0x1f6   : > { %19974 = vst [vmem:[#allocation65_spill] sm:$0xff] %v18950_v37  ;;  %v5055_v14 = vadd.f32 %v5049_v3, %v4104_v44  ;;  %v18952_v8 = vpop.f32.mrf.mxu0 }
 0x1f7   : > { %v5246_v1 = vpop.f32.mrf.mxu1 }
 0x1f8   : > { %v5247_v54 = vadd.f32 %v5246_v1, %v5164_v28  ;;  %v5477_v51 = vpop.f32.mrf.mxu0 }
 0x1f9   : > { %v18954_v35 = vpop.f32.mrf.mxu1 }
 0x1fa   : > { %v5324_v30 = vadd.f32 %v5323_v42, %v5247_v54  ;;  %v18956_v25 = vpop.f32.mrf.mxu0 }
 0x1fb   : > { %19975 = vst [vmem:[#allocation66_spill] sm:$0xff] %v18956_v25  ;;  %v5399_v40 = vpop.f32.mrf.mxu1 }
 0x1fc   : > { %v5400_v52 = vadd.f32 %v5399_v40, %v5324_v30  ;;  %v5629_v45 = vpop.f32.mrf.mxu0 }
 0x1fd   : > { %v18958_v57 = vpop.f32.mrf.mxu1 }
 0x1fe   : > { %v5478_v38 = vadd.f32 %v5477_v51, %v5400_v52  ;;  %v18960_v56 = vpop.f32.mrf.mxu0 }
 0x1ff   : > { %19976 = vst [vmem:[#allocation67_spill] sm:$0xff] %v18960_v56  ;;  %v5551_v37 = vpop.f32.mrf.mxu1 }
 0x200   : > { %v5552_v44 = vadd.f32 %v5551_v37, %v5478_v38  ;;  %v5788_v3 = vpop.f32.mrf.mxu0 }
 0x201   : > { %v18962_v32 = vpop.f32.mrf.mxu1 }
 0x202   : > { %19977 = vst [vmem:[#allocation68_spill] sm:$0xff] %v18962_v32  ;;  %v18964_v1 = vadd.f32 %v5552_v44, %v5053_v46  ;;  %v18966_v28 = vpop.f32.mrf.mxu0 }
 0x203   : > { %19979 = vst [vmem:[#allocation70_spill] sm:$0xff] %v18966_v28  ;;  %v5711_v42 = vpop.f32.mrf.mxu1 }
 0x204   : > { %19978 = vst [vmem:[#allocation69_spill] sm:$0xff] %v18964_v1  ;;  %v5712_v54 = vadd.f32 %v5711_v42, %v5629_v45  ;;  %v5942_v25 = vpop.f32.mrf.mxu0 }
 0x205   : > { %v18968_v17 = vpop.f32.mrf.mxu1 }
 0x206   : > { %19980 = vst [vmem:[#allocation71_spill] sm:$0xff] %v18968_v17  ;;  %v5789_v40 = vadd.f32 %v5788_v3, %v5712_v54  ;;  %v18970_v30 = vpop.f32.mrf.mxu0 }
 0x207   : > { %19981 = vst [vmem:[#allocation72_spill] sm:$0xff] %v18970_v30  ;;  %v5864_v51 = vpop.f32.mrf.mxu1 }
 0x208   : > { %v5865_v52 = vadd.f32 %v5864_v51, %v5789_v40  ;;  %v18972_v56 = vpop.f32.mrf.mxu0 }
 0x209   : > { %v18974_v37 = vpop.f32.mrf.mxu1 }
 0x20a   : > { %19982 = vst [vmem:[#allocation73_spill] sm:$0xff] %v18974_v37  ;;  %v5943_v38 = vadd.f32 %v5942_v25, %v5865_v52  ;;  %v18976_v32 = vpop.f32.mrf.mxu0 }
 0x20b   : > { %v6016_v46 = vpop.f32.mrf.mxu1 }
 0x20c   : > { %v6017_v44 = vadd.f32 %v6016_v46, %v5943_v38  ;;  %v18978_v1 = vpop.f32.mrf.mxu0 }
 0x20d   : > { %v18980_v45 = vpop.f32.mrf.mxu1 }
 0x20e   : > { %19983 = vst [vmem:[#allocation74_spill] sm:$0xff] %v18980_v45  ;;  %v18982_v42 = vadd.f32 %v6017_v44, %v5055_v14  ;;  %v18984_v3 = vpop.f32.mrf.mxu0 }
 0x20f   : > { %v6214_v54 = vpop.f32.mrf.mxu1 }
 0x210   : > { %19984 = vst [vmem:[#allocation75_spill] sm:$0xff] %v18982_v42  ;;  %v18986_v30 = vpop.f32.mrf.mxu0 }
 0x211   : > { %19985 = vst [vmem:[#allocation76_spill] sm:$0xff] %v18986_v30  ;;  %v18988_v40 = vpop.f32.mrf.mxu1 }
 0x212   : > { %v18990_v51 = vpop.f32.mrf.mxu0 }
 0x213   : > { %19986 = vst [vmem:[#allocation77_spill] sm:$0xff] %v18990_v51  ;;  %v18992_v25 = vpop.f32.mrf.mxu1 }
 0x214   : > { %v18994_v52 = vpop.f32.mrf.mxu0 }
 0x215   : > { %19987 = vst [vmem:[#allocation78_spill] sm:$0xff] %v18994_v52  ;;  %v18996_v38 = vpop.f32.mrf.mxu1 }
 0x216   : > { %v18998_v46 = vpop.f32.mrf.mxu0 }
 0x217   : > { %19988 = vst [vmem:[#allocation79_spill] sm:$0xff] %v18998_v46  ;;  %v19000_v45 = vpop.f32.mrf.mxu1 }
 0x218   : > { %19989 = vst [vmem:[#allocation80_spill] sm:$0xff] %v19000_v45  ;;  %v19002_v14 = vpop.f32.mrf.mxu0 }
 0x219   : > { %19990 = vst [vmem:[#allocation81_spill] sm:$0xff] %v19002_v14  ;;  %v19004_v44 = vpop.f32.mrf.mxu1  ;;  %v426_v14 = vadd.f32 %v18801_v58, %v18783_v50  ;;  %v2362_v58 = vadd.f32 %v18876_v62, %v18869_v43 }
 0x21a   : > { %19991 = vst [vmem:[#allocation82_spill] sm:$0xff] %v19004_v44  ;;  %v19006_v42 = vpop.f32.mrf.mxu0 }
 0x21b   : > { %19992 = vst [vmem:[#allocation83_spill] sm:$0xff] %v19006_v42  ;;  %v19008_v37 = vpop.f32.mrf.mxu1  ;;  %v2439_v43 = vadd.f32 %v18874_v12, %v2362_v58  ;;  %v4281_v12 = vadd.f32 %v18930_v10, %v18924_v48 }
 0x21c   : > { %19993 = vst [vmem:[#allocation84_spill] sm:$0xff] %v19008_v37  ;;  %v19010_v28 = vpop.f32.mrf.mxu0  ;;  %v1859_v37 = vadd.f32 %v18863_v9, %v18856_v16 }
 0x21d   : > { %19994 = vst [vmem:[#allocation85_spill] sm:$0xff] %v19010_v28  ;;  %v19012_v51 = vpop.f32.mrf.mxu1  ;;  %v891_v28 = vadd.f32 %v18829_v53, %v18813_v29 }
 0x21e   : > { %19995 = vst [vmem:[#allocation86_spill] sm:$0xff] %v19012_v51  ;;  %v19014_v30 = vpop.f32.mrf.mxu0  ;;  %v1394_v51 = vadd.f32 %v18848_v49, %v18840_v11  ;;  %v3330_v49 = vadd.f32 %v18900_v19, %v18894_v4  ;;  %v1936_v9 = vadd.f32 %v18861_v21, %v1859_v37  ;;  %v2827_v19 = vadd.f32 %v18888_v39, %v18882_v6 }
 0x21f   : > { %19996 = vst [vmem:[#allocation87_spill] sm:$0xff] %v19014_v30  ;;  %v19016_v52 = vpop.f32.mrf.mxu1  ;;  %v968_v29 = vadd.f32 %v18822_v18, %v891_v28  ;;  %v5249_v6 = vadd.f32 %v18954_v35, %v18948_v26  ;;  %v3795_v35 = vadd.f32 %v18918_v60, %v18906_v22  ;;  %v6217_v26 = vadd.f32 %v18988_v40, %v18976_v32 }
 0x220   : > { %19997 = vst [vmem:[#allocation88_spill] sm:$0xff] %v19016_v52  ;;  %v7100_v17 = vpop.f32.mrf.mxu0  ;;  %v1471_v53 = vadd.f32 %v18846_v36, %v1394_v51  ;;  %v3407_v4 = vadd.f32 %v18898_v23, %v3330_v49  ;;  %v2012_v37 = vadd.f32 %v18867_v2, %v1936_v9  ;;  %v2904_v2 = vadd.f32 %v18886_v27, %v2827_v19 }
 0x221   : > { %v19018_v46 = vpop.f32.mrf.mxu1  ;;  %v1044_v18 = vadd.f32 %v18838_v63, %v968_v29  ;;  %v2515_v63 = vadd.f32 %v18880_v31, %v2439_v43  ;;  %v20001_v29 = vld [vmem:[#allocation50_spill] sm:$0xff]  ;;  %v8934_v32 = vlaneseq }
 0x222   : > { %19998 = vst [vmem:[#allocation89_spill] sm:$0xff] %v19018_v46  ;;  %v7102_v45 = vpop.f32.mrf.mxu0  ;;  %v503_v46 = vadd.f32 %v18791_v59, %v426_v14  ;;  %v1547_v36 = vadd.f32 %v18854_v47, %v1471_v53  ;;  %v3483_v10 = vadd.f32 %v18904_v5, %v3407_v4  ;;  %v2090_v14 = vadd.f32 %v18865_v15, %v2012_v37  ;;  %v20007_v37 = vld [vmem:[#allocation48_spill] sm:$0xff] }
 0x223   : > { %v19022_v44 = vpop.f32.mrf.mxu1  ;;  %v2593_v58 = vadd.f32 %v18878_v34, %v2515_v63  ;;  %v5326_v15 = vadd.f32 %v18952_v8, %v5249_v6  ;;  %v2980_v34 = vadd.f32 %v18892_v7, %v2904_v2  ;;  %v20005_v8 = vld [vmem:[#allocation47_spill] sm:$0xff]  ;;  %v6294_v7 = vadd.f32 %v18984_v3, %v6217_v26  ;;  %v20008_v63 = vld [vmem:[#allocation52_spill] sm:$0xff] }
 0x224   : > { %19999 = vst [vmem:[#allocation90_spill] sm:$0xff] %v19022_v44  ;;  %v19024_v42 = vpop.f32.mrf.mxu0  ;;  %v579_v59 = vadd.f32 %v18810_v13, %v503_v46  ;;  %v1122_v46 = vadd.f32 %v18832_v0, %v1044_v18  ;;  %v1625_v39 = vadd.f32 %v18850_v55, %v1547_v36  ;;  %v4358_v0 = vadd.f32 %v18928_v20, %v4281_v12 }
 0x225   : > { %v19030_v30 = vpop.f32.mrf.mxu1  ;;  %v3561_v53 = vadd.f32 %v20001_v29, %v3483_v10  ;;  %v2667_v9 = vadd.f32 %v20005_v8, %v2593_v58  ;;  %v5402_v19 = vadd.f32 %v18958_v57, %v5326_v15  ;;  %v3058_v12 = vadd.f32 %v20007_v37, %v2980_v34  ;;  %v20010_v10 = vld [vmem:[#allocation59_spill] sm:$0xff]  ;;  %v20016_v34 = vld [vmem:[#allocation76_spill] sm:$0xff] }
 0x226   : > { %20000 = vst [vmem:[#allocation91_spill] sm:$0xff] %v19030_v30  ;;  %v19032_v52 = vpop.f32.mrf.mxu0  ;;  %v657_v21 = vadd.f32 %v18804_v61, %v579_v59  ;;  %v6215_v61 = vadd.f32 %v6214_v54, %v18972_v56  ;;  %v1196_v5 = vadd.f32 %v18844_v33, %v1122_v46  ;;  %v20004_v33 = vld [vmem:[#allocation58_spill] sm:$0xff]  ;;  %v19118_v3 = vshrl.u32 %v8934_v32, 7  ;;  %v20015_v15 = vld [vmem:[#allocation71_spill] sm:$0xff]  ;;  %v20020_v8 = vld [vmem:[#allocation60_spill] sm:$0xff] }
 0x227   : > { %v7182_v50 = vpop.f32.mrf.mxu1  ;;  %v4434_v59 = vadd.f32 %v20004_v33, %v4358_v0  ;;  %v3635_v46 = vadd.f32 %v20008_v63, %v3561_v53  ;;  %v20012_v0 = vld [vmem:[#allocation55_spill] sm:$0xff]  ;;  %v20017_v53 = vld [vmem:[#allocation78_spill] sm:$0xff]  ;;  %v20025_v63 = vld [vmem:[#allocation77_spill] sm:$0xff] }
 0x228   : > { %v19039_v44 = vpop.f32.mrf.mxu0  ;;  %v731_v31 = vadd.f32 %v18819_v41, %v657_v21  ;;  %v7183_v27 = vadd.f32 %v7182_v50, %v7100_v17  ;;  %v1699_v41 = vadd.f32 %v18859_v24, %v1625_v39  ;;  %v6292_v20 = vadd.f32 %v18978_v1, %v6215_v61  ;;  %v20002_v17 = vld [vmem:[#allocation45_spill] sm:$0xff]  ;;  %v20003_v50 = vld [vmem:[#allocation46_spill] sm:$0xff] }
 0x229   : > { %v7184_v11 = vpop.f32.mrf.mxu1  ;;  %v2164_v49 = vadd.f32 %v20003_v50, %v2090_v14  ;;  %v20006_v1 = vld [vmem:[#allocation53_spill] sm:$0xff] }
 0x22a   : > { %v19045_v30 = vpop.f32.mrf.mxu0  ;;  %v7185_v22 = vadd.f32 %v7184_v11, %v7102_v45  ;;  %v1199_v40 = vadd.f32 %v731_v31, %v20002_v17  ;;  %v3872_v43 = vadd.f32 %v20006_v1, %v3795_v35  ;;  %v7260_v18 = vadd.f32 %v19024_v42, %v7183_v27  ;;  %v20009_v61 = vld [vmem:[#allocation57_spill] sm:$0xff]  ;;  %v20011_v31 = vld [vmem:[#allocation62_spill] sm:$0xff] }
 0x22b   : > { %v19049_v16 = vpop.f32.mrf.mxu1  ;;  %v1201_v11 = vadd.f32 %v1196_v5, %v20002_v17  ;;  %v6368_v4 = vadd.f32 %v18992_v25, %v6292_v20  ;;  %v4512_v2 = vadd.f32 %v20009_v61, %v4434_v59  ;;  %v4746_v57 = vadd.f32 %v20011_v31, %v20010_v10  ;;  %v20013_v27 = vld [vmem:[#allocation66_spill] sm:$0xff]  ;;  %v20019_v50 = vld [vmem:[#allocation49_spill] sm:$0xff]  ;;  %v20026_v61 = vld [vmem:[#allocation68_spill] sm:$0xff] }
 0x22c   : > { %v19052_v62 = vpop.f32.mrf.mxu0  ;;  %v2167_v36 = vadd.f32 %v1699_v41, %v1199_v40  ;;  %v7262_v39 = vadd.f32 %v19032_v52, %v7185_v22  ;;  %v3948_v58 = vadd.f32 %v20012_v0, %v3872_v43  ;;  %v6370_v35 = vadd.f32 %v18996_v38, %v6294_v7  ;;  %v20014_v41 = vld [vmem:[#allocation67_spill] sm:$0xff]  ;;  %v20018_v22 = vld [vmem:[#allocation84_spill] sm:$0xff]  ;;  %v20021_v1 = vld [vmem:[#allocation61_spill] sm:$0xff] }
 0x22d   : > { %v19056_v28 = vpop.f32.mrf.mxu1  ;;  %v19120_v42 = vadd.f32 %v2164_v49, %v1201_v11  ;;  %v7336_v26 = vadd.f32 %v19049_v16, %v7260_v18  ;;  %v5480_v5 = vadd.f32 %v20013_v27, %v5402_v19  ;;  %v5714_v20 = vadd.f32 %v20015_v15, %v20014_v41  ;;  %v20022_v7 = vld [vmem:[#allocation79_spill] sm:$0xff]  ;;  %v20023_v18 = vld [vmem:[#allocation86_spill] sm:$0xff]  ;;  %v20029_v0 = vld [vmem:[#allocation81_spill] sm:$0xff] }
 0x22e   : > { %v19061_v13 = vpop.f32.mrf.mxu0  ;;  %v3135_v25 = vadd.f32 %v2667_v9, %v2167_v36  ;;  %v6446_v29 = vadd.f32 %v20016_v34, %v6368_v4  ;;  %v6680_v32 = vadd.f32 %v20018_v22, %v20017_v53  ;;  %v3132_v49 = vadd.f32 %v20019_v50, %v3058_v12  ;;  %v20024_v4 = vld [vmem:[#allocation54_spill] sm:$0xff] }
 0x22f   : > { %v19067_v51 = vpop.f32.mrf.mxu1  ;;  %v7338_v38 = vadd.f32 %v19056_v28, %v7262_v39  ;;  %v8936_v16 = vsub.s32 0, %v19118_v3  ;;  %v4586_v9 = vadd.f32 %v20020_v8, %v4512_v2  ;;  %v4823_v43 = vadd.f32 %v20021_v1, %v4746_v57  ;;  %v20027_v31 = vld [vmem:[#allocation70_spill] sm:$0xff] }
 0x230   : > { %v19070_v47 = vpop.f32.mrf.mxu0  ;;  %v4103_v33 = vadd.f32 %v3635_v46, %v3135_v25  ;;  %v6682_v11 = vadd.f32 %v20023_v18, %v20022_v7  ;;  %v4026_v37 = vadd.f32 %v20024_v4, %v3948_v58  ;;  %v6448_v12 = vadd.f32 %v20025_v63, %v6370_v35  ;;  %v20028_v25 = vld [vmem:[#allocation80_spill] sm:$0xff]  ;;  %v20032_v22 = vld [vmem:[#allocation82_spill] sm:$0xff] }
 0x231   : > { %v19077_v23 = vpop.f32.mrf.mxu1  ;;  %v7414_v46 = vadd.f32 %v19039_v44, %v7336_v26  ;;  %v5554_v10 = vadd.f32 %v20026_v61, %v5480_v5  ;;  %v5791_v2 = vadd.f32 %v20027_v31, %v5714_v20  ;;  %v6520_v57 = vadd.f32 %v20028_v25, %v6446_v29  ;;  %v20030_v44 = vld [vmem:[#allocation64_spill] sm:$0xff]  ;;  %v20031_v26 = vld [vmem:[#allocation83_spill] sm:$0xff] }
 0x232   : > { %v19081_v48 = vpop.f32.mrf.mxu0  ;;  %v6757_v27 = vadd.f32 %v20029_v0, %v6680_v32  ;;  %v5054_v34 = vadd.f32 %v4586_v9, %v4103_v33  ;;  %v6759_v53 = vadd.f32 %v20031_v26, %v6682_v11  ;;  %v6522_v29 = vadd.f32 %v20032_v22, %v6448_v12  ;;  %v20035_v33 = vld [vmem:[#allocation88_spill] sm:$0xff]  ;;  %v20043_v22 = vld [vmem:[#allocation74_spill] sm:$0xff] }
 0x233   : > { %v7647_v55 = vpop.f32.mrf.mxu1  ;;  %v7488_v32 = vadd.f32 %v19067_v51, %v7414_v46  ;;  %v8940_v12 = vsub.s32 1, %v19118_v3  ;;  %v20038_v31 = vld [vmem:[#allocation56_spill] sm:$0xff] }
 0x234   : > { %v19091_v56 = vpop.f32.mrf.mxu0  ;;  %v7648_v36 = vadd.f32 %v7647_v55, %v19052_v62  ;;  %v7416_v62 = vadd.f32 %v19045_v30, %v7338_v38  ;;  %v6022_v38 = vadd.f32 %v5554_v10, %v5054_v34  ;;  %v6833_v9 = vadd.f32 %v20035_v33, %v6757_v27  ;;  %v20039_v25 = vld [vmem:[#allocation72_spill] sm:$0xff]  ;;  %v20042_v34 = vld [vmem:[#allocation87_spill] sm:$0xff] }
 0x235   : > { %v7649_v54 = vpop.f32.mrf.mxu1  ;;  %v3137_v10 = vadd.f32 %v3132_v49, %v19120_v42 }
 0x236   : > { %v19099_v60 = vpop.f32.mrf.mxu0  ;;  %v7650_v55 = vadd.f32 %v7649_v54, %v19061_v13  ;;  %v7725_v5 = vadd.f32 %v19070_v47, %v7648_v36  ;;  %v20033_v13 = vld [vmem:[#allocation73_spill] sm:$0xff]  ;;  %v20036_v36 = vld [vmem:[#allocation63_spill] sm:$0xff]  ;;  %v6990_v46 = vadd.f32 %v6522_v29, %v6022_v38 }
 0x237   : > { %v19104_v24 = vpop.f32.mrf.mxu1  ;;  %v5867_v54 = vadd.f32 %v20033_v13, %v5791_v2  ;;  %v4100_v2 = vadd.f32 %v20038_v31, %v4026_v37 }
 0x238   : > { %v8068_v45 = vpop.f32.mrf.mxu0  ;;  %v7727_v47 = vadd.f32 %v19081_v48, %v7650_v55  ;;  %v7801_v4 = vadd.f32 %v19104_v24, %v7725_v5  ;;  %v20040_v24 = vld [vmem:[#allocation85_spill] sm:$0xff] }
 0x239   : > { %v19113_v21 = vpop.f32.mrf.mxu1  ;;  %v6911_v0 = vadd.f32 %v20040_v24, %v6833_v9 }
 0x23a   : > { %v8070_v6 = vpop.f32.mrf.mxu0 }
 0x23b   : > { %v19125_v14 = vpop.f32.mrf.mxu1 }
 0x23c   : > { %v8227_v52 = vpop.f32.mrf.mxu0 }
 0x23d   : > { %v19136_v40 = vpop.f32.mrf.mxu1 }
 0x23e   : > { %v8229_v59 = vpop.f32.mrf.mxu0 }
 0x23f   : > { %v8150_v19 = vpop.f32.mrf.mxu1 }
 0x240   : > { %v8151_v28 = vadd.f32 %v8150_v19, %v8068_v45  ;;  %v8381_v39 = vpop.f32.mrf.mxu0  ;;  %v4899_v45 = vadd.f32 %v20030_v44, %v4823_v43  ;;  %v7490_v43 = vadd.f32 %v19077_v23, %v7416_v62  ;;  %v19172_v23 = vld [vmem:[%s19831_s3] sm:$0xf]  ;;  %v7803_v62 = vadd.f32 %v19113_v21, %v7727_v47 }
 0x241   : > { %v8152_v41 = vpop.f32.mrf.mxu1  ;;  %v8937_v42 = vrot.slane %v19172_v23, %v8936_v16  ;;  %v8941_v5 = vrot.slane %v19172_v23, %v8940_v12  ;;  %v4105_v21 = vadd.f32 %v4100_v2, %v3137_v10  ;;  %v20045_v16 = vld [vmem:[#allocation91_spill] sm:$0xff] }
 0x242   : > { %v8228_v58 = vadd.f32 %v8227_v52, %v8151_v28  ;;  %v8153_v15 = vadd.f32 %v8152_v41, %v8070_v6  ;;  %v8383_v35 = vpop.f32.mrf.mxu0  ;;  %v20034_v6 = vld [vmem:[#allocation69_spill] sm:$0xff]  ;;  %v4977_v51 = vadd.f32 %v20036_v36, %v4899_v45  ;;  %v7958_v41 = vadd.f32 %v7490_v43, %v6990_v46  ;;  %v20046_v36 = vld [vmem:[#allocation75_spill] sm:$0xff] }
 0x243   : > { %v8303_v20 = vpop.f32.mrf.mxu1  ;;  %v6989_v52 = vadd.f32 %v6520_v57, %v20034_v6  ;;  %v5945_v57 = vadd.f32 %v20039_v25, %v5867_v54  ;;  %v7879_v45 = vadd.f32 %v19091_v56, %v7801_v4  ;;  %v7881_v38 = vadd.f32 %v19099_v60, %v7803_v62 }
 0x244   : > { %v8230_v50 = vadd.f32 %v8229_v59, %v8153_v15  ;;  %v8304_v8 = vadd.f32 %v8303_v20, %v8228_v58  ;;  %v8533_v30 = vpop.f32.mrf.mxu0  ;;  %v20037_v59 = vld [vmem:[#allocation89_spill] sm:$0xff]  ;;  %v8944_v46 = vsub.s32 2, %v19118_v3 }
 0x245   : > { %v8305_v1 = vpop.f32.mrf.mxu1  ;;  %v6835_v19 = vadd.f32 %v20037_v59, %v6759_v53  ;;  %v7957_v28 = vadd.f32 %v7488_v32, %v6989_v52  ;;  %v20041_v15 = vld [vmem:[#allocation65_spill] sm:$0xff]  ;;  %v6019_v29 = vadd.f32 %v20043_v22, %v5945_v57  ;;  %v20044_v32 = vld [vmem:[#allocation90_spill] sm:$0xff]  ;;  %v7953_v33 = vadd.f32 %v19125_v14, %v7879_v45  ;;  %v15702_v22 = vld [vmem:[#allocation2 + $0x1c] sm:$0xf] }
 0x246   : > { %v8382_v7 = vadd.f32 %v8381_v39, %v8304_v8  ;;  %v8306_v18 = vadd.f32 %v8305_v1, %v8230_v50  ;;  %v8535_v11 = vpop.f32.mrf.mxu0  ;;  %v6985_v50 = vadd.f32 %v20044_v32, %v6911_v0  ;;  %v7955_v60 = vadd.f32 %v19136_v40, %v7881_v38  ;;  %v8977_v32 = vpop.permute.xlu0 %8976 }
 0x247   : > { %v8455_v63 = vpop.f32.mrf.mxu1  ;;  %v6913_v44 = vadd.f32 %v20042_v34, %v6835_v19  ;;  %v8948_v14 = vsub.s32 3, %v19118_v3  ;;  %v8945_v24 = vrot.slane %v19172_v23, %v8944_v46 }
 0x248   : > { %v8384_v61 = vadd.f32 %v8383_v35, %v8306_v18  ;;  %v8456_v48 = vadd.f32 %v8455_v63, %v8382_v7  ;;  %v8692_v39 = vpop.f32.mrf.mxu0  ;;  %v5051_v35 = vadd.f32 %v20041_v15, %v4977_v51  ;;  %v6991_v51 = vadd.f32 %v6985_v50, %v20046_v36  ;;  %v19201_v15 = vld [vmem:[#allocation2] sm:$0xff]  ;;  %v8979_v50 = vpop.permute.xlu1 %8978 }
 0x249   : > { %v8457_v27 = vpop.f32.mrf.mxu1  ;;  %v6987_v52 = vadd.f32 %v20045_v16, %v6913_v44 }
 0x24a   : > { %v8925_v55 = vadd.f32 %v8456_v48, %v7957_v28  ;;  %v8458_v58 = vadd.f32 %v8457_v27, %v8384_v61  ;;  %v8694_v37 = vpop.f32.mrf.mxu0  ;;  %v5056_v6 = vadd.f32 %v5051_v35, %v4105_v21  ;;  %v7959_v61 = vadd.f32 %v7953_v33, %v6991_v51  ;;  %v20049_v51 = vld [vmem:[#allocation10_spill] sm:$0xff] }
 0x24b   : > { %v8615_v49 = vpop.f32.mrf.mxu1  ;;  %v8949_v27 = vrot.slane %v19172_v23, %v8948_v14 }
 0x24c   : > { %v8929_v26 = vmax.f32 %v8925_v55, 0.0  ;;  %v8926_v53 = vadd.f32 %v8458_v58, %v7958_v41  ;;  %v8616_v20 = vadd.f32 %v8615_v49, %v8533_v30  ;;  %v6024_v18 = vadd.f32 %v6019_v29, %v5056_v6  ;;  %v20047_v55 = vld [vmem:[#allocation51_spill] sm:$0xff]  ;;  %v16666_v29 = vld [vmem:[#allocation2 + $0x1c] sm:$0xf] }
 0x24d   : > { %v8617_v8 = vpop.f32.mrf.mxu1  ;;  %v8846_v1 = vpop.f32.mrf.mxu0 }
 0x24e   : > { %v8930_v56 = vmax.f32 %v8926_v53, 0.0  ;;  %v8693_v13 = vadd.f32 %v8692_v39, %v8616_v20  ;;  %v8618_v54 = vadd.f32 %v8617_v8, %v8535_v11  ;;  %v8954_v43 = vmul.f32 %v8937_v42, %v8929_v26  ;;  %v13774_v53 = vld [vmem:[#allocation2 + $0x18] sm:$0xf] }
 0x24f   : > { %v8768_v9 = vpop.f32.mrf.mxu1  ;;  %v8848_v63 = vpop.f32.mrf.mxu0  ;;  %v6992_v28 = vadd.f32 %v6987_v52, %v6024_v18  ;;  %v8986_v8 = vsel %vm250_vm1, %v8977_v32, %v8979_v50  ;;  %v20052_v32 = vld [vmem:[#allocation16_spill] sm:$0xff] }
 0x250   : > { %v8955_v30 = vmul.f32 %v8941_v5, %v8930_v56  ;;  %v8695_v47 = vadd.f32 %v8694_v37, %v8618_v54  ;;  %v8769_v7 = vadd.f32 %v8768_v9, %v8693_v13  ;;  %v14738_v5 = vld [vmem:[#allocation2 + $0x18] sm:$0xf]  ;;  %v8990_v38 = vsel %vm259_vm2, %v8986_v8, 0 }
 0x251   : > { %v8770_v59 = vpop.f32.mrf.mxu1  ;;  %v7960_v31 = vadd.f32 %v7955_v60, %v6992_v28  ;;  %v9030_v56 = vand.u32 4294901760, %v8990_v38 }
 0x252   : > { %v8962_v19 = vcombine.low %v8954_v43, %v8955_v30  ;;  %v8847_v4 = vadd.f32 %v8846_v1, %v8769_v7  ;;  %v8771_v11 = vadd.f32 %v8770_v59, %v8695_v47  ;;  %v17824_v25 = vcombine.low %v8955_v30, %v8955_v30  ;;  %v20048_v43 = vld [vmem:[#allocation12_spill] sm:$0xff] }
 0x253   : > { %v8920_v12 = vpop.f32.mrf.mxu1  ;;  %v9113_v13 = vsub.f32 %v8990_v38, %v9030_v56 }
 0x254   : > { %8966 = vst [vmem:[#allocation2 + $0x8] sm:$0xff] %v8962_v19  ;;  %v8849_v48 = vadd.f32 %v8848_v63, %v8771_v11  ;;  %v8921_v39 = vadd.f32 %v8920_v12, %v8847_v4  ;;  %8980 = vrot.lane.b32.xlu1 %v8962_v19, %s17922_s8  ;;  %v20050_v4 = vld [vmem:[#allocation9_spill] sm:$0xff]  ;;  %v20051_v63 = vld [vmem:[#allocation11_spill] sm:$0xff] }
 0x255   : > { %v8922_v10 = vpop.f32.mrf.mxu1  ;;  %v9114_v52 = vand.u32 4294901760, %v9113_v13 }
 0x256   : > { %v8927_v2 = vadd.f32 %v8921_v39, %v7959_v61  ;;  %v8923_v40 = vadd.f32 %v8922_v10, %v8849_v48 }
 0x257   : > { %v9115_v1 = vsub.f32 %v9113_v13, %v9114_v52 }
 0x258   : > { %v8931_v57 = vmax.f32 %v8927_v2, 0.0  ;;  %v8928_v0 = vadd.f32 %v8923_v40, %v7960_v31  ;;  %8982 = vrot.lane.b32.xlu1 %v17824_v25, %s17922_s8 }
 0x259   : > { %v9116_v18 = vand.u32 4294901760, %v9115_v1 }
 0x25a   : > { %v8932_v3 = vmax.f32 %v8928_v0, 0.0  ;;  %v8956_v41 = vmul.f32 %v8945_v24, %v8931_v57 }
 0x25b   : > { %v10896_v45 = vld [vmem:[#allocation2 + $0x4] sm:$0xff] }
 0x25c   : > { %v8957_v62 = vmul.f32 %v8949_v27, %v8932_v3  ;;  %9942 = vrot.lane.b32.xlu1 %v20047_v55, %s17923_s26  ;;  %v10902_v42 = vcombine.high %v10896_v45, %v10896_v45 }
 0x25e   : > { %v8963_v58 = vcombine.low %v8956_v41, %v8957_v62  ;;  %v17825_v26 = vcombine.low %v8957_v62, %v8957_v62 }
 0x260   : > { %8967 = vst [vmem:[#allocation2 + $0x10] sm:$0xff] %v8963_v58  ;;  %9940 = vrot.lane.b32.xlu1 %v19201_v15, %s17923_s26 }
 0x267   : > { %v8970_v35 = vld [vmem:[#allocation2 + $0x10] sm:$0xf]  ;;  %v10898_v49 = vld [vmem:[#allocation2 + $0x14] sm:$0xf] }
 0x268   : > { %v9934_v34 = vld [vmem:[#allocation2 + $0x10] sm:$0xf]  ;;  %8984 = vrot.lane.b32.xlu0 %v8970_v35, %s17922_s8  ;;  %v11862_v37 = vld [vmem:[#allocation2 + $0x14] sm:$0xf]  ;;  %s17743_s8 = sshll.u32 %s18055_s7, 4 }
 0x269   : > { %9948 = vrot.lane.b32.xlu1 %v9934_v34, %s17923_s26  ;;  %v10897_v23 = vld [vmem:[#allocation2 + $0xc] sm:$0xff]  ;;  %v15701_v20 = vld [vmem:[#allocation2 + $0x14] sm:$0xff] }
 0x26a   : > { %v10903_v44 = vcombine.high %v10897_v23, %v10897_v23  ;;  %v15707_v21 = vcombine.high %v15701_v20, %v15701_v20 }
 0x26c   : > { %9944 = vrot.lane.b32.xlu0 %v8962_v19, %s17923_s26 }
 0x26d   : > { %10908 = vrot.lane.b32.xlu1 %v10897_v23, %s17924_s10 }
 0x270   : > { %9946 = vrot.lane.b32.xlu0 %v17824_v25, %s17923_s26  ;;  %s213_s26 = scalar_lea.vmem [#allocation6], %s17743_s8 }
 0x271   : > { %10910 = vrot.lane.b32.xlu1 %v10903_v44, %s17924_s10 }
 0x274   : > { %10906 = vrot.lane.b32.xlu0 %v10902_v42, %s17924_s10 }
 0x275   : > { %11870 = vrot.lane.b32.xlu1 %v10902_v42, %s17925_s11 }
 0x278   : > { %10904 = vrot.lane.b32.xlu0 %v10896_v45, %s17924_s10 }
 0x279   : > { %11868 = vrot.lane.b32.xlu1 %v10896_v45, %s17925_s11 }
 0x27c   : > { %10912 = vrot.lane.b32.xlu0 %v10898_v49, %s17924_s10  ;;  %s17750_s10 = sshll.u32 %s17978_s19, 8  ;;  %s17860_s19 = scalar_lea.vmem %s17859_s30, 512 }
 0x27d   : > { %11876 = vrot.lane.b32.xlu1 %v11862_v37, %s17925_s11 }
 0x280   : > { %11872 = vrot.lane.b32.xlu0 %v10897_v23, %s17925_s11 }
 0x281   : > { %13784 = vrot.lane.b32.xlu1 %v8963_v58, %s17926_s12 }
 0x284   : > { %11874 = vrot.lane.b32.xlu0 %v10903_v44, %s17925_s11  ;;  %s17665_s11 = sshll.u32 %s213_s26, 4  ;;  %s17666_s11 = int_to_ptr.vmem [resolvable:$true] %s17665_s11 }
 0x285   : > { %13786 = vrot.lane.b32.xlu1 %v17825_v26, %s17926_s12  ;;  %p17861_p3 = scmp.lt.s32.totalorder %s17666_s11, %s17859_s30 }
 0x288   : > { %13782 = vrot.lane.b32.xlu0 %v17824_v25, %s17926_s12 }
 0x289   : > { %14746 = vrot.lane.b32.xlu1 %v17824_v25, %s17927_s20 }
 0x28c   : > { %13780 = vrot.lane.b32.xlu0 %v8962_v19, %s17926_s12 }
 0x28d   : > { %14744 = vrot.lane.b32.xlu1 %v8962_v19, %s17927_s20 }
 0x290   : > { %13788 = vrot.lane.b32.xlu0 %v13774_v53, %s17926_s12 }
 0x291   : > { %14752 = vrot.lane.b32.xlu1 %v14738_v5, %s17927_s20 }
 0x294   : > { %14748 = vrot.lane.b32.xlu0 %v8963_v58, %s17927_s20 }
 0x295   : > { %15712 = vrot.lane.b32.xlu1 %v15701_v20, %s17928_s22 }
 0x298   : > { %14750 = vrot.lane.b32.xlu0 %v17825_v26, %s17927_s20  ;;  %s17663_s20 = scalar_lea.hbm %s19832_s4, %s17750_s10 }
 0x299   : > { %15714 = vrot.lane.b32.xlu1 %v15707_v21, %s17928_s22 }
 0x29c   : > { %15710 = vrot.lane.b32.xlu0 %v10903_v44, %s17928_s22 }
 0x29d   : > { %16674 = vrot.lane.b32.xlu1 %v10903_v44, %s17929_s23 }
 0x2a0   : > { %15708 = vrot.lane.b32.xlu0 %v10897_v23, %s17928_s22 }
 0x2a1   : > { %16672 = vrot.lane.b32.xlu1 %v10897_v23, %s17929_s23 }
 0x2a4   : > { %15716 = vrot.lane.b32.xlu0 %v15702_v22, %s17928_s22  ;;  %s17651_s22 = scalar_lea.sflag [#allocation5], %s18055_s7 }
 0x2a5   : > { %16680 = vrot.lane.b32.xlu1 %v16666_v29, %s17929_s23 }
 0x2a8   : > { %16676 = vrot.lane.b32.xlu0 %v15701_v20, %s17929_s23 }
 0x2ac   : > { %16678 = vrot.lane.b32.xlu0 %v15707_v21, %s17929_s23  ;;  %s17854_s23 = scalar_lea.vmem %s17666_s11, 256 }
 0x2ad   : > { %p17855_p11 = scmp.ne.s32.totalorder %s17666_s11, %s17854_s23  ;;  %p17862_p5 = scmp.lt.s32.totalorder %s17860_s19, %s17854_s23 }
 0x2af   : > { %p17856_p13 = pnand %p17855_p11, %p20084_p12  ;;  %p17863_p8 = por %p17862_p5, %p17861_p3 }
 0x2b1   : > { %p17857_p1 = pneg %p17856_p13 }
 0x2b3   : > { %p17864_p10 = pnand %p17863_p8, %p17857_p1 }
 0x2c6   : > { %v8981_v54 = vpop.permute.xlu1 %8980 }
 0x2c7   : > { %v8987_v6 = vsel %vm250_vm1, %v8979_v50, %v8981_v54 }
 0x2c8   : > { %v8992_v16 = vsel %vm259_vm2, %v8987_v6, 0  ;;  %v20053_v6 = vld [vmem:[#allocation14_spill] sm:$0xff] }
 0x2c9   : > { %v9028_v33 = vand.u32 4294901760, %v8992_v16 }
 0x2ca   : > { %v8983_v47 = vpop.permute.xlu1 %8982 }
 0x2cb   : > { %v9107_v9 = vsub.f32 %v8992_v16, %v9028_v33  ;;  %9029 = vmatprep.subr.mxu0 %v9028_v33  ;;  %v8988_v36 = vsel %vm250_vm1, %v8981_v54, %v8983_v47 }
 0x2cc   : > { %9031 = vmatpush1.msra.mxu0 %v9030_v56  ;;  %v8994_v60 = vsel %vm259_vm2, %v8988_v36, 0 }
 0x2cd   : > { %9070 = vmatmul.mubr.f32.vlgmr.msra.gmra.mxu0 %v20048_v43  ;;  %9190 = vmatprep.subr.mxu0 %v9107_v9  ;;  %v9108_v30 = vand.u32 4294901760, %v9107_v9  ;;  %v19251_v11 = vand.u32 4294901760, %v8994_v60 }
 0x2ce   : > { %9193 = vmatpush1.msra.mxu0 %v9113_v13  ;;  %9226 = vmatprep.mubr.f32.mxu0 %v19201_v15  ;;  %v9943_v19 = vpop.permute.xlu1 %9942 }
 0x2cf   : > { %9344 = vmatprep.subr.mxu0 %v9108_v30  ;;  %v9109_v7 = vsub.f32 %v9107_v9, %v9108_v30  ;;  %v9578_v14 = vsub.f32 %v8994_v60, %v19251_v11  ;;  %v20054_v30 = vld [vmem:[#allocation13_spill] sm:$0xff] }
 0x2d1   : > { %9229 = vmatmul.mubr.f32.vlgmr.msra.gmra.mxu0 %v20049_v51  ;;  %v9110_v59 = vand.u32 4294901760, %v9109_v7  ;;  %v9579_v25 = vand.u32 4294901760, %v9578_v14 }
 0x2d2   : > { %9348 = vmatpush1.msra.mxu0 %v9114_v52  ;;  %9381 = vmatprep.mubr.f32.mxu0 %v19201_v15  ;;  %v9941_v46 = vpop.permute.xlu1 %9940 }
 0x2d3   : > { %9111 = vmatprep.subr.mxu1 %v9110_v59  ;;  %v9950_v61 = vsel %vm1220_vm3, %v9941_v46, %v9943_v19  ;;  %v9580_v55 = vsub.f32 %v9578_v14, %v9579_v25  ;;  %v20055_v59 = vld [vmem:[#allocation15_spill] sm:$0xff] }
 0x2d4   : > { %9117 = vmatpush1.msra.mxu1 %v9116_v18  ;;  %v9954_v10 = vsel %vm259_vm2, %v9950_v61, 0 }
 0x2d5   : > { %9152 = vmatmul.mubr.f32.vlgmr.msra.gmra.mxu1 %v20050_v4  ;;  %9266 = vmatprep.subr.mxu1 %v9028_v33  ;;  %v19267_v24 = vand.u32 4294901760, %v9954_v10  ;;  %v9581_v49 = vand.u32 4294901760, %v9580_v55 }
 0x2d6   : > { %9383 = vmatmul.mubr.f32.vlgmr.msra.gmra.mxu0 %v20050_v4  ;;  %9268 = vmatpush1.msra.mxu1 %v9030_v56 }
 0x2d7   : > { %9420 = vmatprep.subr.mxu1 %v9028_v33  ;;  %9301 = vmatprep.mubr.f32.mxu1 %v19201_v15  ;;  %v10077_v34 = vsub.f32 %v9954_v10, %v19267_v24 }
 0x2d8   : > { %9529 = vmatprep.mubr.f32.mxu0 %v19201_v15 }
 0x2d9   : > { %9305 = vmatmul.mubr.f32.vlgmr.msra.gmra.mxu1 %v20051_v63  ;;  %v10078_v37 = vand.u32 4294901760, %v10077_v34 }
 0x2da   : > { %v8985_v12 = vpop.permute.xlu0 %8984  ;;  %9422 = vmatpush1.msra.mxu1 %v9030_v56  ;;  %9455 = vmatprep.mubr.f32.mxu1 %v19201_v15 }
 0x2db   : > { %v8989_v28 = vsel %vm250_vm1, %v8983_v47, %v8985_v12  ;;  %v9949_v62 = vpop.permute.xlu1 %9948  ;;  %v10079_v22 = vsub.f32 %v10077_v34, %v10078_v37 }
 0x2dc   : > { %v8996_v48 = vsel %vm259_vm2, %v8989_v28, 0 }
 0x2dd   : > { %v9493_v39 = vand.u32 4294901760, %v8996_v48  ;;  %9457 = vmatmul.mubr.f32.vlgmr.msra.gmra.mxu1 %v20050_v4  ;;  %v10080_v54 = vand.u32 4294901760, %v10079_v22 }
 0x2de   : > { %v9945_v31 = vpop.permute.xlu0 %9944  ;;  %9615 = vmatprep.mubr.f32.mxu1 %v19201_v15 }
 0x2df   : > { %v9572_v2 = vsub.f32 %v8996_v48, %v9493_v39  ;;  %v9951_v40 = vsel %vm1220_vm3, %v9943_v19, %v9945_v31  ;;  %9494 = vmatprep.subr.mxu0 %v9493_v39  ;;  %v10909_v8 = vpop.permute.xlu1 %10908 }
 0x2e0   : > { %v9956_v57 = vsel %vm259_vm2, %v9951_v40, 0  ;;  %9496 = vmatpush1.msra.mxu0 %v19251_v11 }
 0x2e1   : > { %v19269_v0 = vand.u32 4294901760, %v9956_v57  ;;  %9535 = vmatmul.mubr.f32.vlgmr.msra.gmra.mxu0 %v20048_v43  ;;  %9655 = vmatprep.subr.mxu0 %v9572_v2  ;;  %v9573_v27 = vand.u32 4294901760, %v9572_v2 }
 0x2e2   : > { %v9947_v3 = vpop.permute.xlu0 %9946  ;;  %9658 = vmatpush1.msra.mxu0 %v9578_v14  ;;  %9691 = vmatprep.mubr.f32.mxu0 %v19201_v15 }
 0x2e3   : > { %v10071_v41 = vsub.f32 %v9956_v57, %v19269_v0  ;;  %9809 = vmatprep.subr.mxu0 %v9573_v27  ;;  %v9953_v58 = vsel %vm1220_vm3, %v9947_v3, %v9949_v62  ;;  %v9574_v35 = vsub.f32 %v9572_v2, %v9573_v27  ;;  %v9952_v45 = vsel %vm1220_vm3, %v9945_v31, %v9947_v3  ;;  %v10911_v19 = vpop.permute.xlu1 %10910  ;;  %v20056_v57 = vld [vmem:[#allocation20_spill] sm:$0xff]  ;;  %v20057_v62 = vld [vmem:[#allocation18_spill] sm:$0xff] }
 0x2e4   : > { %v9960_v42 = vsel %vm259_vm2, %v9953_v58, 0  ;;  %v9958_v26 = vsel %vm259_vm2, %v9952_v45, 0  ;;  %v10916_v46 = vsel %vm2188_vm4, %v10909_v8, %v10911_v19  ;;  %v20058_v45 = vld [vmem:[#allocation17_spill] sm:$0xff] }
 0x2e5   : > { %9694 = vmatmul.mubr.f32.vlgmr.msra.gmra.mxu0 %v20049_v51  ;;  %v9575_v23 = vand.u32 4294901760, %v9574_v35  ;;  %v10072_v44 = vand.u32 4294901760, %v10071_v41  ;;  %v19283_v53 = vand.u32 4294901760, %v9960_v42  ;;  %v19288_v21 = vand.u32 4294901760, %v9958_v26 }
 0x2e6   : > { %9813 = vmatpush1.msra.mxu0 %v9579_v25  ;;  %9846 = vmatprep.mubr.f32.mxu0 %v19201_v15  ;;  %v10907_v5 = vpop.permute.xlu0 %10906  ;;  %v10922_v61 = vsel %vm259_vm2, %v10916_v46, 0 }
 0x2e7   : > { %9993 = vmatprep.subr.mxu0 %v19269_v0  ;;  %9576 = vmatprep.subr.mxu1 %v9575_v23  ;;  %v10073_v20 = vsub.f32 %v10071_v41, %v10072_v44  ;;  %v10536_v29 = vsub.f32 %v9960_v42, %v19283_v53  ;;  %v10915_v38 = vsel %vm2188_vm4, %v10907_v5, %v10909_v8  ;;  %v11871_v48 = vpop.permute.xlu1 %11870  ;;  %v19344_v31 = vand.u32 4294901760, %v10922_v61 }
 0x2e8   : > { %9582 = vmatpush1.msra.mxu1 %v9581_v49  ;;  %v10542_v13 = vsub.f32 %v9958_v26, %v19288_v21  ;;  %v10920_v52 = vsel %vm259_vm2, %v10915_v38, 0 }
 0x2e9   : > { %9848 = vmatmul.mubr.f32.vlgmr.msra.gmra.mxu0 %v20050_v4  ;;  %9617 = vmatmul.mubr.f32.vlgmr.msra.gmra.mxu1 %v20050_v4  ;;  %v10074_v50 = vand.u32 4294901760, %v10073_v20  ;;  %v10537_v16 = vand.u32 4294901760, %v10536_v29  ;;  %v19308_v1 = vand.u32 4294901760, %v10920_v52  ;;  %v11506_v3 = vsub.f32 %v10922_v61, %v19344_v31 }
 0x2ea   : > { %9731 = vmatprep.subr.mxu1 %v9493_v39  ;;  %9995 = vmatpush1.msra.mxu0 %v19267_v24  ;;  %v10905_v56 = vpop.permute.xlu0 %10904  ;;  %v10543_v9 = vand.u32 4294901760, %v10542_v13 }
 0x2eb   : > { %9733 = vmatpush1.msra.mxu1 %v19251_v11  ;;  %10154 = vmatprep.subr.mxu0 %v10071_v41  ;;  %v10914_v33 = vsel %vm2188_vm4, %v10905_v56, %v10907_v5  ;;  %v10538_v47 = vsub.f32 %v10536_v29, %v10537_v16  ;;  %v11035_v51 = vsub.f32 %v10920_v52, %v19308_v1  ;;  %v20059_v5 = vld [vmem:[#allocation19_spill] sm:$0xff] }
 0x2ec   : > { %9885 = vmatprep.subr.mxu1 %v9493_v39  ;;  %9766 = vmatprep.mubr.f32.mxu1 %v19201_v15  ;;  %v10918_v43 = vsel %vm259_vm2, %v10914_v33, 0  ;;  %v10544_v36 = vsub.f32 %v10542_v13, %v10543_v9 }
 0x2ed   : > { %10028 = vmatprep.mubr.f32.mxu0 %v19201_v15  ;;  %9770 = vmatmul.mubr.f32.vlgmr.msra.gmra.mxu1 %v20051_v63  ;;  %v19316_v7 = vand.u32 4294901760, %v10918_v43  ;;  %v10539_v60 = vand.u32 4294901760, %v10538_v47  ;;  %v11036_v12 = vand.u32 4294901760, %v11035_v51 }
 0x2ee   : > { %10034 = vmatmul.mubr.f32.vlgmr.msra.gmra.mxu0 %v20052_v32  ;;  %9887 = vmatpush1.msra.mxu1 %v19251_v11  ;;  %v10913_v18 = vpop.permute.xlu0 %10912  ;;  %v10545_v63 = vand.u32 4294901760, %v10544_v36 }
 0x2ef   : > { %10157 = vmatpush1.msra.mxu0 %v10077_v34  ;;  %10075 = vmatprep.subr.mxu1 %v10074_v50  ;;  %v11041_v11 = vsub.f32 %v10918_v43, %v19316_v7  ;;  %v11037_v10 = vsub.f32 %v11035_v51, %v11036_v12  ;;  %v11507_v34 = vand.u32 4294901760, %v11506_v3 }
 0x2f0   : > { %10308 = vmatprep.subr.mxu0 %v10072_v44  ;;  %9920 = vmatprep.mubr.f32.mxu1 %v19201_v15 }
 0x2f1   : > { %10190 = vmatprep.mubr.f32.mxu0 %v19201_v15  ;;  %9922 = vmatmul.mubr.f32.vlgmr.msra.gmra.mxu1 %v20050_v4  ;;  %v10917_v4 = vsel %vm2188_vm4, %v10911_v19, %v10913_v18  ;;  %v11042_v28 = vand.u32 4294901760, %v11041_v11  ;;  %v11508_v26 = vsub.f32 %v11506_v3, %v11507_v34  ;;  %v20061_v18 = vld [vmem:[#allocation22_spill] sm:$0xff] }
 0x2f2   : > { %10193 = vmatmul.mubr.f32.vlgmr.msra.gmra.mxu0 %v20053_v6  ;;  %10081 = vmatpush1.msra.mxu1 %v10080_v54  ;;  %v10924_v14 = vsel %vm259_vm2, %v10917_v4, 0  ;;  %v11873_v2 = vpop.permute.xlu0 %11872 }
 0x2f3   : > { %10312 = vmatpush1.msra.mxu0 %v10078_v37  ;;  %10230 = vmatprep.subr.mxu1 %v19269_v0  ;;  %v19337_v39 = vand.u32 4294901760, %v10924_v14  ;;  %v11043_v40 = vsub.f32 %v11041_v11, %v11042_v28  ;;  %v11879_v27 = vsel %vm3156_vm5, %v11871_v48, %v11873_v2 }
 0x2f4   : > { %10458 = vmatprep.subr.mxu0 %v19283_v53  ;;  %10114 = vmatprep.mubr.f32.mxu1 %v19201_v15  ;;  %v11884_v35 = vsel %vm259_vm2, %v11879_v27, 0 }
 0x2f5   : > { %10345 = vmatprep.mubr.f32.mxu0 %v19201_v15  ;;  %10116 = vmatmul.mubr.f32.vlgmr.msra.gmra.mxu1 %v20054_v30  ;;  %v11500_v25 = vsub.f32 %v10924_v14, %v19337_v39  ;;  %v11044_v41 = vand.u32 4294901760, %v11043_v40  ;;  %v19365_v44 = vand.u32 4294901760, %v11884_v35  ;;  %v20063_v14 = vld [vmem:[#allocation23_spill] sm:$0xff] }
 0x2f6   : > { %10347 = vmatmul.mubr.f32.vlgmr.msra.gmra.mxu0 %v20054_v30  ;;  %10232 = vmatpush1.msra.mxu1 %v19267_v24  ;;  %v11875_v37 = vpop.permute.xlu0 %11874 }
 0x2f7   : > { %10460 = vmatpush1.msra.mxu0 %v19288_v21  ;;  %10384 = vmatprep.subr.mxu1 %v19269_v0  ;;  %v11869_v0 = vpop.permute.xlu1 %11868  ;;  %v11501_v55 = vand.u32 4294901760, %v11500_v25  ;;  %v11880_v8 = vsel %vm3156_vm5, %v11873_v2, %v11875_v37 }
 0x2f8   : > { %10619 = vmatprep.subr.mxu0 %v10536_v29  ;;  %10265 = vmatprep.mubr.f32.mxu1 %v19201_v15  ;;  %v11878_v58 = vsel %vm3156_vm5, %v11869_v0, %v11871_v48 }
 0x2f9   : > { %10493 = vmatprep.mubr.f32.mxu0 %v19201_v15  ;;  %10269 = vmatmul.mubr.f32.vlgmr.msra.gmra.mxu1 %v20055_v59  ;;  %v11882_v23 = vsel %vm259_vm2, %v11878_v58, 0  ;;  %v11502_v42 = vsub.f32 %v11500_v25, %v11501_v55 }
 0x2fa   : > { %10499 = vmatmul.mubr.f32.vlgmr.msra.gmra.mxu0 %v20052_v32  ;;  %10386 = vmatpush1.msra.mxu1 %v19267_v24  ;;  %v11038_v24 = vand.u32 4294901760, %v11037_v10  ;;  %v19372_v49 = vand.u32 4294901760, %v11882_v23  ;;  %v11509_v32 = vand.u32 4294901760, %v11508_v26 }
 0x2fb   : > { %10622 = vmatpush1.msra.mxu0 %v10542_v13  ;;  %10540 = vmatprep.subr.mxu1 %v10539_v60  ;;  %v11503_v20 = vand.u32 4294901760, %v11502_v42  ;;  %v11886_v13 = vsel %vm259_vm2, %v11880_v8, 0  ;;  %v20062_v60 = vld [vmem:[#allocation21_spill] sm:$0xff]  ;;  %v20067_v8 = vld [vmem:[#allocation27_spill] sm:$0xff] }
 0x2fc   : > { %10773 = vmatprep.subr.mxu0 %v10537_v16  ;;  %10419 = vmatprep.mubr.f32.mxu1 %v19201_v15  ;;  %v12005_v29 = vsub.f32 %v11882_v23, %v19372_v49  ;;  %v12824_v16 = vld [vmem:[#allocation2 + $0x8] sm:$0xff]  ;;  %v19400_v52 = vand.u32 4294901760, %v11886_v13 }
 0x2fd   : > { %10655 = vmatprep.mubr.f32.mxu0 %v19201_v15  ;;  %10421 = vmatmul.mubr.f32.vlgmr.msra.gmra.mxu1 %v20054_v30 }
 0x2fe   : > { %10658 = vmatmul.mubr.f32.vlgmr.msra.gmra.mxu0 %v20053_v6  ;;  %10546 = vmatpush1.msra.mxu1 %v10545_v63  ;;  %v12006_v56 = vand.u32 4294901760, %v12005_v29  ;;  %v12470_v47 = vsub.f32 %v11886_v13, %v19400_v52  ;;  %v12825_v63 = vld [vmem:[#allocation2 + $0x10] sm:$0xff] }
 0x2ff   : > { %10777 = vmatpush1.msra.mxu0 %v10543_v9  ;;  %10695 = vmatprep.subr.mxu1 %v19283_v53  ;;  %v12829_v48 = vcombine.high %v12825_v63, %v12825_v63  ;;  %v12834_v0 = vsel %vm259_vm2, %v12825_v63, 0 }
 0x300   : > { %10957 = vmatprep.subr.mxu0 %v19308_v1  ;;  %10579 = vmatprep.mubr.f32.mxu1 %v19201_v15  ;;  %v12007_v33 = vsub.f32 %v12005_v29, %v12006_v56 }
 0x301   : > { %10810 = vmatprep.mubr.f32.mxu0 %v19201_v15  ;;  %10581 = vmatmul.mubr.f32.vlgmr.msra.gmra.mxu1 %v20054_v30  ;;  %v12836_v2 = vsel %vm259_vm2, %v12829_v48, 0 }
 0x302   : > { %10812 = vmatmul.mubr.f32.vlgmr.msra.gmra.mxu0 %v20054_v30  ;;  %10697 = vmatpush1.msra.mxu1 %v19288_v21 }
 0x303   : > { %10959 = vmatpush1.msra.mxu0 %v19316_v7  ;;  %10849 = vmatprep.subr.mxu1 %v19283_v53  ;;  %v11999_v53 = vsub.f32 %v11884_v35, %v19365_v44 }
 0x304   : > { %11118 = vmatprep.subr.mxu0 %v11035_v51  ;;  %10730 = vmatprep.mubr.f32.mxu1 %v19201_v15 }
 0x305   : > { %10992 = vmatprep.mubr.f32.mxu0 %v19201_v15  ;;  %10734 = vmatmul.mubr.f32.vlgmr.msra.gmra.mxu1 %v20055_v59  ;;  %v12000_v50 = vand.u32 4294901760, %v11999_v53  ;;  %v12471_v59 = vand.u32 4294901760, %v12470_v47 }
 0x306   : > { %10998 = vmatmul.mubr.f32.vlgmr.msra.gmra.mxu0 %v20056_v57  ;;  %10851 = vmatpush1.msra.mxu1 %v19288_v21  ;;  %v11877_v21 = vpop.permute.xlu1 %11876 }
 0x307   : > { %11121 = vmatpush1.msra.mxu0 %v11041_v11  ;;  %11039 = vmatprep.subr.mxu1 %v11038_v24  ;;  %v11881_v22 = vsel %vm3156_vm5, %v11875_v37, %v11877_v21  ;;  %v12001_v6 = vsub.f32 %v11999_v53, %v12000_v50  ;;  %v12830_v11 = vsel %vm259_vm2, %v12824_v16, 0  ;;  %v19446_v24 = vand.u32 4294901760, %v12836_v2 }
 0x308   : > { %11272 = vmatprep.subr.mxu0 %v11036_v12  ;;  %10884 = vmatprep.mubr.f32.mxu1 %v19201_v15  ;;  %v11888_v38 = vsel %vm259_vm2, %v11881_v22, 0  ;;  %v12472_v12 = vsub.f32 %v12470_v47, %v12471_v59  ;;  %v19428_v46 = vand.u32 4294901760, %v12830_v11 }
 0x309   : > { %11154 = vmatprep.mubr.f32.mxu0 %v19201_v15  ;;  %10886 = vmatmul.mubr.f32.vlgmr.msra.gmra.mxu1 %v20054_v30  ;;  %v19393_v54 = vand.u32 4294901760, %v11888_v38  ;;  %v12002_v43 = vand.u32 4294901760, %v12001_v6  ;;  %v12828_v30 = vcombine.high %v12824_v16, %v12824_v16 }
 0x30a   : > { %11157 = vmatmul.mubr.f32.vlgmr.msra.gmra.mxu0 %v20057_v62  ;;  %11045 = vmatpush1.msra.mxu1 %v11044_v41  ;;  %v12953_v10 = vsub.f32 %v12830_v11, %v19428_v46  ;;  %v20064_v41 = vld [vmem:[#allocation28_spill] sm:$0xff]  ;;  %v13785_v58 = vpop.permute.xlu1 %13784 }
 0x30b   : > { %11276 = vmatpush1.msra.mxu0 %v11042_v28  ;;  %11194 = vmatprep.subr.mxu1 %v19308_v1  ;;  %v12464_v9 = vsub.f32 %v11888_v38, %v19393_v54  ;;  %v12832_v51 = vsel %vm259_vm2, %v12828_v30, 0 }
 0x30c   : > { %11422 = vmatprep.subr.mxu0 %v19337_v39  ;;  %11078 = vmatprep.mubr.f32.mxu1 %v19201_v15  ;;  %v19420_v4 = vand.u32 4294901760, %v12832_v51  ;;  %v12954_v40 = vand.u32 4294901760, %v12953_v10 }
 0x30d   : > { %11309 = vmatprep.mubr.f32.mxu0 %v19201_v15  ;;  %11080 = vmatmul.mubr.f32.vlgmr.msra.gmra.mxu1 %v20058_v45  ;;  %v12465_v36 = vand.u32 4294901760, %v12464_v9 }
 0x30e   : > { %11311 = vmatmul.mubr.f32.vlgmr.msra.gmra.mxu0 %v20058_v45  ;;  %11196 = vmatpush1.msra.mxu1 %v19316_v7  ;;  %v12947_v61 = vsub.f32 %v12832_v51, %v19420_v4  ;;  %v12955_v27 = vsub.f32 %v12953_v10, %v12954_v40 }
 0x30f   : > { %11424 = vmatpush1.msra.mxu0 %v19344_v31  ;;  %11348 = vmatprep.subr.mxu1 %v19308_v1  ;;  %v20060_v1 = vld [vmem:[#allocation24_spill] sm:$0xff]  ;;  %v12466_v19 = vsub.f32 %v12464_v9, %v12465_v36 }
 0x310   : > { %11583 = vmatprep.subr.mxu0 %v11500_v25  ;;  %11229 = vmatprep.mubr.f32.mxu1 %v19201_v15  ;;  %v13783_v25 = vpop.permute.xlu0 %13782  ;;  %v12956_v23 = vand.u32 4294901760, %v12955_v27 }
 0x311   : > { %11457 = vmatprep.mubr.f32.mxu0 %v19201_v15  ;;  %11233 = vmatmul.mubr.f32.vlgmr.msra.gmra.mxu1 %v20059_v5  ;;  %v12467_v28 = vand.u32 4294901760, %v12466_v19  ;;  %v13791_v35 = vsel %vm5075_vm6, %v13783_v25, %v13785_v58 }
 0x312   : > { %11463 = vmatmul.mubr.f32.vlgmr.msra.gmra.mxu0 %v20056_v57  ;;  %11350 = vmatpush1.msra.mxu1 %v19316_v7  ;;  %v12008_v7 = vand.u32 4294901760, %v12007_v33 }
 0x313   : > { %11586 = vmatpush1.msra.mxu0 %v11506_v3  ;;  %11504 = vmatprep.subr.mxu1 %v11503_v20  ;;  %v19454_v3 = vand.u32 4294901760, %v12834_v0  ;;  %v20066_v20 = vld [vmem:[#allocation25_spill] sm:$0xff] }
 0x314   : > { %11737 = vmatprep.subr.mxu0 %v11501_v55  ;;  %11383 = vmatprep.mubr.f32.mxu1 %v19201_v15  ;;  %v13412_v55 = vsub.f32 %v12836_v2, %v19446_v24 }
 0x315   : > { %11619 = vmatprep.mubr.f32.mxu0 %v19201_v15  ;;  %11385 = vmatmul.mubr.f32.vlgmr.msra.gmra.mxu1 %v20058_v45 }
 0x316   : > { %11622 = vmatmul.mubr.f32.vlgmr.msra.gmra.mxu0 %v20057_v62  ;;  %11510 = vmatpush1.msra.mxu1 %v11509_v32  ;;  %v13413_v42 = vand.u32 4294901760, %v13412_v55 }
 0x317   : > { %11741 = vmatpush1.msra.mxu0 %v11507_v34  ;;  %11659 = vmatprep.subr.mxu1 %v19337_v39  ;;  %v13781_v34 = vpop.permute.xlu0 %13780 }
 0x318   : > { %11921 = vmatprep.subr.mxu0 %v19365_v44  ;;  %11543 = vmatprep.mubr.f32.mxu1 %v19201_v15  ;;  %v13790_v37 = vsel %vm5075_vm6, %v13781_v34, %v13783_v25  ;;  %v13414_v21 = vsub.f32 %v13412_v55, %v13413_v42 }
 0x319   : > { %11774 = vmatprep.mubr.f32.mxu0 %v19201_v15  ;;  %11545 = vmatmul.mubr.f32.vlgmr.msra.gmra.mxu1 %v20058_v45 }
 0x31a   : > { %11776 = vmatmul.mubr.f32.vlgmr.msra.gmra.mxu0 %v20058_v45  ;;  %11661 = vmatpush1.msra.mxu1 %v19344_v31  ;;  %v13415_v38 = vand.u32 4294901760, %v13414_v21 }
 0x31b   : > { %11923 = vmatpush1.msra.mxu0 %v19372_v49  ;;  %11813 = vmatprep.subr.mxu1 %v19337_v39  ;;  %v12473_v39 = vand.u32 4294901760, %v12472_v12  ;;  %v20069_v12 = vld [vmem:[#allocation30_spill] sm:$0xff] }
 0x31c   : > { %12082 = vmatprep.subr.mxu0 %v11999_v53  ;;  %11694 = vmatprep.mubr.f32.mxu1 %v19201_v15 }
 0x31d   : > { %11956 = vmatprep.mubr.f32.mxu0 %v19201_v15  ;;  %11698 = vmatmul.mubr.f32.vlgmr.msra.gmra.mxu1 %v20059_v5  ;;  %v13794_v5 = vsel %vm259_vm2, %v13790_v37, 0 }
 0x31e   : > { %11962 = vmatmul.mubr.f32.vlgmr.msra.gmra.mxu0 %v20060_v1  ;;  %11815 = vmatpush1.msra.mxu1 %v19344_v31  ;;  %v12948_v31 = vand.u32 4294901760, %v12947_v61  ;;  %v19480_v22 = vand.u32 4294901760, %v13794_v5 }
 0x31f   : > { %12085 = vmatpush1.msra.mxu0 %v12005_v29  ;;  %12003 = vmatprep.subr.mxu1 %v12002_v43  ;;  %v13789_v29 = vpop.permute.xlu0 %13788 }
 0x320   : > { %12236 = vmatprep.subr.mxu0 %v12000_v50  ;;  %11848 = vmatprep.mubr.f32.mxu1 %v19201_v15  ;;  %v12949_v57 = vsub.f32 %v12947_v61, %v12948_v31 }
 0x321   : > { %12118 = vmatprep.mubr.f32.mxu0 %v19201_v15  ;;  %11850 = vmatmul.mubr.f32.vlgmr.msra.gmra.mxu1 %v20058_v45  ;;  %v20065_v45 = vld [vmem:[#allocation26_spill] sm:$0xff] }
 0x322   : > { %12121 = vmatmul.mubr.f32.vlgmr.msra.gmra.mxu0 %v20061_v18  ;;  %12009 = vmatpush1.msra.mxu1 %v12008_v7  ;;  %v12950_v62 = vand.u32 4294901760, %v12949_v57 }
 0x323   : > { %12240 = vmatpush1.msra.mxu0 %v12006_v56  ;;  %12158 = vmatprep.subr.mxu1 %v19365_v44  ;;  %v13787_v56 = vpop.permute.xlu1 %13786 }
 0x324   : > { %12386 = vmatprep.subr.mxu0 %v19393_v54  ;;  %12042 = vmatprep.mubr.f32.mxu1 %v19201_v15  ;;  %v13793_v13 = vsel %vm5075_vm6, %v13787_v56, %v13789_v29 }
 0x325   : > { %12273 = vmatprep.mubr.f32.mxu0 %v19201_v15  ;;  %12044 = vmatmul.mubr.f32.vlgmr.msra.gmra.mxu1 %v20062_v60  ;;  %v13800_v33 = vsel %vm259_vm2, %v13793_v13, 0 }
 0x326   : > { %12275 = vmatmul.mubr.f32.vlgmr.msra.gmra.mxu0 %v20062_v60  ;;  %12160 = vmatpush1.msra.mxu1 %v19372_v49  ;;  %v19501_v30 = vand.u32 4294901760, %v13800_v33 }
 0x327   : > { %12388 = vmatpush1.msra.mxu0 %v19400_v52  ;;  %12312 = vmatprep.subr.mxu1 %v19365_v44  ;;  %v13418_v44 = vsub.f32 %v12834_v0, %v19454_v3  ;;  %v14747_v43 = vpop.permute.xlu1 %14746 }
 0x328   : > { %12547 = vmatprep.subr.mxu0 %v12464_v9  ;;  %12193 = vmatprep.mubr.f32.mxu1 %v19201_v15  ;;  %v14376_v51 = vsub.f32 %v13800_v33, %v19501_v30 }
 0x329   : > { %12421 = vmatprep.mubr.f32.mxu0 %v19201_v15  ;;  %12197 = vmatmul.mubr.f32.vlgmr.msra.gmra.mxu1 %v20063_v14  ;;  %v13419_v26 = vand.u32 4294901760, %v13418_v44 }
 0x32a   : > { %12427 = vmatmul.mubr.f32.vlgmr.msra.gmra.mxu0 %v20060_v1  ;;  %12314 = vmatpush1.msra.mxu1 %v19372_v49  ;;  %v13796_v49 = vsel %vm259_vm2, %v13791_v35, 0 }
 0x32b   : > { %12550 = vmatpush1.msra.mxu0 %v12470_v47  ;;  %12468 = vmatprep.subr.mxu1 %v12467_v28  ;;  %v19472_v53 = vand.u32 4294901760, %v13796_v49  ;;  %v13420_v32 = vsub.f32 %v13418_v44, %v13419_v26  ;;  %v14745_v19 = vpop.permute.xlu1 %14744 }
 0x32c   : > { %12701 = vmatprep.subr.mxu0 %v12465_v36  ;;  %12347 = vmatprep.mubr.f32.mxu1 %v19201_v15 }
 0x32d   : > { %12583 = vmatprep.mubr.f32.mxu0 %v19201_v15  ;;  %12349 = vmatmul.mubr.f32.vlgmr.msra.gmra.mxu1 %v20062_v60  ;;  %v13911_v50 = vsub.f32 %v13796_v49, %v19472_v53  ;;  %v13421_v6 = vand.u32 4294901760, %v13420_v32 }
 0x32e   : > { %12586 = vmatmul.mubr.f32.vlgmr.msra.gmra.mxu0 %v20061_v18  ;;  %12474 = vmatpush1.msra.mxu1 %v12473_v39  ;;  %v19510_v18 = vpop.permute.xlu0 %14748 }
 0x32f   : > { %12705 = vmatpush1.msra.mxu0 %v12471_v59  ;;  %12623 = vmatprep.subr.mxu1 %v19393_v54  ;;  %v13912_v16 = vand.u32 4294901760, %v13911_v50  ;;  %v20068_v59 = vld [vmem:[#allocation32_spill] sm:$0xff]  ;;  %v14753_v27 = vpop.permute.xlu1 %14752 }
 0x330   : > { %12869 = vmatprep.subr.mxu0 %v19420_v4  ;;  %12507 = vmatprep.mubr.f32.mxu1 %v19201_v15 }
 0x331   : > { %12738 = vmatprep.mubr.f32.mxu0 %v19201_v15  ;;  %12509 = vmatmul.mubr.f32.vlgmr.msra.gmra.mxu1 %v20062_v60  ;;  %v13913_v47 = vsub.f32 %v13911_v50, %v13912_v16 }
 0x332   : > { %12740 = vmatmul.mubr.f32.vlgmr.msra.gmra.mxu0 %v20062_v60  ;;  %12625 = vmatpush1.msra.mxu1 %v19400_v52 }
 0x333   : > { %12871 = vmatpush1.msra.mxu0 %v19428_v46  ;;  %12777 = vmatprep.subr.mxu1 %v19393_v54  ;;  %v13917_v54 = vsub.f32 %v13794_v5, %v19480_v22 }
 0x334   : > { %13030 = vmatprep.subr.mxu0 %v12947_v61  ;;  %12658 = vmatprep.mubr.f32.mxu1 %v19201_v15 }
 0x335   : > { %12904 = vmatprep.mubr.f32.mxu0 %v19201_v15  ;;  %12662 = vmatmul.mubr.f32.vlgmr.msra.gmra.mxu1 %v20063_v14  ;;  %v13918_v9 = vand.u32 4294901760, %v13917_v54  ;;  %v14754_v14 = vsel %vm6043_vm7, %v14745_v19, %v14747_v43 }
 0x336   : > { %12910 = vmatmul.mubr.f32.vlgmr.msra.gmra.mxu0 %v20064_v41  ;;  %12779 = vmatpush1.msra.mxu1 %v19400_v52  ;;  %v13792_v52 = vsel %vm5075_vm6, %v13785_v58, %v13787_v56  ;;  %v14758_v48 = vsel %vm259_vm2, %v14754_v14, 0 }
 0x337   : > { %13033 = vmatpush1.msra.mxu0 %v12953_v10  ;;  %12951 = vmatprep.subr.mxu1 %v12950_v62  ;;  %v13798_v1 = vsel %vm259_vm2, %v13792_v52, 0  ;;  %v13919_v36 = vsub.f32 %v13917_v54, %v13918_v9  ;;  %v20070_v10 = vld [vmem:[#allocation29_spill] sm:$0xff]  ;;  %v19539_v2 = vand.u32 4294901760, %v14758_v48 }
 0x338   : > { %13184 = vmatprep.subr.mxu0 %v12948_v31  ;;  %12812 = vmatprep.mubr.f32.mxu1 %v19201_v15  ;;  %v19508_v7 = vand.u32 4294901760, %v13798_v1  ;;  %v19549_v62 = vld [vmem:[#allocation2] sm:$0xff] }
 0x339   : > { %13066 = vmatprep.mubr.f32.mxu0 %v19201_v15  ;;  %12814 = vmatmul.mubr.f32.vlgmr.msra.gmra.mxu1 %v20062_v60  ;;  %v13914_v60 = vand.u32 4294901760, %v13913_v47  ;;  %v13920_v63 = vand.u32 4294901760, %v13919_v36 }
 0x33a   : > { %13069 = vmatmul.mubr.f32.vlgmr.msra.gmra.mxu0 %v20065_v45  ;;  %12957 = vmatpush1.msra.mxu1 %v12956_v23  ;;  %v14382_v11 = vsub.f32 %v13798_v1, %v19508_v7 }
 0x33b   : > { %13188 = vmatpush1.msra.mxu0 %v12954_v40  ;;  %13106 = vmatprep.subr.mxu1 %v19420_v4  ;;  %v14751_v40 = vpop.permute.xlu0 %14750 }
 0x33c   : > { %13334 = vmatprep.subr.mxu0 %v19446_v24  ;;  %12990 = vmatprep.mubr.f32.mxu1 %v19201_v15  ;;  %v14383_v61 = vand.u32 4294901760, %v14382_v11  ;;  %v14756_v58 = vsel %vm6043_vm7, %v19510_v18, %v14751_v40 }
 0x33d   : > { %13221 = vmatprep.mubr.f32.mxu0 %v19201_v15  ;;  %12992 = vmatmul.mubr.f32.vlgmr.msra.gmra.mxu1 %v20066_v20  ;;  %v14762_v23 = vsel %vm259_vm2, %v14756_v58, 0 }
 0x33e   : > { %13223 = vmatmul.mubr.f32.vlgmr.msra.gmra.mxu0 %v20066_v20  ;;  %13108 = vmatpush1.msra.mxu1 %v19428_v46  ;;  %v14384_v25 = vsub.f32 %v14382_v11, %v14383_v61  ;;  %v19570_v49 = vand.u32 4294901760, %v14762_v23 }
 0x33f   : > { %13336 = vmatpush1.msra.mxu0 %v19454_v3  ;;  %13260 = vmatprep.subr.mxu1 %v19420_v4  ;;  %v14755_v4 = vsel %vm6043_vm7, %v14747_v43, %v19510_v18 }
 0x340   : > { %13495 = vmatprep.subr.mxu0 %v13412_v55  ;;  %13141 = vmatprep.mubr.f32.mxu1 %v19201_v15  ;;  %v14760_v28 = vsel %vm259_vm2, %v14755_v4, 0  ;;  %v15346_v29 = vsub.f32 %v14762_v23, %v19570_v49 }
 0x341   : > { %13369 = vmatprep.mubr.f32.mxu0 %v19201_v15  ;;  %13145 = vmatmul.mubr.f32.vlgmr.msra.gmra.mxu1 %v20067_v8  ;;  %v19532_v39 = vand.u32 4294901760, %v14760_v28 }
 0x342   : > { %13375 = vmatmul.mubr.f32.vlgmr.msra.gmra.mxu0 %v20064_v41  ;;  %13262 = vmatpush1.msra.mxu1 %v19428_v46  ;;  %v14377_v46 = vand.u32 4294901760, %v14376_v51  ;;  %v14881_v41 = vsub.f32 %v14758_v48, %v19539_v2  ;;  %v15347_v13 = vand.u32 4294901760, %v15346_v29 }
 0x343   : > { %13498 = vmatpush1.msra.mxu0 %v13418_v44  ;;  %13416 = vmatprep.subr.mxu1 %v13415_v38  ;;  %v14875_v57 = vsub.f32 %v14760_v28, %v19532_v39 }
 0x344   : > { %13649 = vmatprep.subr.mxu0 %v13413_v42  ;;  %13295 = vmatprep.mubr.f32.mxu1 %v19201_v15  ;;  %v14378_v31 = vsub.f32 %v14376_v51, %v14377_v46  ;;  %v14882_v34 = vand.u32 4294901760, %v14881_v41  ;;  %v15348_v1 = vsub.f32 %v15346_v29, %v15347_v13 }
 0x345   : > { %13531 = vmatprep.mubr.f32.mxu0 %v19201_v15  ;;  %13297 = vmatmul.mubr.f32.vlgmr.msra.gmra.mxu1 %v20066_v20  ;;  %v14876_v55 = vand.u32 4294901760, %v14875_v57 }
 0x346   : > { %13534 = vmatmul.mubr.f32.vlgmr.msra.gmra.mxu0 %v20065_v45  ;;  %13422 = vmatpush1.msra.mxu1 %v13421_v6  ;;  %v14379_v0 = vand.u32 4294901760, %v14378_v31  ;;  %v15711_v45 = vpop.permute.xlu0 %15710  ;;  %v14883_v37 = vsub.f32 %v14881_v41, %v14882_v34 }
 0x347   : > { %13653 = vmatpush1.msra.mxu0 %v13419_v26  ;;  %13571 = vmatprep.subr.mxu1 %v19446_v24  ;;  %v14877_v42 = vsub.f32 %v14875_v57, %v14876_v55 }
 0x348   : > { %13833 = vmatprep.subr.mxu0 %v19472_v53  ;;  %13455 = vmatprep.mubr.f32.mxu1 %v19201_v15  ;;  %v14884_v32 = vand.u32 4294901760, %v14883_v37 }
 0x349   : > { %13686 = vmatprep.mubr.f32.mxu0 %v19201_v15  ;;  %13457 = vmatmul.mubr.f32.vlgmr.msra.gmra.mxu1 %v20066_v20  ;;  %v14878_v5 = vand.u32 4294901760, %v14877_v42  ;;  %v20079_v42 = vld [vmem:[#allocation39_spill] sm:$0xff] }
 0x34a   : > { %13688 = vmatmul.mubr.f32.vlgmr.msra.gmra.mxu0 %v20066_v20  ;;  %13573 = vmatpush1.msra.mxu1 %v19454_v3 }
 0x34b   : > { %13835 = vmatpush1.msra.mxu0 %v19480_v22  ;;  %13725 = vmatprep.subr.mxu1 %v19446_v24  ;;  %v20071_v24 = vld [vmem:[#allocation31_spill] sm:$0xff] }
 0x34c   : > { %13994 = vmatprep.subr.mxu0 %v13911_v50  ;;  %13606 = vmatprep.mubr.f32.mxu1 %v19201_v15  ;;  %v20073_v50 = vld [vmem:[#allocation34_spill] sm:$0xff] }
 0x34d   : > { %13868 = vmatprep.mubr.f32.mxu0 %v19201_v15  ;;  %13610 = vmatmul.mubr.f32.vlgmr.msra.gmra.mxu1 %v20067_v8 }
 0x34e   : > { %13874 = vmatmul.mubr.f32.vlgmr.msra.gmra.mxu0 %v20068_v59  ;;  %13727 = vmatpush1.msra.mxu1 %v19454_v3  ;;  %v14757_v3 = vsel %vm6043_vm7, %v14751_v40, %v14753_v27 }
 0x34f   : > { %13997 = vmatpush1.msra.mxu0 %v13917_v54  ;;  %13915 = vmatprep.subr.mxu1 %v13914_v60  ;;  %v14764_v35 = vsel %vm259_vm2, %v14757_v3, 0 }
 0x350   : > { %14148 = vmatprep.subr.mxu0 %v13912_v16  ;;  %13760 = vmatprep.mubr.f32.mxu1 %v19201_v15  ;;  %v19563_v44 = vand.u32 4294901760, %v14764_v35  ;;  %v20074_v16 = vld [vmem:[#allocation33_spill] sm:$0xff] }
 0x351   : > { %14030 = vmatprep.mubr.f32.mxu0 %v19201_v15  ;;  %13762 = vmatmul.mubr.f32.vlgmr.msra.gmra.mxu1 %v20066_v20  ;;  %v15713_v20 = vpop.permute.xlu1 %15712 }
 0x352   : > { %14033 = vmatmul.mubr.f32.vlgmr.msra.gmra.mxu0 %v20069_v12  ;;  %13921 = vmatpush1.msra.mxu1 %v13920_v63  ;;  %v15340_v26 = vsub.f32 %v14764_v35, %v19563_v44  ;;  %v15719_v21 = vsel %vm7011_vm8, %v15711_v45, %v15713_v20 }
 0x353   : > { %14152 = vmatpush1.msra.mxu0 %v13918_v9  ;;  %14070 = vmatprep.subr.mxu1 %v19472_v53  ;;  %v15724_v38 = vsel %vm259_vm2, %v15719_v21, 0 }
 0x354   : > { %14298 = vmatprep.subr.mxu0 %v19501_v30  ;;  %13954 = vmatprep.mubr.f32.mxu1 %v19201_v15  ;;  %v15341_v8 = vand.u32 4294901760, %v15340_v26  ;;  %v19590_v54 = vand.u32 4294901760, %v15724_v38 }
 0x355   : > { %14185 = vmatprep.mubr.f32.mxu0 %v19201_v15  ;;  %13956 = vmatmul.mubr.f32.vlgmr.msra.gmra.mxu1 %v20070_v10 }
 0x356   : > { %14187 = vmatmul.mubr.f32.vlgmr.msra.gmra.mxu0 %v20070_v10  ;;  %14072 = vmatpush1.msra.mxu1 %v19480_v22  ;;  %v15342_v52 = vsub.f32 %v15340_v26, %v15341_v8  ;;  %v15839_v43 = vsub.f32 %v15724_v38, %v19590_v54 }
 0x357   : > { %14300 = vmatpush1.msra.mxu0 %v19508_v7  ;;  %14224 = vmatprep.subr.mxu1 %v19472_v53  ;;  %v20072_v53 = vld [vmem:[#allocation36_spill] sm:$0xff] }
 0x358   : > { %14459 = vmatprep.subr.mxu0 %v14376_v51  ;;  %14105 = vmatprep.mubr.f32.mxu1 %v19201_v15  ;;  %v15343_v47 = vand.u32 4294901760, %v15342_v52  ;;  %v15349_v51 = vand.u32 4294901760, %v15348_v1 }
 0x359   : > { %14333 = vmatprep.mubr.f32.mxu0 %v19201_v15  ;;  %14109 = vmatmul.mubr.f32.vlgmr.msra.gmra.mxu1 %v20071_v24  ;;  %v14385_v15 = vand.u32 4294901760, %v14384_v25 }
 0x35a   : > { %14339 = vmatmul.mubr.f32.vlgmr.msra.gmra.mxu0 %v20068_v59  ;;  %14226 = vmatpush1.msra.mxu1 %v19480_v22  ;;  %v15709_v22 = vpop.permute.xlu0 %15708  ;;  %v15840_v59 = vand.u32 4294901760, %v15839_v43 }
 0x35b   : > { %14462 = vmatpush1.msra.mxu0 %v14382_v11  ;;  %14380 = vmatprep.subr.mxu1 %v14379_v0  ;;  %v15718_v56 = vsel %vm7011_vm8, %v15709_v22, %v15711_v45 }
 0x35c   : > { %14613 = vmatprep.subr.mxu0 %v14377_v46  ;;  %14259 = vmatprep.mubr.f32.mxu1 %v19549_v62  ;;  %v15722_v6 = vsel %vm259_vm2, %v15718_v56, 0  ;;  %v15841_v46 = vsub.f32 %v15839_v43, %v15840_v59 }
 0x35d   : > { %14495 = vmatprep.mubr.f32.mxu0 %v19549_v62  ;;  %14261 = vmatmul.mubr.f32.vlgmr.msra.gmra.mxu1 %v20070_v10  ;;  %v19598_v33 = vand.u32 4294901760, %v15722_v6 }
 0x35e   : > { %14498 = vmatmul.mubr.f32.vlgmr.msra.gmra.mxu0 %v20069_v12  ;;  %14386 = vmatpush1.msra.mxu1 %v14385_v15  ;;  %v15717_v9 = vpop.permute.xlu0 %15716 }
 0x35f   : > { %14617 = vmatpush1.msra.mxu0 %v14383_v61  ;;  %14535 = vmatprep.subr.mxu1 %v19501_v30  ;;  %v15845_v36 = vsub.f32 %v15722_v6, %v19598_v33 }
 0x360   : > { %14797 = vmatprep.subr.mxu0 %v19532_v39  ;;  %14419 = vmatprep.mubr.f32.mxu1 %v19549_v62 }
 0x361   : > { %14650 = vmatprep.mubr.f32.mxu0 %v19549_v62  ;;  %14421 = vmatmul.mubr.f32.vlgmr.msra.gmra.mxu1 %v20070_v10  ;;  %v15846_v4 = vand.u32 4294901760, %v15845_v36 }
 0x362   : > { %14652 = vmatmul.mubr.f32.vlgmr.msra.gmra.mxu0 %v20070_v10  ;;  %14537 = vmatpush1.msra.mxu1 %v19508_v7  ;;  %v19628_v28 = vpop.permute.xlu0 %16676 }
 0x363   : > { %14799 = vmatpush1.msra.mxu0 %v19539_v2  ;;  %14689 = vmatprep.subr.mxu1 %v19501_v30  ;;  %v20075_v30 = vld [vmem:[#allocation35_spill] sm:$0xff]  ;;  %v15847_v61 = vsub.f32 %v15845_v36, %v15846_v4 }
 0x364   : > { %14958 = vmatprep.subr.mxu0 %v14875_v57  ;;  %14570 = vmatprep.mubr.f32.mxu1 %v19549_v62  ;;  %v20077_v57 = vld [vmem:[#allocation38_spill] sm:$0xff] }
 0x365   : > { %14832 = vmatprep.mubr.f32.mxu0 %v19549_v62  ;;  %14574 = vmatmul.mubr.f32.vlgmr.msra.gmra.mxu1 %v20071_v24  ;;  %v15848_v25 = vand.u32 4294901760, %v15847_v61  ;;  %v20082_v61 = vld [vmem:[#allocation41_spill] sm:$0xff] }
 0x366   : > { %14838 = vmatmul.mubr.f32.vlgmr.msra.gmra.mxu0 %v20072_v53  ;;  %14691 = vmatpush1.msra.mxu1 %v19508_v7  ;;  %v15715_v7 = vpop.permute.xlu1 %15714 }
 0x367   : > { %14961 = vmatpush1.msra.mxu0 %v14881_v41  ;;  %14879 = vmatprep.subr.mxu1 %v14878_v5  ;;  %v15721_v18 = vsel %vm7011_vm8, %v15715_v7, %v15717_v9  ;;  %v15720_v60 = vsel %vm7011_vm8, %v15713_v20, %v15715_v7 }
 0x368   : > { %15112 = vmatprep.subr.mxu0 %v14876_v55  ;;  %14724 = vmatprep.mubr.f32.mxu1 %v19549_v62  ;;  %v15728_v19 = vsel %vm259_vm2, %v15721_v18, 0  ;;  %v15726_v11 = vsel %vm259_vm2, %v15720_v60, 0  ;;  %v20078_v55 = vld [vmem:[#allocation37_spill] sm:$0xff] }
 0x369   : > { %14994 = vmatprep.mubr.f32.mxu0 %v19549_v62  ;;  %14726 = vmatmul.mubr.f32.vlgmr.msra.gmra.mxu1 %v20070_v10  ;;  %v19619_v12 = vand.u32 4294901760, %v15728_v19  ;;  %v19626_v14 = vand.u32 4294901760, %v15726_v11  ;;  %v15842_v10 = vand.u32 4294901760, %v15841_v46 }
 0x36a   : > { %14997 = vmatmul.mubr.f32.vlgmr.msra.gmra.mxu0 %v20073_v50  ;;  %14885 = vmatpush1.msra.mxu1 %v14884_v32  ;;  %v16675_v63 = vpop.permute.xlu1 %16674 }
 0x36b   : > { %15116 = vmatpush1.msra.mxu0 %v14882_v34  ;;  %15034 = vmatprep.subr.mxu1 %v19532_v39  ;;  %v16304_v48 = vsub.f32 %v15728_v19, %v19619_v12  ;;  %v16310_v40 = vsub.f32 %v15726_v11, %v19626_v14  ;;  %v16679_v34 = vpop.permute.xlu0 %16678 }
 0x36c   : > { %15262 = vmatprep.subr.mxu0 %v19563_v44  ;;  %14918 = vmatprep.mubr.f32.mxu1 %v19549_v62  ;;  %v16684_v21 = vsel %vm7979_vm9, %v19628_v28, %v16679_v34 }
 0x36d   : > { %15149 = vmatprep.mubr.f32.mxu0 %v19549_v62  ;;  %14920 = vmatmul.mubr.f32.vlgmr.msra.gmra.mxu1 %v20074_v16  ;;  %v16305_v24 = vand.u32 4294901760, %v16304_v48  ;;  %v16311_v3 = vand.u32 4294901760, %v16310_v40 }
 0x36e   : > { %15151 = vmatmul.mubr.f32.vlgmr.msra.gmra.mxu0 %v20074_v16  ;;  %15036 = vmatpush1.msra.mxu1 %v19539_v2  ;;  %v16673_v31 = vpop.permute.xlu1 %16672 }
 0x36f   : > { %15264 = vmatpush1.msra.mxu0 %v19570_v49  ;;  %15188 = vmatprep.subr.mxu1 %v19532_v39  ;;  %v20076_v39 = vld [vmem:[#allocation40_spill] sm:$0xff]  ;;  %v16682_v0 = vsel %vm7979_vm9, %v16673_v31, %v16675_v63  ;;  %v16306_v58 = vsub.f32 %v16304_v48, %v16305_v24 }
 0x370   : > { %15423 = vmatprep.subr.mxu0 %v15340_v26  ;;  %15069 = vmatprep.mubr.f32.mxu1 %v19549_v62  ;;  %v16686_v41 = vsel %vm259_vm2, %v16682_v0, 0 }
 0x371   : > { %15297 = vmatprep.mubr.f32.mxu0 %v19549_v62  ;;  %15073 = vmatmul.mubr.f32.vlgmr.msra.gmra.mxu1 %v20075_v30  ;;  %v19657_v35 = vand.u32 4294901760, %v16686_v41 }
 0x372   : > { %15303 = vmatmul.mubr.f32.vlgmr.msra.gmra.mxu0 %v20072_v53  ;;  %15190 = vmatpush1.msra.mxu1 %v19539_v2  ;;  %v16683_v2 = vsel %vm7979_vm9, %v16675_v63, %v19628_v28  ;;  %v16681_v23 = vpop.permute.xlu1 %16680 }
 0x373   : > { %15426 = vmatpush1.msra.mxu0 %v15346_v29  ;;  %15344 = vmatprep.subr.mxu1 %v15343_v47  ;;  %v16688_v27 = vsel %vm259_vm2, %v16683_v2, 0  ;;  %v16685_v37 = vsel %vm7979_vm9, %v16679_v34, %v16681_v23  ;;  %v16809_v26 = vsub.f32 %v16686_v41, %v19657_v35 }
 0x374   : > { %15577 = vmatprep.subr.mxu0 %v15341_v8  ;;  %15223 = vmatprep.mubr.f32.mxu1 %v19549_v62  ;;  %v19650_v15 = vand.u32 4294901760, %v16688_v27  ;;  %v16692_v22 = vsel %vm259_vm2, %v16685_v37, 0  ;;  %v16690_v8 = vsel %vm259_vm2, %v16684_v21, 0 }
 0x375   : > { %15459 = vmatprep.mubr.f32.mxu0 %v19549_v62  ;;  %15225 = vmatmul.mubr.f32.vlgmr.msra.gmra.mxu1 %v20074_v16  ;;  %v16810_v32 = vand.u32 4294901760, %v16809_v26  ;;  %v19679_v38 = vand.u32 4294901760, %v16692_v22 }
 0x376   : > { %15462 = vmatmul.mubr.f32.vlgmr.msra.gmra.mxu0 %v20073_v50  ;;  %15350 = vmatpush1.msra.mxu1 %v15349_v51  ;;  %v16803_v45 = vsub.f32 %v16688_v27, %v19650_v15 }
 0x377   : > { %15581 = vmatpush1.msra.mxu0 %v15347_v13  ;;  %15499 = vmatprep.subr.mxu1 %v19563_v44  ;;  %v16811_v6 = vsub.f32 %v16809_v26, %v16810_v32  ;;  %v17268_v52 = vsub.f32 %v16692_v22, %v19679_v38 }
 0x378   : > { %15761 = vmatprep.subr.mxu0 %v19590_v54  ;;  %15383 = vmatprep.mubr.f32.mxu1 %v19549_v62  ;;  %v16804_v20 = vand.u32 4294901760, %v16803_v45 }
 0x379   : > { %15614 = vmatprep.mubr.f32.mxu0 %v19549_v62  ;;  %15385 = vmatmul.mubr.f32.vlgmr.msra.gmra.mxu1 %v20074_v16 }
 0x37a   : > { %15616 = vmatmul.mubr.f32.vlgmr.msra.gmra.mxu0 %v20074_v16  ;;  %15501 = vmatpush1.msra.mxu1 %v19570_v49  ;;  %v16805_v56 = vsub.f32 %v16803_v45, %v16804_v20 }
 0x37b   : > { %15763 = vmatpush1.msra.mxu0 %v19598_v33  ;;  %15653 = vmatprep.subr.mxu1 %v19563_v44  ;;  %v16312_v44 = vsub.f32 %v16310_v40, %v16311_v3 }
 0x37c   : > { %15922 = vmatprep.subr.mxu0 %v15839_v43  ;;  %15534 = vmatprep.mubr.f32.mxu1 %v19549_v62  ;;  %v16806_v9 = vand.u32 4294901760, %v16805_v56 }
 0x37d   : > { %15796 = vmatprep.mubr.f32.mxu0 %v19549_v62  ;;  %15538 = vmatmul.mubr.f32.vlgmr.msra.gmra.mxu1 %v20075_v30  ;;  %v16313_v53 = vand.u32 4294901760, %v16312_v44 }
 0x37e   : > { %15802 = vmatmul.mubr.f32.vlgmr.msra.gmra.mxu0 %v20076_v39  ;;  %15655 = vmatpush1.msra.mxu1 %v19570_v49  ;;  %v16307_v49 = vand.u32 4294901760, %v16306_v58 }
 0x37f   : > { %15925 = vmatpush1.msra.mxu0 %v15845_v36  ;;  %15843 = vmatprep.subr.mxu1 %v15842_v10  ;;  %v16812_v36 = vand.u32 4294901760, %v16811_v6 }
 0x380   : > { %16076 = vmatprep.subr.mxu0 %v15840_v59  ;;  %15688 = vmatprep.mubr.f32.mxu1 %v19549_v62  ;;  %v20081_v59 = vld [vmem:[#allocation42_spill] sm:$0xff] }
 0x381   : > { %15958 = vmatprep.mubr.f32.mxu0 %v19549_v62  ;;  %15690 = vmatmul.mubr.f32.vlgmr.msra.gmra.mxu1 %v20074_v16 }
 0x382   : > { %15961 = vmatmul.mubr.f32.vlgmr.msra.gmra.mxu0 %v20077_v57  ;;  %15849 = vmatpush1.msra.mxu1 %v15848_v25 }
 0x383   : > { %16080 = vmatpush1.msra.mxu0 %v15846_v4  ;;  %15998 = vmatprep.subr.mxu1 %v19590_v54  ;;  %v17269_v4 = vand.u32 4294901760, %v17268_v52 }
 0x384   : > { %16226 = vmatprep.subr.mxu0 %v19619_v12  ;;  %15882 = vmatprep.mubr.f32.mxu1 %v19549_v62 }
 0x385   : > { %16113 = vmatprep.mubr.f32.mxu0 %v19549_v62  ;;  %15884 = vmatmul.mubr.f32.vlgmr.msra.gmra.mxu1 %v20078_v55 }
 0x386   : > { %16115 = vmatmul.mubr.f32.vlgmr.msra.gmra.mxu0 %v20078_v55  ;;  %16000 = vmatpush1.msra.mxu1 %v19598_v33 }
 0x387   : > { %16228 = vmatpush1.msra.mxu0 %v19626_v14  ;;  %16152 = vmatprep.subr.mxu1 %v19590_v54  ;;  %v19686_v54 = vand.u32 4294901760, %v16690_v8 }
 0x388   : > { %16387 = vmatprep.subr.mxu0 %v16304_v48  ;;  %16033 = vmatprep.mubr.f32.mxu1 %v19549_v62  ;;  %v17270_v48 = vsub.f32 %v17268_v52, %v17269_v4 }
 0x389   : > { %16261 = vmatprep.mubr.f32.mxu0 %v19549_v62  ;;  %16037 = vmatmul.mubr.f32.vlgmr.msra.gmra.mxu1 %v20079_v42  ;;  %v17274_v18 = vsub.f32 %v16690_v8, %v19686_v54 }
 0x38a   : > { %16267 = vmatmul.mubr.f32.vlgmr.msra.gmra.mxu0 %v20076_v39  ;;  %16154 = vmatpush1.msra.mxu1 %v19598_v33  ;;  %v20080_v33 = vld [vmem:[#allocation44_spill] sm:$0xff] }
 0x38b   : > { %16390 = vmatpush1.msra.mxu0 %v16310_v40  ;;  %16308 = vmatprep.subr.mxu1 %v16307_v49 }
 0x38c   : > { %16541 = vmatprep.subr.mxu0 %v16305_v24  ;;  %16187 = vmatprep.mubr.f32.mxu1 %v19549_v62  ;;  %v17271_v24 = vand.u32 4294901760, %v17270_v48 }
 0x38d   : > { %16423 = vmatprep.mubr.f32.mxu0 %v19549_v62  ;;  %v9071_v5 = vpop.f32.mrf.mxu0  ;;  %16189 = vmatmul.mubr.f32.vlgmr.msra.gmra.mxu1 %v20078_v55 }
 0x38e   : > { %16426 = vmatmul.mubr.f32.vlgmr.msra.gmra.mxu0 %v20077_v57  ;;  %16314 = vmatpush1.msra.mxu1 %v16313_v53  ;;  %v20083_v57 = vld [vmem:[#allocation43_spill] sm:$0xff] }
 0x38f   : > { %16545 = vmatpush1.msra.mxu0 %v16311_v3  ;;  %v9073_v29 = vpop.f32.mrf.mxu0  ;;  %16463 = vmatprep.subr.mxu1 %v19619_v12 }
 0x390   : > { %16725 = vmatprep.subr.mxu0 %v19650_v15  ;;  %16347 = vmatprep.mubr.f32.mxu1 %v19549_v62 }
 0x391   : > { %16578 = vmatprep.mubr.f32.mxu0 %v19549_v62  ;;  %v9230_v50 = vpop.f32.mrf.mxu0  ;;  %16349 = vmatmul.mubr.f32.vlgmr.msra.gmra.mxu1 %v20078_v55 }
 0x392   : > { %16580 = vmatmul.mubr.f32.vlgmr.msra.gmra.mxu0 %v20078_v55  ;;  %16465 = vmatpush1.msra.mxu1 %v19626_v14 }
 0x393   : > { %16727 = vmatpush1.msra.mxu0 %v19657_v35  ;;  %v9232_v13 = vpop.f32.mrf.mxu0  ;;  %16617 = vmatprep.subr.mxu1 %v19619_v12 }
 0x394   : > { %16886 = vmatprep.subr.mxu0 %v16803_v45  ;;  %16498 = vmatprep.mubr.f32.mxu1 %v19549_v62 }
 0x395   : > { %16760 = vmatprep.mubr.f32.mxu0 %v19549_v62  ;;  %v9153_v16 = vpop.f32.mrf.mxu1  ;;  %16502 = vmatmul.mubr.f32.vlgmr.msra.gmra.mxu1 %v20079_v42 }
 0x396   : > { %16766 = vmatmul.mubr.f32.vlgmr.msra.gmra.mxu0 %v20080_v33  ;;  %v9154_v1 = vadd.f32 %v9153_v16, %v9071_v5  ;;  %16619 = vmatpush1.msra.mxu1 %v19626_v14  ;;  %v9384_v30 = vpop.f32.mrf.mxu0  ;;  %v17275_v14 = vand.u32 4294901760, %v17274_v18 }
 0x397   : > { %16889 = vmatpush1.msra.mxu0 %v16809_v26  ;;  %v9155_v43 = vpop.f32.mrf.mxu1  ;;  %16807 = vmatprep.subr.mxu1 %v16806_v9 }
 0x398   : > { %17040 = vmatprep.subr.mxu0 %v16804_v20  ;;  %v9156_v47 = vadd.f32 %v9155_v43, %v9073_v29  ;;  %v9231_v7 = vadd.f32 %v9230_v50, %v9154_v1  ;;  %16652 = vmatprep.mubr.f32.mxu1 %v19549_v62  ;;  %v9386_v63 = vpop.f32.mrf.mxu0  ;;  %v17276_v40 = vsub.f32 %v17274_v18, %v17275_v14 }
 0x399   : > { %16922 = vmatprep.mubr.f32.mxu0 %v19549_v62  ;;  %v9306_v51 = vpop.f32.mrf.mxu1  ;;  %16654 = vmatmul.mubr.f32.vlgmr.msra.gmra.mxu1 %v20078_v55 }
 0x39a   : > { %16925 = vmatmul.mubr.f32.vlgmr.msra.gmra.mxu0 %v20081_v59  ;;  %v9233_v60 = vadd.f32 %v9232_v13, %v9156_v47  ;;  %v9307_v19 = vadd.f32 %v9306_v51, %v9231_v7  ;;  %16813 = vmatpush1.msra.mxu1 %v16812_v36  ;;  %v17277_v27 = vand.u32 4294901760, %v17276_v40 }
 0x39b   : > { %17044 = vmatpush1.msra.mxu0 %v16810_v32  ;;  %v9308_v11 = vpop.f32.mrf.mxu1  ;;  %16962 = vmatprep.subr.mxu1 %v19650_v15 }
 0x39c   : > { %17190 = vmatprep.subr.mxu0 %v19679_v38  ;;  %v9309_v12 = vadd.f32 %v9308_v11, %v9233_v60  ;;  %v9385_v46 = vadd.f32 %v9384_v30, %v9307_v19  ;;  %16846 = vmatprep.mubr.f32.mxu1 %v19549_v62 }
 0x39d   : > { %17077 = vmatprep.mubr.f32.mxu0 %v19549_v62  ;;  %v9458_v28 = vpop.f32.mrf.mxu1  ;;  %16848 = vmatmul.mubr.f32.vlgmr.msra.gmra.mxu1 %v20082_v61 }
 0x39e   : > { %17079 = vmatmul.mubr.f32.vlgmr.msra.gmra.mxu0 %v20082_v61  ;;  %v9387_v39 = vadd.f32 %v9386_v63, %v9309_v12  ;;  %v19705_v10 = vadd.f32 %v9458_v28, %v9385_v46  ;;  %16964 = vmatpush1.msra.mxu1 %v19657_v35 }
 0x39f   : > { %17192 = vmatpush1.msra.mxu0 %v19686_v54  ;;  %v9460_v31 = vpop.f32.mrf.mxu1  ;;  %17116 = vmatprep.subr.mxu1 %v19650_v15 }
 0x3a0   : > { %17351 = vmatprep.subr.mxu0 %v17268_v52  ;;  %v19710_v2 = vadd.f32 %v9460_v31, %v9387_v39  ;;  %16997 = vmatprep.mubr.f32.mxu1 %v19549_v62 }
 0x3a1   : > { %17225 = vmatprep.mubr.f32.mxu0 %v19549_v62  ;;  %v9536_v25 = vpop.f32.mrf.mxu0  ;;  %17001 = vmatmul.mubr.f32.vlgmr.msra.gmra.mxu1 %v20083_v57 }
 0x3a2   : > { %17231 = vmatmul.mubr.f32.vlgmr.msra.gmra.mxu0 %v20080_v33  ;;  %17118 = vmatpush1.msra.mxu1 %v19657_v35  ;;  %v9929_v63 = vadd.f32 %v19710_v2, %v20002_v17 }
 0x3a3   : > { %17354 = vmatpush1.msra.mxu0 %v17274_v18  ;;  %v9538_v0 = vpop.f32.mrf.mxu0  ;;  %17272 = vmatprep.subr.mxu1 %v17271_v24 }
 0x3a4   : > { %17505 = vmatprep.subr.mxu0 %v17269_v4  ;;  %17151 = vmatprep.mubr.f32.mxu1 %v19549_v62 }
 0x3a5   : > { %17387 = vmatprep.mubr.f32.mxu0 %v19549_v62  ;;  %v9695_v3 = vpop.f32.mrf.mxu0  ;;  %17153 = vmatmul.mubr.f32.vlgmr.msra.gmra.mxu1 %v20082_v61 }
 0x3a6   : > { %17390 = vmatmul.mubr.f32.vlgmr.msra.gmra.mxu0 %v20081_v59  ;;  %17278 = vmatpush1.msra.mxu1 %v17277_v27  ;;  %v9928_v59 = vadd.f32 %v19705_v10, %v20002_v17 }
 0x3a7   : > { %17509 = vmatpush1.msra.mxu0 %v17275_v14  ;;  %v9697_v41 = vpop.f32.mrf.mxu0  ;;  %17427 = vmatprep.subr.mxu1 %v19679_v38 }
 0x3a8   : > { %17311 = vmatprep.mubr.f32.mxu1 %v19549_v62  ;;  %17542 = vmatprep.mubr.f32.mxu0 %v19549_v62 }
 0x3a9   : > { %v9849_v15 = vpop.f32.mrf.mxu0  ;;  %v9618_v55 = vpop.f32.mrf.mxu1  ;;  %17313 = vmatmul.mubr.f32.vlgmr.msra.gmra.mxu1 %v20082_v61 }
 0x3aa   : > { %17544 = vmatmul.mubr.f32.vlgmr.msra.gmra.mxu0 %v20082_v61  ;;  %v9619_v58 = vadd.f32 %v9618_v55, %v9536_v25  ;;  %17429 = vmatpush1.msra.mxu1 %v19686_v54 }
 0x3ab   : > { %17462 = vmatprep.mubr.f32.mxu1 %v19549_v62  ;;  %v9851_v35 = vpop.f32.mrf.mxu0  ;;  %17581 = vmatprep.subr.mxu1 %v19679_v38  ;;  %v9620_v34 = vpop.f32.mrf.mxu1 }
 0x3ac   : > { %v9621_v23 = vadd.f32 %v9620_v34, %v9538_v0  ;;  %v9696_v44 = vadd.f32 %v9695_v3, %v9619_v58 }
 0x3ad   : > { %v9771_v45 = vpop.f32.mrf.mxu1  ;;  %17466 = vmatmul.mubr.f32.vlgmr.msra.gmra.mxu1 %v20083_v57 }
 0x3ae   : > { %v10035_v42 = vpop.f32.mrf.mxu0  ;;  %v9698_v49 = vadd.f32 %v9697_v41, %v9621_v23  ;;  %v9772_v37 = vadd.f32 %v9771_v45, %v9696_v44  ;;  %17583 = vmatpush1.msra.mxu1 %v19686_v54  ;;  %17616 = vmatprep.mubr.f32.mxu1 %v19549_v62 }
 0x3af   : > { %v9773_v26 = vpop.f32.mrf.mxu1 }
 0x3b0   : > { %v10037_v53 = vpop.f32.mrf.mxu0  ;;  %v9774_v5 = vadd.f32 %v9773_v26, %v9698_v49  ;;  %v9850_v20 = vadd.f32 %v9849_v15, %v9772_v37 }
 0x3b1   : > { %v9923_v21 = vpop.f32.mrf.mxu1  ;;  %17618 = vmatmul.mubr.f32.vlgmr.msra.gmra.mxu1 %v20082_v61 }
 0x3b2   : > { %v10194_v22 = vpop.f32.mrf.mxu0  ;;  %v9852_v29 = vadd.f32 %v9851_v35, %v9774_v5  ;;  %v9924_v32 = vadd.f32 %v9923_v21, %v9850_v20 }
 0x3b3   : > { %v9925_v50 = vpop.f32.mrf.mxu1 }
 0x3b4   : > { %v10196_v8 = vpop.f32.mrf.mxu0  ;;  %v9926_v38 = vadd.f32 %v9925_v50, %v9852_v29  ;;  %v9930_v58 = vadd.f32 %v9924_v32, %v20002_v17 }
 0x3b5   : > { %v10117_v56 = vpop.f32.mrf.mxu1 }
 0x3b6   : > { %v10348_v13 = vpop.f32.mrf.mxu0  ;;  %v10118_v6 = vadd.f32 %v10117_v56, %v10035_v42  ;;  %v9931_v45 = vadd.f32 %v9926_v38, %v20002_v17 }
 0x3b7   : > { %v10119_v16 = vpop.f32.mrf.mxu1 }
 0x3b8   : > { %v10350_v54 = vpop.f32.mrf.mxu0  ;;  %v10120_v52 = vadd.f32 %v10119_v16, %v10037_v53  ;;  %v10195_v62 = vadd.f32 %v10194_v22, %v10118_v6 }
 0x3b9   : > { %v10270_v33 = vpop.f32.mrf.mxu1 }
 0x3ba   : > { %v10500_v9 = vpop.f32.mrf.mxu0  ;;  %v10197_v1 = vadd.f32 %v10196_v8, %v10120_v52  ;;  %v10271_v43 = vadd.f32 %v10270_v33, %v10195_v62 }
 0x3bb   : > { %v10272_v30 = vpop.f32.mrf.mxu1 }
 0x3bc   : > { %v10502_v47 = vpop.f32.mrf.mxu0  ;;  %v10273_v7 = vadd.f32 %v10272_v30, %v10197_v1  ;;  %v10349_v18 = vadd.f32 %v10348_v13, %v10271_v43 }
 0x3bd   : > { %v10422_v36 = vpop.f32.mrf.mxu1 }
 0x3be   : > { %v10659_v51 = vpop.f32.mrf.mxu0  ;;  %v10351_v60 = vadd.f32 %v10350_v54, %v10273_v7  ;;  %v10423_v19 = vadd.f32 %v10422_v36, %v10349_v18 }
 0x3bf   : > { %v10424_v4 = vpop.f32.mrf.mxu1 }
 0x3c0   : > { %v10661_v11 = vpop.f32.mrf.mxu0  ;;  %v10892_v12 = vadd.f32 %v10423_v19, %v9928_v59  ;;  %v10425_v46 = vadd.f32 %v10424_v4, %v10351_v60 }
 0x3c1   : > { %v10582_v14 = vpop.f32.mrf.mxu1 }
 0x3c2   : > { %v10813_v28 = vpop.f32.mrf.mxu0  ;;  %v10893_v61 = vadd.f32 %v10425_v46, %v9929_v63  ;;  %v10583_v48 = vadd.f32 %v10582_v14, %v10500_v9 }
 0x3c3   : > { %v10584_v39 = vpop.f32.mrf.mxu1 }
 0x3c4   : > { %v10815_v31 = vpop.f32.mrf.mxu0  ;;  %v10585_v40 = vadd.f32 %v10584_v39, %v10502_v47  ;;  %v10660_v25 = vadd.f32 %v10659_v51, %v10583_v48 }
 0x3c5   : > { %v10735_v57 = vpop.f32.mrf.mxu1 }
 0x3c6   : > { %v10999_v24 = vpop.f32.mrf.mxu0  ;;  %v10662_v10 = vadd.f32 %v10661_v11, %v10585_v40  ;;  %v10736_v0 = vadd.f32 %v10735_v57, %v10660_v25 }
 0x3c7   : > { %v10737_v27 = vpop.f32.mrf.mxu1 }
 0x3c8   : > { %v11001_v3 = vpop.f32.mrf.mxu0  ;;  %v10738_v41 = vadd.f32 %v10737_v27, %v10662_v10  ;;  %v10814_v15 = vadd.f32 %v10813_v28, %v10736_v0 }
 0x3c9   : > { %v10887_v55 = vpop.f32.mrf.mxu1 }
 0x3ca   : > { %v11158_v2 = vpop.f32.mrf.mxu0  ;;  %v10816_v35 = vadd.f32 %v10815_v31, %v10738_v41  ;;  %v10888_v34 = vadd.f32 %v10887_v55, %v10814_v15 }
 0x3cb   : > { %v10889_v23 = vpop.f32.mrf.mxu1 }
 0x3cc   : > { %v11160_v44 = vpop.f32.mrf.mxu0  ;;  %v10894_v42 = vadd.f32 %v10888_v34, %v9930_v58  ;;  %v10890_v49 = vadd.f32 %v10889_v23, %v10816_v35 }
 0x3cd   : > { %v11081_v37 = vpop.f32.mrf.mxu1 }
 0x3ce   : > { %v11312_v26 = vpop.f32.mrf.mxu0  ;;  %v10895_v53 = vadd.f32 %v10890_v49, %v9931_v45  ;;  %v11082_v5 = vadd.f32 %v11081_v37, %v10999_v24 }
 0x3cf   : > { %v11083_v20 = vpop.f32.mrf.mxu1 }
 0x3d0   : > { %v11314_v21 = vpop.f32.mrf.mxu0  ;;  %v11084_v22 = vadd.f32 %v11083_v20, %v11001_v3  ;;  %v11159_v29 = vadd.f32 %v11158_v2, %v11082_v5 }
 0x3d1   : > { %v11234_v50 = vpop.f32.mrf.mxu1 }
 0x3d2   : > { %v11464_v8 = vpop.f32.mrf.mxu0  ;;  %v11161_v56 = vadd.f32 %v11160_v44, %v11084_v22  ;;  %v11235_v32 = vadd.f32 %v11234_v50, %v11159_v29 }
 0x3d3   : > { %v11236_v13 = vpop.f32.mrf.mxu1 }
 0x3d4   : > { %v11466_v6 = vpop.f32.mrf.mxu0  ;;  %v11237_v16 = vadd.f32 %v11236_v13, %v11161_v56  ;;  %v11313_v54 = vadd.f32 %v11312_v26, %v11235_v32 }
 0x3d5   : > { %v11386_v52 = vpop.f32.mrf.mxu1 }
 0x3d6   : > { %v11623_v17 = vpop.f32.mrf.mxu0  ;;  %v11315_v38 = vadd.f32 %v11314_v21, %v11237_v16  ;;  %v11387_v62 = vadd.f32 %v11386_v52, %v11313_v54 }
 0x3d7   : > { %v11388_v33 = vpop.f32.mrf.mxu1 }
 0x3d8   : > { %v11625_v9 = vpop.f32.mrf.mxu0  ;;  %v11856_v1 = vadd.f32 %v11387_v62, %v10892_v12  ;;  %v11389_v43 = vadd.f32 %v11388_v33, %v11315_v38 }
 0x3d9   : > { %v11546_v30 = vpop.f32.mrf.mxu1 }
 0x3da   : > { %v11777_v47 = vpop.f32.mrf.mxu0  ;;  %v11857_v7 = vadd.f32 %v11389_v43, %v10893_v61  ;;  %v11547_v18 = vadd.f32 %v11546_v30, %v11464_v8 }
 0x3db   : > { %v11548_v36 = vpop.f32.mrf.mxu1 }
 0x3dc   : > { %v11779_v51 = vpop.f32.mrf.mxu0  ;;  %v11549_v59 = vadd.f32 %v11548_v36, %v11466_v6  ;;  %v11624_v60 = vadd.f32 %v11623_v17, %v11547_v18 }
 0x3dd   : > { %v11699_v19 = vpop.f32.mrf.mxu1 }
 0x3de   : > { %v11963_v4 = vpop.f32.mrf.mxu0  ;;  %v11626_v11 = vadd.f32 %v11625_v9, %v11549_v59  ;;  %v11700_v63 = vadd.f32 %v11699_v19, %v11624_v60 }
 0x3df   : > { %v11701_v46 = vpop.f32.mrf.mxu1 }
 0x3e0   : > { %v11965_v14 = vpop.f32.mrf.mxu0  ;;  %v11702_v28 = vadd.f32 %v11701_v46, %v11626_v11  ;;  %v11778_v48 = vadd.f32 %v11777_v47, %v11700_v63 }
 0x3e1   : > { %v11851_v39 = vpop.f32.mrf.mxu1 }
 0x3e2   : > { %v12122_v31 = vpop.f32.mrf.mxu0  ;;  %v11780_v12 = vadd.f32 %v11779_v51, %v11702_v28  ;;  %v11852_v40 = vadd.f32 %v11851_v39, %v11778_v48 }
 0x3e3   : > { %v11853_v25 = vpop.f32.mrf.mxu1 }
 0x3e4   : > { %v12124_v57 = vpop.f32.mrf.mxu0  ;;  %v11858_v61 = vadd.f32 %v11852_v40, %v10894_v42  ;;  %v11854_v24 = vadd.f32 %v11853_v25, %v11780_v12 }
 0x3e5   : > { %v12045_v10 = vpop.f32.mrf.mxu1 }
 0x3e6   : > { %v12276_v0 = vpop.f32.mrf.mxu0  ;;  %v11859_v27 = vadd.f32 %v11854_v24, %v10895_v53  ;;  %v12046_v3 = vadd.f32 %v12045_v10, %v11963_v4 }
 0x3e7   : > { %v12047_v41 = vpop.f32.mrf.mxu1 }
 0x3e8   : > { %v12278_v15 = vpop.f32.mrf.mxu0  ;;  %v12048_v55 = vadd.f32 %v12047_v41, %v11965_v14  ;;  %v12123_v2 = vadd.f32 %v12122_v31, %v12046_v3 }
 0x3e9   : > { %v12198_v58 = vpop.f32.mrf.mxu1 }
 0x3ea   : > { %v12428_v35 = vpop.f32.mrf.mxu0  ;;  %v12125_v34 = vadd.f32 %v12124_v57, %v12048_v55  ;;  %v12199_v23 = vadd.f32 %v12198_v58, %v12123_v2 }
 0x3eb   : > { %v12200_v44 = vpop.f32.mrf.mxu1 }
 0x3ec   : > { %v12430_v45 = vpop.f32.mrf.mxu0  ;;  %v12201_v49 = vadd.f32 %v12200_v44, %v12125_v34  ;;  %v12277_v37 = vadd.f32 %v12276_v0, %v12199_v23 }
 0x3ed   : > { %v12350_v26 = vpop.f32.mrf.mxu1 }
 0x3ee   : > { %v12587_v5 = vpop.f32.mrf.mxu0  ;;  %v12279_v42 = vadd.f32 %v12278_v15, %v12201_v49  ;;  %v12351_v20 = vadd.f32 %v12350_v26, %v12277_v37 }
 0x3ef   : > { %v12352_v21 = vpop.f32.mrf.mxu1 }
 0x3f0   : > { %v12589_v22 = vpop.f32.mrf.mxu0  ;;  %v12820_v53 = vadd.f32 %v12351_v20, %v11856_v1  ;;  %v12353_v29 = vadd.f32 %v12352_v21, %v12279_v42 }
 0x3f1   : > { %v12510_v50 = vpop.f32.mrf.mxu1 }
 0x3f2   : > { %v12741_v8 = vpop.f32.mrf.mxu0  ;;  %v12821_v56 = vadd.f32 %v12353_v29, %v11857_v7  ;;  %v12511_v32 = vadd.f32 %v12510_v50, %v12428_v35 }
 0x3f3   : > { %v12512_v13 = vpop.f32.mrf.mxu1 }
 0x3f4   : > { %v12743_v6 = vpop.f32.mrf.mxu0  ;;  %v12513_v16 = vadd.f32 %v12512_v13, %v12430_v45  ;;  %v12588_v54 = vadd.f32 %v12587_v5, %v12511_v32 }
 0x3f5   : > { %v12663_v52 = vpop.f32.mrf.mxu1 }
 0x3f6   : > { %v12911_v17 = vpop.f32.mrf.mxu0  ;;  %v12590_v38 = vadd.f32 %v12589_v22, %v12513_v16  ;;  %v12664_v62 = vadd.f32 %v12663_v52, %v12588_v54 }
 0x3f7   : > { %v12665_v33 = vpop.f32.mrf.mxu1 }
 0x3f8   : > { %v12913_v9 = vpop.f32.mrf.mxu0  ;;  %v12666_v43 = vadd.f32 %v12665_v33, %v12590_v38  ;;  %v12742_v30 = vadd.f32 %v12741_v8, %v12664_v62 }
 0x3f9   : > { %v12815_v47 = vpop.f32.mrf.mxu1 }
 0x3fa   : > { %v13070_v18 = vpop.f32.mrf.mxu0  ;;  %v12744_v1 = vadd.f32 %v12743_v6, %v12666_v43  ;;  %v12816_v36 = vadd.f32 %v12815_v47, %v12742_v30 }
 0x3fb   : > { %v12817_v51 = vpop.f32.mrf.mxu1 }
 0x3fc   : > { %v13072_v59 = vpop.f32.mrf.mxu0  ;;  %v12822_v7 = vadd.f32 %v12816_v36, %v11858_v61  ;;  %v12818_v60 = vadd.f32 %v12817_v51, %v12744_v1 }
 0x3fd   : > { %v12993_v19 = vpop.f32.mrf.mxu1 }
 0x3fe   : > { %v13224_v4 = vpop.f32.mrf.mxu0  ;;  %v12823_v11 = vadd.f32 %v12818_v60, %v11859_v27  ;;  %v12994_v63 = vadd.f32 %v12993_v19, %v12911_v17 }
 0x3ff   : > { %v12995_v46 = vpop.f32.mrf.mxu1 }
 0x400   : > { %v13226_v14 = vpop.f32.mrf.mxu0  ;;  %v12996_v28 = vadd.f32 %v12995_v46, %v12913_v9  ;;  %v13071_v48 = vadd.f32 %v13070_v18, %v12994_v63 }
 0x401   : > { %v13146_v39 = vpop.f32.mrf.mxu1 }
 0x402   : > { %v13376_v31 = vpop.f32.mrf.mxu0  ;;  %v13073_v12 = vadd.f32 %v13072_v59, %v12996_v28  ;;  %v13147_v40 = vadd.f32 %v13146_v39, %v13071_v48 }
 0x403   : > { %v13148_v25 = vpop.f32.mrf.mxu1 }
 0x404   : > { %v13378_v57 = vpop.f32.mrf.mxu0  ;;  %v13149_v24 = vadd.f32 %v13148_v25, %v13073_v12  ;;  %v13225_v10 = vadd.f32 %v13224_v4, %v13147_v40 }
 0x405   : > { %v13298_v0 = vpop.f32.mrf.mxu1 }
 0x406   : > { %v13535_v3 = vpop.f32.mrf.mxu0  ;;  %v13227_v61 = vadd.f32 %v13226_v14, %v13149_v24  ;;  %v13299_v41 = vadd.f32 %v13298_v0, %v13225_v10 }
 0x407   : > { %v13300_v15 = vpop.f32.mrf.mxu1 }
 0x408   : > { %v13537_v55 = vpop.f32.mrf.mxu0  ;;  %v13768_v27 = vadd.f32 %v13299_v41, %v12820_v53  ;;  %v13301_v2 = vadd.f32 %v13300_v15, %v13227_v61 }
 0x409   : > { %v13458_v58 = vpop.f32.mrf.mxu1 }
 0x40a   : > { %v13689_v35 = vpop.f32.mrf.mxu0  ;;  %v13769_v34 = vadd.f32 %v13301_v2, %v12821_v56  ;;  %v13459_v23 = vadd.f32 %v13458_v58, %v13376_v31 }
 0x40b   : > { %v13460_v44 = vpop.f32.mrf.mxu1 }
 0x40c   : > { %v13691_v45 = vpop.f32.mrf.mxu0  ;;  %v13461_v49 = vadd.f32 %v13460_v44, %v13378_v57  ;;  %v13536_v37 = vadd.f32 %v13535_v3, %v13459_v23 }
 0x40d   : > { %v13611_v26 = vpop.f32.mrf.mxu1 }
 0x40e   : > { %v13875_v5 = vpop.f32.mrf.mxu0  ;;  %v13538_v42 = vadd.f32 %v13537_v55, %v13461_v49  ;;  %v13612_v20 = vadd.f32 %v13611_v26, %v13536_v37 }
 0x40f   : > { %v13613_v21 = vpop.f32.mrf.mxu1 }
 0x410   : > { %v13877_v22 = vpop.f32.mrf.mxu0  ;;  %v13614_v29 = vadd.f32 %v13613_v21, %v13538_v42  ;;  %v13690_v50 = vadd.f32 %v13689_v35, %v13612_v20 }
 0x411   : > { %v13763_v8 = vpop.f32.mrf.mxu1 }
 0x412   : > { %v14034_v32 = vpop.f32.mrf.mxu0  ;;  %v13692_v53 = vadd.f32 %v13691_v45, %v13614_v29  ;;  %v13764_v13 = vadd.f32 %v13763_v8, %v13690_v50 }
 0x413   : > { %v13765_v6 = vpop.f32.mrf.mxu1 }
 0x414   : > { %v14036_v16 = vpop.f32.mrf.mxu0  ;;  %v13770_v56 = vadd.f32 %v13764_v13, %v12822_v7  ;;  %v13766_v54 = vadd.f32 %v13765_v6, %v13692_v53 }
 0x415   : > { %v13957_v52 = vpop.f32.mrf.mxu1 }
 0x416   : > { %v14188_v17 = vpop.f32.mrf.mxu0  ;;  %v13771_v38 = vadd.f32 %v13766_v54, %v12823_v11  ;;  %v13958_v62 = vadd.f32 %v13957_v52, %v13875_v5 }
 0x417   : > { %v13959_v33 = vpop.f32.mrf.mxu1 }
 0x418   : > { %v14190_v9 = vpop.f32.mrf.mxu0  ;;  %v13960_v43 = vadd.f32 %v13959_v33, %v13877_v22  ;;  %v14035_v30 = vadd.f32 %v14034_v32, %v13958_v62 }
 0x419   : > { %v14110_v47 = vpop.f32.mrf.mxu1 }
 0x41a   : > { %v14340_v18 = vpop.f32.mrf.mxu0  ;;  %v14037_v1 = vadd.f32 %v14036_v16, %v13960_v43  ;;  %v14111_v36 = vadd.f32 %v14110_v47, %v14035_v30 }
 0x41b   : > { %v14112_v51 = vpop.f32.mrf.mxu1 }
 0x41c   : > { %v14342_v59 = vpop.f32.mrf.mxu0  ;;  %v14113_v60 = vadd.f32 %v14112_v51, %v14037_v1  ;;  %v14189_v19 = vadd.f32 %v14188_v17, %v14111_v36 }
 0x41d   : > { %v14262_v4 = vpop.f32.mrf.mxu1 }
 0x41e   : > { %v14499_v63 = vpop.f32.mrf.mxu0  ;;  %v14191_v7 = vadd.f32 %v14190_v9, %v14113_v60  ;;  %v14263_v46 = vadd.f32 %v14262_v4, %v14189_v19 }
 0x41f   : > { %v14264_v14 = vpop.f32.mrf.mxu1 }
 0x420   : > { %v14501_v28 = vpop.f32.mrf.mxu0  ;;  %v19739_v11 = vadd.f32 %v14263_v46, %v13768_v27  ;;  %v14265_v48 = vadd.f32 %v14264_v14, %v14191_v7 }
 0x421   : > { %v14422_v39 = vpop.f32.mrf.mxu1 }
 0x422   : > { %v14653_v31 = vpop.f32.mrf.mxu0  ;;  %v19741_v12 = vadd.f32 %v14265_v48, %v13769_v34  ;;  %v14423_v40 = vadd.f32 %v14422_v39, %v14340_v18 }
 0x423   : > { %v14424_v25 = vpop.f32.mrf.mxu1 }
 0x424   : > { %v14655_v57 = vpop.f32.mrf.mxu0  ;;  %v14425_v24 = vadd.f32 %v14424_v25, %v14342_v59  ;;  %v14500_v10 = vadd.f32 %v14499_v63, %v14423_v40 }
 0x425   : > { %v14575_v0 = vpop.f32.mrf.mxu1 }
 0x426   : > { %v14839_v3 = vpop.f32.mrf.mxu0  ;;  %v14502_v61 = vadd.f32 %v14501_v28, %v14425_v24  ;;  %v14576_v41 = vadd.f32 %v14575_v0, %v14500_v10 }
 0x427   : > { %v14577_v15 = vpop.f32.mrf.mxu1 }
 0x428   : > { %v14841_v55 = vpop.f32.mrf.mxu0  ;;  %v14578_v2 = vadd.f32 %v14577_v15, %v14502_v61  ;;  %v14654_v58 = vadd.f32 %v14653_v31, %v14576_v41 }
 0x429   : > { %v14727_v27 = vpop.f32.mrf.mxu1 }
 0x42a   : > { %v14998_v35 = vpop.f32.mrf.mxu0  ;;  %v14656_v23 = vadd.f32 %v14655_v57, %v14578_v2  ;;  %v14728_v44 = vadd.f32 %v14727_v27, %v14654_v58 }
 0x42b   : > { %v14729_v45 = vpop.f32.mrf.mxu1 }
 0x42c   : > { %v15000_v34 = vpop.f32.mrf.mxu0  ;;  %v19743_v49 = vadd.f32 %v14728_v44, %v13770_v56  ;;  %v14730_v37 = vadd.f32 %v14729_v45, %v14656_v23 }
 0x42d   : > { %v14921_v26 = vpop.f32.mrf.mxu1 }
 0x42e   : > { %v15152_v5 = vpop.f32.mrf.mxu0  ;;  %v19745_v42 = vadd.f32 %v14730_v37, %v13771_v38  ;;  %v14922_v28 = vadd.f32 %v14921_v26, %v14839_v3 }
 0x42f   : > { %v14923_v20 = vpop.f32.mrf.mxu1 }
 0x430   : > { %v15154_v21 = vpop.f32.mrf.mxu0  ;;  %v14924_v48 = vadd.f32 %v14923_v20, %v14841_v55  ;;  %v14999_v24 = vadd.f32 %v14998_v35, %v14922_v28 }
 0x431   : > { %v15074_v22 = vpop.f32.mrf.mxu1 }
 0x432   : > { %v15304_v29 = vpop.f32.mrf.mxu0  ;;  %v15001_v0 = vadd.f32 %v15000_v34, %v14924_v48  ;;  %v15075_v27 = vadd.f32 %v15074_v22, %v14999_v24 }
 0x433   : > { %v15076_v50 = vpop.f32.mrf.mxu1 }
 0x434   : > { %v15306_v8 = vpop.f32.mrf.mxu0  ;;  %v15077_v44 = vadd.f32 %v15076_v50, %v15001_v0 }
 0x435   : > { %v19747_v32 = vpop.f32.mrf.mxu1 }
 0x436   : > { %v15463_v53 = vpop.f32.mrf.mxu0 }
 0x437   : > { %v19749_v13 = vpop.f32.mrf.mxu1 }
 0x438   : > { %v19751_v6 = vpop.f32.mrf.mxu0 }
 0x439   : > { %v15386_v16 = vpop.f32.mrf.mxu1 }
 0x43a   : > { %v19753_v56 = vpop.f32.mrf.mxu0  ;;  %v15387_v37 = vadd.f32 %v15386_v16, %v15304_v29 }
 0x43b   : > { %v15388_v54 = vpop.f32.mrf.mxu1 }
 0x43c   : > { %v19755_v52 = vpop.f32.mrf.mxu0  ;;  %v15389_v34 = vadd.f32 %v15388_v54, %v15306_v8  ;;  %v15464_v22 = vadd.f32 %v15463_v53, %v15387_v37 }
 0x43d   : > { %v19757_v17 = vpop.f32.mrf.mxu1 }
 0x43e   : > { %v15803_v38 = vpop.f32.mrf.mxu0  ;;  %v15540_v53 = vadd.f32 %v19757_v17, %v15464_v22 }
 0x43f   : > { %v19759_v62 = vpop.f32.mrf.mxu1 }
 0x440   : > { %v15805_v33 = vpop.f32.mrf.mxu0 }
 0x441   : > { %v19761_v9 = vpop.f32.mrf.mxu1 }
 0x442   : > { %v15962_v43 = vpop.f32.mrf.mxu0 }
 0x443   : > { %v19763_v30 = vpop.f32.mrf.mxu1 }
 0x444   : > { %v15964_v47 = vpop.f32.mrf.mxu0 }
 0x445   : > { %v15885_v18 = vpop.f32.mrf.mxu1 }
 0x446   : > { %v16116_v1 = vpop.f32.mrf.mxu0  ;;  %v15886_v40 = vadd.f32 %v15885_v18, %v15803_v38  ;;  %v15153_v38 = vadd.f32 %v15152_v5, %v15075_v27  ;;  %v15466_v5 = vadd.f32 %v19751_v6, %v15389_v34 }
 0x447   : > { %v15887_v36 = vpop.f32.mrf.mxu1 }
 0x448   : > { %v16118_v51 = vpop.f32.mrf.mxu0  ;;  %v15888_v10 = vadd.f32 %v15887_v36, %v15805_v33  ;;  %v15963_v15 = vadd.f32 %v15962_v43, %v15886_v40  ;;  %v15155_v33 = vadd.f32 %v15154_v21, %v15077_v44  ;;  %v15227_v24 = vadd.f32 %v19747_v32, %v15153_v38 }
 0x449   : > { %v16038_v59 = vpop.f32.mrf.mxu1  ;;  %v15542_v6 = vadd.f32 %v19759_v62, %v15466_v5 }
 0x44a   : > { %v16268_v60 = vpop.f32.mrf.mxu0  ;;  %v15965_v23 = vadd.f32 %v15964_v47, %v15888_v10  ;;  %v16039_v45 = vadd.f32 %v16038_v59, %v15963_v15  ;;  %v15229_v10 = vadd.f32 %v19749_v13, %v15155_v33  ;;  %v15696_v32 = vadd.f32 %v15227_v24, %v19739_v11 }
 0x44b   : > { %v16040_v19 = vpop.f32.mrf.mxu1 }
 0x44c   : > { %v16270_v4 = vpop.f32.mrf.mxu0  ;;  %v16041_v35 = vadd.f32 %v16040_v19, %v15965_v23  ;;  %v16117_v43 = vadd.f32 %v16116_v1, %v16039_v45  ;;  %v15697_v13 = vadd.f32 %v15229_v10, %v19741_v12  ;;  %v15620_v12 = vadd.f32 %v19755_v52, %v15542_v6 }
 0x44d   : > { %v16190_v63 = vpop.f32.mrf.mxu1 }
 0x44e   : > { %v16427_v7 = vpop.f32.mrf.mxu0  ;;  %v16119_v59 = vadd.f32 %v16118_v51, %v16041_v35  ;;  %v16191_v54 = vadd.f32 %v16190_v63, %v16117_v43 }
 0x44f   : > { %v16192_v46 = vpop.f32.mrf.mxu1 }
 0x450   : > { %v16429_v14 = vpop.f32.mrf.mxu0  ;;  %v16193_v51 = vadd.f32 %v16192_v46, %v16119_v59 }
 0x451   : > { %v16350_v39 = vpop.f32.mrf.mxu1 }
 0x452   : > { %v19765_v31 = vpop.f32.mrf.mxu0  ;;  %v16351_v28 = vadd.f32 %v16350_v39, %v16268_v60  ;;  %v16661_v11 = vadd.f32 %v16193_v51, %v15697_v13 }
 0x453   : > { %v16352_v25 = vpop.f32.mrf.mxu1 }
 0x454   : > { %v19767_v57 = vpop.f32.mrf.mxu0  ;;  %v16353_v47 = vadd.f32 %v16352_v25, %v16270_v4  ;;  %v16428_v1 = vadd.f32 %v16427_v7, %v16351_v28  ;;  %v16660_v7 = vadd.f32 %v16191_v54, %v15696_v32  ;;  %v15694_v28 = vadd.f32 %v19763_v30, %v15620_v12 }
 0x455   : > { %v16503_v61 = vpop.f32.mrf.mxu1 }
 0x456   : > { %v16767_v41 = vpop.f32.mrf.mxu0  ;;  %v16430_v4 = vadd.f32 %v16429_v14, %v16353_v47  ;;  %v16504_v27 = vadd.f32 %v16503_v61, %v16428_v1  ;;  %v15618_v14 = vadd.f32 %v19753_v56, %v15540_v53  ;;  %v15699_v10 = vadd.f32 %v15694_v28, %v19745_v42 }
 0x457   : > { %v16505_v2 = vpop.f32.mrf.mxu1 }
 0x458   : > { %v16769_v58 = vpop.f32.mrf.mxu0  ;;  %v16506_v44 = vadd.f32 %v16505_v2, %v16430_v4  ;;  %v16582_v38 = vadd.f32 %v19765_v31, %v16504_v27  ;;  %v15692_v61 = vadd.f32 %v19761_v9, %v15618_v14 }
 0x459   : > { %v19769_v3 = vpop.f32.mrf.mxu1 }
 0x45a   : > { %v16926_v55 = vpop.f32.mrf.mxu0  ;;  %v16584_v34 = vadd.f32 %v19767_v57, %v16506_v44  ;;  %v16656_v22 = vadd.f32 %v19769_v3, %v16582_v38  ;;  %v15698_v9 = vadd.f32 %v15692_v61, %v19743_v49 }
 0x45b   : > { %v19771_v26 = vpop.f32.mrf.mxu1 }
 0x45c   : > { %v16928_v20 = vpop.f32.mrf.mxu0  ;;  %v16658_v57 = vadd.f32 %v19771_v26, %v16584_v34  ;;  %v16662_v5 = vadd.f32 %v16656_v22, %v15698_v9 }
 0x45d   : > { %v16849_v18 = vpop.f32.mrf.mxu1 }
 0x45e   : > { %v17080_v36 = vpop.f32.mrf.mxu0  ;;  %v16850_v48 = vadd.f32 %v16849_v18, %v16767_v41  ;;  %v16663_v54 = vadd.f32 %v16658_v57, %v15699_v10 }
 0x45f   : > { %v16851_v50 = vpop.f32.mrf.mxu1 }
 0x460   : > { %v17082_v40 = vpop.f32.mrf.mxu0  ;;  %v16852_v29 = vadd.f32 %v16851_v50, %v16769_v58  ;;  %v16927_v16 = vadd.f32 %v16926_v55, %v16850_v48  ;;  %v17628_v58 = vld [vmem:[%s18059_s14 + $0x8] sm:$0xff] }
 0x461   : > { %v17002_v21 = vpop.f32.mrf.mxu1  ;;  %v17632_v37 = vcombine.high %v17628_v58, %v17628_v58 }
 0x462   : > { %v17232_v8 = vpop.f32.mrf.mxu0  ;;  %v16929_v60 = vadd.f32 %v16928_v20, %v16852_v29  ;;  %v17003_v19 = vadd.f32 %v17002_v21, %v16927_v16  ;;  %v17629_v16 = vld [vmem:[%s18059_s14 + $0x10] sm:$0xff] }
 0x463   : > { %v17004_v39 = vpop.f32.mrf.mxu1  ;;  %v17633_v26 = vcombine.high %v17629_v16, %v17629_v16 }
 0x464   : > { %v17234_v25 = vpop.f32.mrf.mxu0  ;;  %v17005_v0 = vadd.f32 %v17004_v39, %v16929_v60  ;;  %v17081_v41 = vadd.f32 %v17080_v36, %v17003_v19 }
 0x465   : > { %v17154_v15 = vpop.f32.mrf.mxu1 }
 0x466   : > { %v17391_v63 = vpop.f32.mrf.mxu0  ;;  %v17083_v23 = vadd.f32 %v17082_v40, %v17005_v0  ;;  %v17155_v17 = vadd.f32 %v17154_v15, %v17081_v41 }
 0x467   : > { %v17156_v55 = vpop.f32.mrf.mxu1 }
 0x468   : > { %v17624_v46 = vadd.f32 %v17155_v17, %v16660_v7  ;;  %v17157_v45 = vadd.f32 %v17156_v55, %v17083_v23  ;;  %v17393_v62 = vpop.f32.mrf.mxu0 }
 0x469   : > { %v17314_v20 = vpop.f32.mrf.mxu1 }
 0x46a   : > { %v17625_v35 = vadd.f32 %v17157_v45, %v16661_v11  ;;  %v17315_v33 = vadd.f32 %v17314_v20, %v17232_v8  ;;  %v17636_v2 = vadd.f32 %v17628_v58, %v17624_v46  ;;  %v17545_v48 = vpop.f32.mrf.mxu0 }
 0x46b   : > { %v17316_v56 = vpop.f32.mrf.mxu1 }
 0x46c   : > { %v17637_v18 = vadd.f32 %v17632_v37, %v17625_v35  ;;  %v17317_v36 = vadd.f32 %v17316_v56, %v17234_v25  ;;  %v17392_v43 = vadd.f32 %v17391_v63, %v17315_v33  ;;  %v17547_v29 = vpop.f32.mrf.mxu0 }
 0x46d   : > { %v17467_v52 = vpop.f32.mrf.mxu1 }
 0x46e   : > { %v17644_v31 = vcombine.low %v17636_v2, %v17637_v18  ;;  %v17394_v47 = vadd.f32 %v17393_v62, %v17317_v36  ;;  %v17468_v50 = vadd.f32 %v17467_v52, %v17392_v43 }
 0x46f   : > { %v17469_v40 = vpop.f32.mrf.mxu1 }
 0x470   : > { %v17470_v24 = vadd.f32 %v17469_v40, %v17394_v47  ;;  %v17546_v59 = vadd.f32 %v17545_v48, %v17468_v50  ;;  %17648 = vst [vmem:[%s213_s26] sm:$0xff] %v17644_v31 }
 0x471   : > { %v17619_v30 = vpop.f32.mrf.mxu1 }
 0x472   : > { %v17548_v3 = vadd.f32 %v17547_v29, %v17470_v24  ;;  %v17620_v21 = vadd.f32 %v17619_v30, %v17546_v59 }
 0x473   : > { %v17621_v8 = vpop.f32.mrf.mxu1 }
 0x474   : > { %v17626_v49 = vadd.f32 %v17620_v21, %v16662_v5  ;;  %v17622_v1 = vadd.f32 %v17621_v8, %v17548_v3 }
 0x476   : > { %v17627_v60 = vadd.f32 %v17622_v1, %v16663_v54  ;;  %v17638_v19 = vadd.f32 %v17629_v16, %v17626_v49 }
 0x478   : > { %v17639_v53 = vadd.f32 %v17633_v26, %v17627_v60 }
 0x47a   : > { %v17645_v4 = vcombine.low %v17638_v19, %v17639_v53 }
 0x47c   : > { %17649 = vst [vmem:[%s213_s26 + $0x8] sm:$0xff] %v17645_v4 }
 0x47d   : > { %17867 = shalt.err (!%p17864_p10)
}
 0x47e   : > { %s17868_s5 = scalar_lea.hbm %s17663_s20, 256  ;;  %s17872_s9 = scalar_lea.hbm %s19832_s4, 512 }
 0x47f   : > { %p17869_p2 = scmp.ne.s32.totalorder %s17663_s20, %s17868_s5  ;;  %p17873_p7 = scmp.lt.s32.totalorder %s17663_s20, %s19832_s4 }
 0x480   : > { %p17874_p0 = scmp.lt.s32.totalorder %s17872_s9, %s17868_s5 }
 0x481   : > { %p17870_p4 = pnand %p17869_p2, %p20084_p12 }
 0x482   : > { %p17875_p6 = por %p17874_p0, %p17873_p7 }
 0x483   : > { %p17871_p9 = pneg %p17870_p4 }
 0x485   : > { %p17876_p11 = pnand %p17875_p6, %p17871_p9 }
 0x487   : > { %17879 = shalt.err (!%p17876_p11)
}
 0x488   : > { %17753 = dma.vmem_to_hbm [thread:$0]  (%p20084_p12), %s17666_s11, 256, %s17663_s20, %s17651_s22  }
 0x489 PF: > { %s17677_s8 = sand.u32 1, %s17906_s15   ;;  %p20085_p13 = scmp.ne.s32.totalorder %s19913_s28, 0 }
 0x48a   : > { %p20086_p1 = scmp.ge.s32.totalorder %s17918_s18, 2  ;;  %s17678_s26 = scalar_lea.sflag [#allocation5], %s17677_s8 }
 0x48c   : > { %p17760_p3 = pnand %p20086_p1, %p20085_p13 }
 0x48e   : > { %p17761_p5 = pneg %p17760_p3 }
 0x490   : > { %17901 = dma.done.wait (%p17761_p5), %s17678_s26, 256  }
 0x491   : > { %17903 = vsyncadd (%p17761_p5), %s17678_s26, 4294967040  ;;  %p17_p8 = scmp.ge.s32.totalorder %s17982_s21, 4   ;;  %s20087_s15 = smov %s17910_s16 }
 0x492   : > { %s20088_s16 = smov %s17914_s17  ;;  %s20089_s17 = smov %s17994_s24 }
 0x493   : > { %s20090_s18 = smov %s17982_s21  ;;  %19 = sbr.rel (!%p17_p8) target bundleno = 5 (0x5), region = 81 }
 0x498   :  { %17683 = vsyncpa [#allocation4], 1 }
 0x499   :  { %17685 = vsyncpa [#allocation4 + $0x1], 1 }
 0x49a   :  { %17686 = vsyncpa [#allocation5], 1 }
 0x49b   :  { %17688 = vsyncpa [#allocation5 + $0x1], 1 }

</bundles_post_ra>
